<compile_context>
chip_gen: v5e
topology: v5e:2x2
jax: 0.10.0
libtpu: 0.0.40
codegen_flags: <defaults>
</compile_context>

<pallas_src>
import functools
import math

import jax
import jax.numpy as jnp
import numpy as np
from jax.experimental import pallas as pl
from jax.experimental.pallas import tpu as pltpu


_VMEM = pl.BlockSpec(memory_space=pltpu.MemorySpace.VMEM)

# --------------------------------------------------------------------------- #
# In-kernel helpers
# --------------------------------------------------------------------------- #
_ERF_P = 0.3275911
_ERF_A = (0.254829592, -0.284496736, 1.421413741, -1.453152027, 1.061405429)


def _gelu_erf(x):
    # Exact (erf-based) GELU.  erf via Abramowitz & Stegun 7.1.26 polynomial
    # (max abs error ~1.5e-7, i.e. float32-exact).
    # TODO(synk): switch to lax.erf if/when a Mosaic lowering is guaranteed.
    z = x * np.float32(1.0 / math.sqrt(2.0))
    az = jnp.abs(z)
    t = 1.0 / (1.0 + _ERF_P * az)
    a1, a2, a3, a4, a5 = _ERF_A
    poly = t * (a1 + t * (a2 + t * (a3 + t * (a4 + t * a5))))
    erf_abs = 1.0 - poly * jnp.exp(-az * az)
    erf = jnp.where(z >= 0, erf_abs, -erf_abs)
    return 0.5 * x * (1.0 + erf)


def _layernorm(v, g, b, eps):
    # torch.nn.LayerNorm semantics (biased variance).
    mu = jnp.mean(v, axis=-1, keepdims=True)
    c = v - mu
    var = jnp.mean(c * c, axis=-1, keepdims=True)
    return c * jax.lax.rsqrt(var + eps) * g + b


# --------------------------------------------------------------------------- #
# Kernel 1: embedding + full encoder stack + final LayerNorm (one call)
# --------------------------------------------------------------------------- #
def _encoder_kernel(x_ref, hm_ref, bias_ref, embw_ref, embb_ref,
                    ln1g_ref, ln1b_ref, wq_ref, bq_ref, wk_ref, bk_ref,
                    wv_ref, bv_ref, wo_ref, bo_ref, ln2g_ref, ln2b_ref,
                    w1_ref, b1_ref, w2_ref, b2_ref, flng_ref, flnb_ref,
                    o_ref, *, n_layers, num_heads, scale, eps):
    # att_embeddings_nope
    x = (jnp.dot(x_ref[...], embw_ref[...], preferred_element_type=jnp.float32)
         + embb_ref[...])                                     # (N, H)
    bias = bias_ref[...]                                      # (N, N) 0 / -1e30

    for li in range(n_layers):                                # unrolled
        # ---------------- self-attention block (pre-LN) ---------------- #
        y = _layernorm(x, ln1g_ref[li], ln1b_ref[li], eps)
        q = (jnp.dot(y, wq_ref[li], preferred_element_type=jnp.float32)
             + bq_ref[li]) * scale
        k = jnp.dot(y, wk_ref[li], preferred_element_type=jnp.float32) + bk_ref[li]
        v = jnp.dot(y, wv_ref[li], preferred_element_type=jnp.float32) + bv_ref[li]

        attn = jnp.zeros_like(x)
        for h in range(num_heads):
            m = hm_ref[h:h + 1, :]                            # (1, H) head-h mask
            # scores_h = Q_h K_h^T : masking Q's columns restricts the
            # contraction to head h's hidden slice (no lane slicing needed).
            s = jax.lax.dot_general(q * m, k, (((1,), (1,)), ((), ())),
                                    preferred_element_type=jnp.float32) + bias
            smax = jnp.max(s, axis=-1, keepdims=True)
            e = jnp.exp(s - smax)
            den = jnp.sum(e, axis=-1, keepdims=True)
            p = e * pl.reciprocal(den, approx=True)           # softmax over keys
            # P_h @ (V .* mask_h) lands head-h output in head-h's columns.
            attn = attn + jnp.dot(p, v * m, preferred_element_type=jnp.float32)

        x = x + jnp.dot(attn, wo_ref[li], preferred_element_type=jnp.float32) + bo_ref[li]

        # ---------------- feed-forward block (pre-LN) ------------------ #
        y = _layernorm(x, ln2g_ref[li], ln2b_ref[li], eps)
        h1 = _gelu_erf(jnp.dot(y, w1_ref[li], preferred_element_type=jnp.float32)
                       + b1_ref[li])
        x = x + jnp.dot(h1, w2_ref[li], preferred_element_type=jnp.float32) + b2_ref[li]

    # final LayerNorm fused here
    x = _layernorm(x, flng_ref[...], flnb_ref[...], eps)
    o_ref[...] = x.astype(o_ref.dtype)


def encoder_forward(x2, p, head_mask, attn_bias, *, n_layers, num_heads, scale):
    n = x2.shape[0]
    hid = p["emb_w"].shape[1]
    args = [x2, head_mask, attn_bias, p["emb_w"], p["emb_b"],
            p["ln1_g"], p["ln1_b"], p["wq"], p["bq"], p["wk"], p["bk"],
            p["wv"], p["bv"], p["wo"], p["bo"], p["ln2_g"], p["ln2_b"],
            p["w1"], p["b1"], p["w2"], p["b2"], p["fln_g"], p["fln_b"]]
    kernel = functools.partial(_encoder_kernel, n_layers=n_layers,
                               num_heads=num_heads, scale=scale, eps=1e-5)
    return pl.pallas_call(
        kernel,
        out_shape=jax.ShapeDtypeStruct((n, hid), jnp.float32),
        in_specs=[_VMEM] * len(args),
        out_specs=_VMEM,
    )(*args)


# --------------------------------------------------------------------------- #
# Kernel 2: whole CNN head + node concat + final FC (one call)
# --------------------------------------------------------------------------- #
def _cnn_head_kernel(patches_ref, w1_ref, b1_ref, pool1_ref, s2_ref,
                     w2_ref, b2_ref, pool2_ref, wfc_ref, bfc_ref,
                     enc_ref, nsel_ref, fcwn_ref, fcwf_ref, fcb_ref,
                     o_ref, p2_scr, *, batch, c1, c2, dff):
    # conv1 (im2col matmul) + ReLU -> (B*220, c1), rows ordered (b, y*Wo+x)
    a1 = jnp.dot(patches_ref[...], w1_ref[...], preferred_element_type=jnp.float32)
    a1 = jnp.maximum(a1 + b1_ref[...], 0.0)
    # adaptive 3x3 avg pool #1 (block-diag pooling matrix) -> (B*9, c1), rows (b, s)
    p1 = jnp.dot(pool1_ref[...], a1, preferred_element_type=jnp.float32)

    # conv2 (3x3, padding 2 on the 3x3 pooled map -> 5x5 output) computed as
    # 9 tap-selection matmuls: out += (S_t @ pooled1) @ W2_t.  No im2col.
    acc = jnp.zeros((batch * 25, c2), jnp.float32)
    for t in range(9):
        sh = jnp.dot(s2_ref[t], p1, preferred_element_type=jnp.float32)   # (B*25, c1)
        acc = acc + jnp.dot(sh, w2_ref[t * c1:(t + 1) * c1, :],
                            preferred_element_type=jnp.float32)
    a2 = jnp.maximum(acc + b2_ref[...], 0.0)                  # (B*25, c2), rows (b, p)

    # adaptive 3x3 avg pool #2; pooling matrix reorders rows to (pool-pos s, b)
    p2_scr[...] = jnp.dot(pool2_ref[...], a2, preferred_element_type=jnp.float32)

    # cnn fc (576 -> 512): sum over the 9 pool positions of (B, c2) @ (c2, dff)
    fea = jnp.zeros((batch, dff), jnp.float32)
    for s in range(9):
        fea = fea + jnp.dot(p2_scr[s * batch:(s + 1) * batch, :],
                            wfc_ref[s * c2:(s + 1) * c2, :],
                            preferred_element_type=jnp.float32)
    fea = fea + bfc_ref[...]                                  # (B, dff)

    # node = output[:, 0, :] via selection matmul; concat + FC(532->1) folded
    # into two matmuls on the split FC weight.
    node = jnp.dot(nsel_ref[...], enc_ref[...], preferred_element_type=jnp.float32)
    out = (jnp.dot(node, fcwn_ref[...], preferred_element_type=jnp.float32)
           + jnp.dot(fea, fcwf_ref[...], preferred_element_type=jnp.float32)
           + fcb_ref[...])                                    # (B, 1)
    o_ref[...] = out.astype(o_ref.dtype)


def cnn_head(patches1, p, pool1, s2, pool2, enc_out, node_sel, *, batch):
    c1 = p["conv1_wmat"].shape[1]
    c2 = p["conv2_w9"].shape[1]
    dff = p["cnn_fc_w"].shape[1]
    args = [patches1, p["conv1_wmat"], p["conv1_b"], pool1, s2,
            p["conv2_w9"], p["conv2_b"], pool2, p["cnn_fc_w"], p["cnn_fc_b"],
            enc_out, node_sel, p["fc_w_node"], p["fc_w_fea"], p["fc_b"]]
    kernel = functools.partial(_cnn_head_kernel, batch=batch, c1=c1, c2=c2, dff=dff)
    return pl.pallas_call(
        kernel,
        out_shape=jax.ShapeDtypeStruct((batch, 1), jnp.float32),
        in_specs=[_VMEM] * len(args),
        out_specs=_VMEM,
        scratch_shapes=[pltpu.VMEM((9 * batch, c2), jnp.float32)],
    )(*args)


# --------------------------------------------------------------------------- #
# Trace-time constants & XLA glue
# --------------------------------------------------------------------------- #
def _pool_matrix(in_size, out_size=3):
    """Averaging matrix reproducing torch.nn.AdaptiveAvgPool2d's window rule."""
    m = np.zeros((out_size, in_size), np.float32)
    for i in range(out_size):
        s = (i * in_size) // out_size
        e = -((-(i + 1) * in_size) // out_size)        # ceil((i+1)*in/out)
        m[i, s:e] = 1.0 / (e - s)
    return m


def _pool2d_matrix(h, w):
    """(9, h*w): pooled[oy*3+ox] = sum_{y,x} M[., y*w+x] * plane[y, x]."""
    ph = _pool_matrix(h)
    pw = _pool_matrix(w)
    return np.einsum("ay,bx->abyx", ph, pw).reshape(9, h * w)


def _conv2_tap_selectors(batch):
    """(9, B*25, B*9): for tap t=(dy,dx), 0/1 matrix mapping pooled1 rows
    (b, yi*3+xi) to conv2-output rows (b, yo*5+xo) (kernel 3x3, padding 2)."""
    s2 = np.zeros((9, batch * 25, batch * 9), np.float32)
    for dy in range(3):
        for dx in range(3):
            t = dy * 3 + dx
            for yo in range(5):
                for xo in range(5):
                    yi, xi = yo + dy - 2, xo + dx - 2
                    if 0 <= yi < 3 and 0 <= xi < 3:
                        for b in range(batch):
                            s2[t, b * 25 + yo * 5 + xo, b * 9 + yi * 3 + xi] = 1.0
    return s2


def _attention_constants(batch, seq, hidden, num_heads):
    n = batch * seq
    dk = hidden // num_heads
    hm = np.zeros((num_heads, hidden), np.float32)
    for h in range(num_heads):
        hm[h, h * dk:(h + 1) * dk] = 1.0
    bid = np.arange(n) // seq
    bias = np.where(bid[:, None] == bid[None, :], 0.0, -1e30).astype(np.float32)
    return jnp.asarray(hm), jnp.asarray(bias)


def _im2col_3x3(x_nhwc, pad=2):
    """3x3, stride-1, padding-2 patch extraction (tiny; left in XLA glue)."""
    b, h, w, cin = x_nhwc.shape
    xp = jnp.pad(x_nhwc, ((0, 0), (pad, pad), (pad, pad), (0, 0)))
    ho = h + 2 * pad - 2
    wo = w + 2 * pad - 2
    patches = jnp.stack(
        [xp[:, dy:dy + ho, dx:dx + wo, :] for dy in range(3) for dx in range(3)],
        axis=-1)                                        # (B, Ho, Wo, Cin, 9)
    return patches.reshape(b * ho * wo, cin * 9), ho, wo


# --------------------------------------------------------------------------- #
# Full forward
# --------------------------------------------------------------------------- #
def tecnn_forward(batched_data, params, *, num_heads):
    b, s, din = batched_data.shape
    hid = params["emb_w"].shape[1]
    n = b * s
    dk = hid // num_heads
    n_layers = params["wq"].shape[0]

    head_mask, attn_bias = _attention_constants(b, s, hid, num_heads)

    # Kernel 1: embedding + encoder stack + final LayerNorm.
    enc_out = encoder_forward(batched_data.reshape(n, din), params,
                              head_mask, attn_bias,
                              n_layers=n_layers, num_heads=num_heads,
                              scale=dk ** -0.5)                 # (N, hid)

    # ---------------- CNN head constants (trace-time numpy) ---------------- #
    # conv1 on the (seq, hidden) "image" with 1 input channel.
    patches1, ho1, wo1 = _im2col_3x3(enc_out.reshape(b, s, hid)[..., None])
    pool1 = jnp.asarray(np.kron(np.eye(b, dtype=np.float32),
                                _pool2d_matrix(ho1, wo1)))      # (B*9, B*Ho*Wo)
    s2 = jnp.asarray(_conv2_tap_selectors(b))                   # (9, B*25, B*9)
    p2m = _pool2d_matrix(5, 5)                                  # conv2 output is 5x5
    pool2 = np.zeros((9 * b, b * 25), np.float32)               # rows ordered (s, b)
    for bb in range(b):
        pool2[np.arange(9) * b + bb, bb * 25:(bb + 1) * 25] = p2m
    pool2 = jnp.asarray(pool2)
    node_sel = np.zeros((b, n), np.float32)                     # picks output[:, 0, :]
    node_sel[np.arange(b), np.arange(b) * s] = 1.0
    node_sel = jnp.asarray(node_sel)

    # Kernel 2: conv1 + pool + conv2 + pool + cnn fc + concat + FC.
    return cnn_head(patches1, params, pool1, s2, pool2, enc_out, node_sel, batch=b)


# --------------------------------------------------------------------------- #
# Deterministic parameter construction (synthetic, mirrors __init__ shapes)
# --------------------------------------------------------------------------- #
def init_tecnn_params(key, *, input_dim, hidden_dim, ffn_dim, n_layers, num_heads):
    del num_heads
    std = 0.02 / math.sqrt(n_layers)

    def nrm(k, shape, s):
        return jax.random.normal(k, shape, jnp.float32) * s

    keys = iter(jax.random.split(key, 32))
    L, H, F = n_layers, hidden_dim, ffn_dim
    p = {}
    p["emb_w"] = nrm(next(keys), (input_dim, H), std)
    p["emb_b"] = jnp.zeros((1, H), jnp.float32)
    # Encoder weights, layer-stacked (leading dim = n_layers).
    p["ln1_g"] = jnp.ones((L, 1, H), jnp.float32)
    p["ln1_b"] = jnp.zeros((L, 1, H), jnp.float32)
    p["wq"] = nrm(next(keys), (L, H, H), std)
    p["bq"] = jnp.zeros((L, 1, H), jnp.float32)
    p["wk"] = nrm(next(keys), (L, H, H), std)
    p["bk"] = jnp.zeros((L, 1, H), jnp.float32)
    p["wv"] = nrm(next(keys), (L, H, H), std)
    p["bv"] = jnp.zeros((L, 1, H), jnp.float32)
    p["wo"] = nrm(next(keys), (L, H, H), std)
    p["bo"] = jnp.zeros((L, 1, H), jnp.float32)
    p["ln2_g"] = jnp.ones((L, 1, H), jnp.float32)
    p["ln2_b"] = jnp.zeros((L, 1, H), jnp.float32)
    p["w1"] = nrm(next(keys), (L, H, F), std)
    p["b1"] = jnp.zeros((L, 1, F), jnp.float32)
    p["w2"] = nrm(next(keys), (L, F, H), std)
    p["b2"] = jnp.zeros((L, 1, H), jnp.float32)
    p["fln_g"] = jnp.ones((1, H), jnp.float32)
    p["fln_b"] = jnp.zeros((1, H), jnp.float32)

    # CNN head weights: generated in torch layout, converted (once, eagerly)
    # to the matmul-ready layouts the kernel consumes.
    w1t = nrm(next(keys), (32, 1, 3, 3), 0.1)            # conv1.weight
    p["conv1_wmat"] = w1t.reshape(32, 9).T               # (9, 32), rows t=dy*3+dx
    p["conv1_b"] = nrm(next(keys), (1, 32), 0.1)
    w2t = nrm(next(keys), (64, 32, 3, 3), 0.05)          # conv2.weight
    # conv2_w9[t*32 + ci, co] = w2t[co, ci, dy, dx]
    p["conv2_w9"] = jnp.transpose(w2t.reshape(64, 32, 9), (2, 1, 0)).reshape(288, 64)
    p["conv2_b"] = nrm(next(keys), (1, 64), 0.05)
    fcw = nrm(next(keys), (512, 576), 0.02)              # cnn.fc.weight
    # rows permuted from the NCHW flatten order (c*9+s) to pool-position-major (s*64+c)
    p["cnn_fc_w"] = jnp.transpose(fcw.reshape(512, 64, 9), (2, 1, 0)).reshape(576, 512)
    p["cnn_fc_b"] = jnp.zeros((1, 512), jnp.float32)
    fc = nrm(next(keys), (1, H + 512), 0.02)             # FC = Linear(532, 1)
    p["fc_w_node"] = fc[:, :H].T                         # (H, 1)
    p["fc_w_fea"] = fc[:, H:].T                          # (512, 1)
    p["fc_b"] = jnp.zeros((1, 1), jnp.float32)
    # out_proj / attn_layer / Linear1 / scaling exist in __init__ but are unused
    # in forward(), so they are not materialized.
    return p


# --------------------------------------------------------------------------- #
if __name__ == "__main__":
    hops = 7
    seq_len = hops + 1        # 8
    input_dim = 16
    hidden_dim = 20           # FC = Linear(532, 1) implies hidden_dim + 512 == 532
    ffn_dim = 32
    n_layers = 2
    num_heads = 4             # att_size = 5
    batch = 2

    key = jax.random.PRNGKey(0)
    pkey, xkey = jax.random.split(key)
    params = init_tecnn_params(pkey, input_dim=input_dim, hidden_dim=hidden_dim,
                               ffn_dim=ffn_dim, n_layers=n_layers,
                               num_heads=num_heads)
    batched_data = jax.random.normal(xkey, (batch, seq_len, input_dim), jnp.float32)

    fwd = jax.jit(functools.partial(tecnn_forward, num_heads=num_heads))
    y = fwd(batched_data, params)
    jax.block_until_ready(y)
    assert y.shape == (batch, 1) and y.dtype == jnp.float32
    print("KERNEL_OK")
</pallas_src>

<mosaic_0001>
module attributes {stable_mosaic.version = 11 : i64} {
  func.func @_encoder_kernel(%arg0: memref<16x16xf32, #tpu.memory_space<vmem>>, %arg1: memref<4x20xf32, #tpu.memory_space<vmem>>, %arg2: memref<16x16xf32, #tpu.memory_space<vmem>>, %arg3: memref<16x20xf32, #tpu.memory_space<vmem>>, %arg4: memref<1x20xf32, #tpu.memory_space<vmem>>, %arg5: memref<2x1x20xf32, #tpu.memory_space<vmem>>, %arg6: memref<2x1x20xf32, #tpu.memory_space<vmem>>, %arg7: memref<2x20x20xf32, #tpu.memory_space<vmem>>, %arg8: memref<2x1x20xf32, #tpu.memory_space<vmem>>, %arg9: memref<2x20x20xf32, #tpu.memory_space<vmem>>, %arg10: memref<2x1x20xf32, #tpu.memory_space<vmem>>, %arg11: memref<2x20x20xf32, #tpu.memory_space<vmem>>, %arg12: memref<2x1x20xf32, #tpu.memory_space<vmem>>, %arg13: memref<2x20x20xf32, #tpu.memory_space<vmem>>, %arg14: memref<2x1x20xf32, #tpu.memory_space<vmem>>, %arg15: memref<2x1x20xf32, #tpu.memory_space<vmem>>, %arg16: memref<2x1x20xf32, #tpu.memory_space<vmem>>, %arg17: memref<2x20x32xf32, #tpu.memory_space<vmem>>, %arg18: memref<2x1x32xf32, #tpu.memory_space<vmem>>, %arg19: memref<2x32x20xf32, #tpu.memory_space<vmem>>, %arg20: memref<2x1x20xf32, #tpu.memory_space<vmem>>, %arg21: memref<1x20xf32, #tpu.memory_space<vmem>>, %arg22: memref<1x20xf32, #tpu.memory_space<vmem>>, %arg23: memref<16x20xf32, #tpu.memory_space<vmem>>) attributes {dimension_semantics = [], scalar_prefetch = 0 : i64, scratch_operands = 0 : i64, tpu.core_type = #tpu.core_type<tc>} {
    %c0 = arith.constant 0 : index
    %c0_0 = arith.constant 0 : index
    %0 = vector.load %arg0[%c0, %c0_0] : memref<16x16xf32, #tpu.memory_space<vmem>>, vector<16x16xf32>
    %c0_1 = arith.constant 0 : index
    %c0_2 = arith.constant 0 : index
    %1 = vector.load %arg3[%c0_1, %c0_2] : memref<16x20xf32, #tpu.memory_space<vmem>>, vector<16x20xf32>
    %cst = arith.constant dense<0.000000e+00> : vector<16x20xf32>
    %2 = tpu.matmul %0, %1, %cst {dimension_numbers = #tpu.dot_dimension_numbers<[1], [0], [0], [1], [0, 0, 1, 1], [], []>} : vector<16x16xf32>, vector<16x20xf32>, vector<16x20xf32> -> vector<16x20xf32>
    %c0_3 = arith.constant 0 : index
    %c0_4 = arith.constant 0 : index
    %3 = vector.load %arg4[%c0_3, %c0_4] : memref<1x20xf32, #tpu.memory_space<vmem>>, vector<1x20xf32>
    %4 = vector.broadcast %3 : vector<1x20xf32> to vector<16x20xf32>
    %5 = arith.addf %2, %4 : vector<16x20xf32>
    %c0_5 = arith.constant 0 : index
    %c0_6 = arith.constant 0 : index
    %6 = vector.load %arg2[%c0_5, %c0_6] : memref<16x16xf32, #tpu.memory_space<vmem>>, vector<16x16xf32>
    %c0_7 = arith.constant 0 : index
    %c0_8 = arith.constant 0 : index
    %c0_9 = arith.constant 0 : index
    %7 = vector.load %arg5[%c0_7, %c0_8, %c0_9] : memref<2x1x20xf32, #tpu.memory_space<vmem>>, vector<1x1x20xf32>
    %8 = vector.shape_cast %7 : vector<1x1x20xf32> to vector<1x20xf32>
    %c0_10 = arith.constant 0 : index
    %c0_11 = arith.constant 0 : index
    %c0_12 = arith.constant 0 : index
    %9 = vector.load %arg6[%c0_10, %c0_11, %c0_12] : memref<2x1x20xf32, #tpu.memory_space<vmem>>, vector<1x1x20xf32>
    %10 = vector.shape_cast %9 : vector<1x1x20xf32> to vector<1x20xf32>
    %cst_13 = arith.constant dense<0.000000e+00> : vector<16xf32>
    %11 = vector.multi_reduction <add>, %5, %cst_13 [1] : vector<16x20xf32> to vector<16xf32>
    %12 = vector.shape_cast %11 : vector<16xf32> to vector<16x1xf32>
    %cst_14 = arith.constant 2.000000e+01 : f32
    %13 = vector.broadcast %cst_14 : f32 to vector<16x1xf32>
    %14 = arith.divf %12, %13 : vector<16x1xf32>
    %15 = vector.broadcast %14 : vector<16x1xf32> to vector<16x20xf32>
    %16 = arith.subf %5, %15 : vector<16x20xf32>
    %17 = arith.mulf %16, %16 : vector<16x20xf32>
    %cst_15 = arith.constant dense<0.000000e+00> : vector<16xf32>
    %18 = vector.multi_reduction <add>, %17, %cst_15 [1] : vector<16x20xf32> to vector<16xf32>
    %19 = vector.shape_cast %18 : vector<16xf32> to vector<16x1xf32>
    %cst_16 = arith.constant 2.000000e+01 : f32
    %20 = vector.broadcast %cst_16 : f32 to vector<16x1xf32>
    %21 = arith.divf %19, %20 : vector<16x1xf32>
    %cst_17 = arith.constant 9.99999974E-6 : f32
    %22 = vector.broadcast %cst_17 : f32 to vector<16x1xf32>
    %23 = arith.addf %21, %22 : vector<16x1xf32>
    %24 = math.rsqrt %23 : vector<16x1xf32>
    %25 = vector.broadcast %24 : vector<16x1xf32> to vector<16x20xf32>
    %26 = arith.mulf %16, %25 : vector<16x20xf32>
    %27 = vector.broadcast %8 : vector<1x20xf32> to vector<16x20xf32>
    %28 = arith.mulf %26, %27 : vector<16x20xf32>
    %29 = vector.broadcast %10 : vector<1x20xf32> to vector<16x20xf32>
    %30 = arith.addf %28, %29 : vector<16x20xf32>
    %c0_18 = arith.constant 0 : index
    %c0_19 = arith.constant 0 : index
    %c0_20 = arith.constant 0 : index
    %31 = vector.load %arg7[%c0_18, %c0_19, %c0_20] : memref<2x20x20xf32, #tpu.memory_space<vmem>>, vector<1x20x20xf32>
    %32 = vector.shape_cast %31 : vector<1x20x20xf32> to vector<20x20xf32>
    %cst_21 = arith.constant dense<0.000000e+00> : vector<16x20xf32>
    %33 = tpu.matmul %30, %32, %cst_21 {dimension_numbers = #tpu.dot_dimension_numbers<[1], [0], [0], [1], [0, 0, 1, 1], [], []>} : vector<16x20xf32>, vector<20x20xf32>, vector<16x20xf32> -> vector<16x20xf32>
    %c0_22 = arith.constant 0 : index
    %c0_23 = arith.constant 0 : index
    %c0_24 = arith.constant 0 : index
    %34 = vector.load %arg8[%c0_22, %c0_23, %c0_24] : memref<2x1x20xf32, #tpu.memory_space<vmem>>, vector<1x1x20xf32>
    %35 = vector.shape_cast %34 : vector<1x1x20xf32> to vector<1x20xf32>
    %36 = vector.broadcast %35 : vector<1x20xf32> to vector<16x20xf32>
    %37 = arith.addf %33, %36 : vector<16x20xf32>
    %cst_25 = arith.constant 0.44721359 : f32
    %38 = vector.broadcast %cst_25 : f32 to vector<16x20xf32>
    %39 = arith.mulf %37, %38 : vector<16x20xf32>
    %c0_26 = arith.constant 0 : index
    %c0_27 = arith.constant 0 : index
    %c0_28 = arith.constant 0 : index
    %40 = vector.load %arg9[%c0_26, %c0_27, %c0_28] : memref<2x20x20xf32, #tpu.memory_space<vmem>>, vector<1x20x20xf32>
    %41 = vector.shape_cast %40 : vector<1x20x20xf32> to vector<20x20xf32>
    %cst_29 = arith.constant dense<0.000000e+00> : vector<16x20xf32>
    %42 = tpu.matmul %30, %41, %cst_29 {dimension_numbers = #tpu.dot_dimension_numbers<[1], [0], [0], [1], [0, 0, 1, 1], [], []>} : vector<16x20xf32>, vector<20x20xf32>, vector<16x20xf32> -> vector<16x20xf32>
    %c0_30 = arith.constant 0 : index
    %c0_31 = arith.constant 0 : index
    %c0_32 = arith.constant 0 : index
    %43 = vector.load %arg10[%c0_30, %c0_31, %c0_32] : memref<2x1x20xf32, #tpu.memory_space<vmem>>, vector<1x1x20xf32>
    %44 = vector.shape_cast %43 : vector<1x1x20xf32> to vector<1x20xf32>
    %45 = vector.broadcast %44 : vector<1x20xf32> to vector<16x20xf32>
    %46 = arith.addf %42, %45 : vector<16x20xf32>
    %c0_33 = arith.constant 0 : index
    %c0_34 = arith.constant 0 : index
    %c0_35 = arith.constant 0 : index
    %47 = vector.load %arg11[%c0_33, %c0_34, %c0_35] : memref<2x20x20xf32, #tpu.memory_space<vmem>>, vector<1x20x20xf32>
    %48 = vector.shape_cast %47 : vector<1x20x20xf32> to vector<20x20xf32>
    %cst_36 = arith.constant dense<0.000000e+00> : vector<16x20xf32>
    %49 = tpu.matmul %30, %48, %cst_36 {dimension_numbers = #tpu.dot_dimension_numbers<[1], [0], [0], [1], [0, 0, 1, 1], [], []>} : vector<16x20xf32>, vector<20x20xf32>, vector<16x20xf32> -> vector<16x20xf32>
    %c0_37 = arith.constant 0 : index
    %c0_38 = arith.constant 0 : index
    %c0_39 = arith.constant 0 : index
    %50 = vector.load %arg12[%c0_37, %c0_38, %c0_39] : memref<2x1x20xf32, #tpu.memory_space<vmem>>, vector<1x1x20xf32>
    %51 = vector.shape_cast %50 : vector<1x1x20xf32> to vector<1x20xf32>
    %52 = vector.broadcast %51 : vector<1x20xf32> to vector<16x20xf32>
    %53 = arith.addf %49, %52 : vector<16x20xf32>
    %cst_40 = arith.constant 0.000000e+00 : f32
    %54 = vector.broadcast %cst_40 : f32 to vector<16x20xf32>
    %c0_41 = arith.constant 0 : index
    %c0_42 = arith.constant 0 : index
    %55 = vector.load %arg1[%c0_41, %c0_42] : memref<4x20xf32, #tpu.memory_space<vmem>>, vector<1x20xf32>
    %56 = vector.broadcast %55 : vector<1x20xf32> to vector<16x20xf32>
    %57 = arith.mulf %39, %56 : vector<16x20xf32>
    %cst_43 = arith.constant dense<0.000000e+00> : vector<16x16xf32>
    %58 = tpu.matmul %57, %46, %cst_43 {dimension_numbers = #tpu.dot_dimension_numbers<[1], [1], [0], [0], [0, 0, 1, 0], [], []>} : vector<16x20xf32>, vector<16x20xf32>, vector<16x16xf32> -> vector<16x16xf32>
    %59 = arith.addf %58, %6 : vector<16x16xf32>
    %cst_44 = arith.constant dense<0xFF800000> : vector<16xf32>
    %60 = vector.multi_reduction <maximumf>, %59, %cst_44 [1] : vector<16x16xf32> to vector<16xf32>
    %61 = vector.shape_cast %60 : vector<16xf32> to vector<16x1xf32>
    %62 = vector.broadcast %61 : vector<16x1xf32> to vector<16x16xf32>
    %63 = arith.subf %59, %62 : vector<16x16xf32>
    %64 = math.exp %63 : vector<16x16xf32>
    %cst_45 = arith.constant dense<0.000000e+00> : vector<16xf32>
    %65 = vector.multi_reduction <add>, %64, %cst_45 [1] : vector<16x16xf32> to vector<16xf32>
    %66 = vector.shape_cast %65 : vector<16xf32> to vector<16x1xf32>
    %67 = tpu.reciprocal %66 {approx = true} : vector<16x1xf32> -> vector<16x1xf32>
    %68 = vector.broadcast %67 : vector<16x1xf32> to vector<16x16xf32>
    %69 = arith.mulf %64, %68 : vector<16x16xf32>
    %70 = vector.broadcast %55 : vector<1x20xf32> to vector<16x20xf32>
    %71 = arith.mulf %53, %70 : vector<16x20xf32>
    %cst_46 = arith.constant dense<0.000000e+00> : vector<16x20xf32>
    %72 = tpu.matmul %69, %71, %cst_46 {dimension_numbers = #tpu.dot_dimension_numbers<[1], [0], [0], [1], [0, 0, 1, 1], [], []>} : vector<16x16xf32>, vector<16x20xf32>, vector<16x20xf32> -> vector<16x20xf32>
    %73 = arith.addf %54, %72 : vector<16x20xf32>
    %c1 = arith.constant 1 : index
    %c0_47 = arith.constant 0 : index
    %74 = vector.load %arg1[%c1, %c0_47] : memref<4x20xf32, #tpu.memory_space<vmem>>, vector<1x20xf32>
    %75 = vector.broadcast %74 : vector<1x20xf32> to vector<16x20xf32>
    %76 = arith.mulf %39, %75 : vector<16x20xf32>
    %cst_48 = arith.constant dense<0.000000e+00> : vector<16x16xf32>
    %77 = tpu.matmul %76, %46, %cst_48 {dimension_numbers = #tpu.dot_dimension_numbers<[1], [1], [0], [0], [0, 0, 1, 0], [], []>} : vector<16x20xf32>, vector<16x20xf32>, vector<16x16xf32> -> vector<16x16xf32>
    %78 = arith.addf %77, %6 : vector<16x16xf32>
    %cst_49 = arith.constant dense<0xFF800000> : vector<16xf32>
    %79 = vector.multi_reduction <maximumf>, %78, %cst_49 [1] : vector<16x16xf32> to vector<16xf32>
    %80 = vector.shape_cast %79 : vector<16xf32> to vector<16x1xf32>
    %81 = vector.broadcast %80 : vector<16x1xf32> to vector<16x16xf32>
    %82 = arith.subf %78, %81 : vector<16x16xf32>
    %83 = math.exp %82 : vector<16x16xf32>
    %cst_50 = arith.constant dense<0.000000e+00> : vector<16xf32>
    %84 = vector.multi_reduction <add>, %83, %cst_50 [1] : vector<16x16xf32> to vector<16xf32>
    %85 = vector.shape_cast %84 : vector<16xf32> to vector<16x1xf32>
    %86 = tpu.reciprocal %85 {approx = true} : vector<16x1xf32> -> vector<16x1xf32>
    %87 = vector.broadcast %86 : vector<16x1xf32> to vector<16x16xf32>
    %88 = arith.mulf %83, %87 : vector<16x16xf32>
    %89 = vector.broadcast %74 : vector<1x20xf32> to vector<16x20xf32>
    %90 = arith.mulf %53, %89 : vector<16x20xf32>
    %cst_51 = arith.constant dense<0.000000e+00> : vector<16x20xf32>
    %91 = tpu.matmul %88, %90, %cst_51 {dimension_numbers = #tpu.dot_dimension_numbers<[1], [0], [0], [1], [0, 0, 1, 1], [], []>} : vector<16x16xf32>, vector<16x20xf32>, vector<16x20xf32> -> vector<16x20xf32>
    %92 = arith.addf %73, %91 : vector<16x20xf32>
    %c2 = arith.constant 2 : index
    %c0_52 = arith.constant 0 : index
    %93 = vector.load %arg1[%c2, %c0_52] : memref<4x20xf32, #tpu.memory_space<vmem>>, vector<1x20xf32>
    %94 = vector.broadcast %93 : vector<1x20xf32> to vector<16x20xf32>
    %95 = arith.mulf %39, %94 : vector<16x20xf32>
    %cst_53 = arith.constant dense<0.000000e+00> : vector<16x16xf32>
    %96 = tpu.matmul %95, %46, %cst_53 {dimension_numbers = #tpu.dot_dimension_numbers<[1], [1], [0], [0], [0, 0, 1, 0], [], []>} : vector<16x20xf32>, vector<16x20xf32>, vector<16x16xf32> -> vector<16x16xf32>
    %97 = arith.addf %96, %6 : vector<16x16xf32>
    %cst_54 = arith.constant dense<0xFF800000> : vector<16xf32>
    %98 = vector.multi_reduction <maximumf>, %97, %cst_54 [1] : vector<16x16xf32> to vector<16xf32>
    %99 = vector.shape_cast %98 : vector<16xf32> to vector<16x1xf32>
    %100 = vector.broadcast %99 : vector<16x1xf32> to vector<16x16xf32>
    %101 = arith.subf %97, %100 : vector<16x16xf32>
    %102 = math.exp %101 : vector<16x16xf32>
    %cst_55 = arith.constant dense<0.000000e+00> : vector<16xf32>
    %103 = vector.multi_reduction <add>, %102, %cst_55 [1] : vector<16x16xf32> to vector<16xf32>
    %104 = vector.shape_cast %103 : vector<16xf32> to vector<16x1xf32>
    %105 = tpu.reciprocal %104 {approx = true} : vector<16x1xf32> -> vector<16x1xf32>
    %106 = vector.broadcast %105 : vector<16x1xf32> to vector<16x16xf32>
    %107 = arith.mulf %102, %106 : vector<16x16xf32>
    %108 = vector.broadcast %93 : vector<1x20xf32> to vector<16x20xf32>
    %109 = arith.mulf %53, %108 : vector<16x20xf32>
    %cst_56 = arith.constant dense<0.000000e+00> : vector<16x20xf32>
    %110 = tpu.matmul %107, %109, %cst_56 {dimension_numbers = #tpu.dot_dimension_numbers<[1], [0], [0], [1], [0, 0, 1, 1], [], []>} : vector<16x16xf32>, vector<16x20xf32>, vector<16x20xf32> -> vector<16x20xf32>
    %111 = arith.addf %92, %110 : vector<16x20xf32>
    %c3 = arith.constant 3 : index
    %c0_57 = arith.constant 0 : index
    %112 = vector.load %arg1[%c3, %c0_57] : memref<4x20xf32, #tpu.memory_space<vmem>>, vector<1x20xf32>
    %113 = vector.broadcast %112 : vector<1x20xf32> to vector<16x20xf32>
    %114 = arith.mulf %39, %113 : vector<16x20xf32>
    %cst_58 = arith.constant dense<0.000000e+00> : vector<16x16xf32>
    %115 = tpu.matmul %114, %46, %cst_58 {dimension_numbers = #tpu.dot_dimension_numbers<[1], [1], [0], [0], [0, 0, 1, 0], [], []>} : vector<16x20xf32>, vector<16x20xf32>, vector<16x16xf32> -> vector<16x16xf32>
    %116 = arith.addf %115, %6 : vector<16x16xf32>
    %cst_59 = arith.constant dense<0xFF800000> : vector<16xf32>
    %117 = vector.multi_reduction <maximumf>, %116, %cst_59 [1] : vector<16x16xf32> to vector<16xf32>
    %118 = vector.shape_cast %117 : vector<16xf32> to vector<16x1xf32>
    %119 = vector.broadcast %118 : vector<16x1xf32> to vector<16x16xf32>
    %120 = arith.subf %116, %119 : vector<16x16xf32>
    %121 = math.exp %120 : vector<16x16xf32>
    %cst_60 = arith.constant dense<0.000000e+00> : vector<16xf32>
    %122 = vector.multi_reduction <add>, %121, %cst_60 [1] : vector<16x16xf32> to vector<16xf32>
    %123 = vector.shape_cast %122 : vector<16xf32> to vector<16x1xf32>
    %124 = tpu.reciprocal %123 {approx = true} : vector<16x1xf32> -> vector<16x1xf32>
    %125 = vector.broadcast %124 : vector<16x1xf32> to vector<16x16xf32>
    %126 = arith.mulf %121, %125 : vector<16x16xf32>
    %127 = vector.broadcast %112 : vector<1x20xf32> to vector<16x20xf32>
    %128 = arith.mulf %53, %127 : vector<16x20xf32>
    %cst_61 = arith.constant dense<0.000000e+00> : vector<16x20xf32>
    %129 = tpu.matmul %126, %128, %cst_61 {dimension_numbers = #tpu.dot_dimension_numbers<[1], [0], [0], [1], [0, 0, 1, 1], [], []>} : vector<16x16xf32>, vector<16x20xf32>, vector<16x20xf32> -> vector<16x20xf32>
    %130 = arith.addf %111, %129 : vector<16x20xf32>
    %c0_62 = arith.constant 0 : index
    %c0_63 = arith.constant 0 : index
    %c0_64 = arith.constant 0 : index
    %131 = vector.load %arg13[%c0_62, %c0_63, %c0_64] : memref<2x20x20xf32, #tpu.memory_space<vmem>>, vector<1x20x20xf32>
    %132 = vector.shape_cast %131 : vector<1x20x20xf32> to vector<20x20xf32>
    %cst_65 = arith.constant dense<0.000000e+00> : vector<16x20xf32>
    %133 = tpu.matmul %130, %132, %cst_65 {dimension_numbers = #tpu.dot_dimension_numbers<[1], [0], [0], [1], [0, 0, 1, 1], [], []>} : vector<16x20xf32>, vector<20x20xf32>, vector<16x20xf32> -> vector<16x20xf32>
    %134 = arith.addf %5, %133 : vector<16x20xf32>
    %c0_66 = arith.constant 0 : index
    %c0_67 = arith.constant 0 : index
    %c0_68 = arith.constant 0 : index
    %135 = vector.load %arg14[%c0_66, %c0_67, %c0_68] : memref<2x1x20xf32, #tpu.memory_space<vmem>>, vector<1x1x20xf32>
    %136 = vector.shape_cast %135 : vector<1x1x20xf32> to vector<1x20xf32>
    %137 = vector.broadcast %136 : vector<1x20xf32> to vector<16x20xf32>
    %138 = arith.addf %134, %137 : vector<16x20xf32>
    %c0_69 = arith.constant 0 : index
    %c0_70 = arith.constant 0 : index
    %c0_71 = arith.constant 0 : index
    %139 = vector.load %arg15[%c0_69, %c0_70, %c0_71] : memref<2x1x20xf32, #tpu.memory_space<vmem>>, vector<1x1x20xf32>
    %140 = vector.shape_cast %139 : vector<1x1x20xf32> to vector<1x20xf32>
    %c0_72 = arith.constant 0 : index
    %c0_73 = arith.constant 0 : index
    %c0_74 = arith.constant 0 : index
    %141 = vector.load %arg16[%c0_72, %c0_73, %c0_74] : memref<2x1x20xf32, #tpu.memory_space<vmem>>, vector<1x1x20xf32>
    %142 = vector.shape_cast %141 : vector<1x1x20xf32> to vector<1x20xf32>
    %cst_75 = arith.constant dense<0.000000e+00> : vector<16xf32>
    %143 = vector.multi_reduction <add>, %138, %cst_75 [1] : vector<16x20xf32> to vector<16xf32>
    %144 = vector.shape_cast %143 : vector<16xf32> to vector<16x1xf32>
    %cst_76 = arith.constant 2.000000e+01 : f32
    %145 = vector.broadcast %cst_76 : f32 to vector<16x1xf32>
    %146 = arith.divf %144, %145 : vector<16x1xf32>
    %147 = vector.broadcast %146 : vector<16x1xf32> to vector<16x20xf32>
    %148 = arith.subf %138, %147 : vector<16x20xf32>
    %149 = arith.mulf %148, %148 : vector<16x20xf32>
    %cst_77 = arith.constant dense<0.000000e+00> : vector<16xf32>
    %150 = vector.multi_reduction <add>, %149, %cst_77 [1] : vector<16x20xf32> to vector<16xf32>
    %151 = vector.shape_cast %150 : vector<16xf32> to vector<16x1xf32>
    %cst_78 = arith.constant 2.000000e+01 : f32
    %152 = vector.broadcast %cst_78 : f32 to vector<16x1xf32>
    %153 = arith.divf %151, %152 : vector<16x1xf32>
    %cst_79 = arith.constant 9.99999974E-6 : f32
    %154 = vector.broadcast %cst_79 : f32 to vector<16x1xf32>
    %155 = arith.addf %153, %154 : vector<16x1xf32>
    %156 = math.rsqrt %155 : vector<16x1xf32>
    %157 = vector.broadcast %156 : vector<16x1xf32> to vector<16x20xf32>
    %158 = arith.mulf %148, %157 : vector<16x20xf32>
    %159 = vector.broadcast %140 : vector<1x20xf32> to vector<16x20xf32>
    %160 = arith.mulf %158, %159 : vector<16x20xf32>
    %161 = vector.broadcast %142 : vector<1x20xf32> to vector<16x20xf32>
    %162 = arith.addf %160, %161 : vector<16x20xf32>
    %c0_80 = arith.constant 0 : index
    %c0_81 = arith.constant 0 : index
    %c0_82 = arith.constant 0 : index
    %163 = vector.load %arg17[%c0_80, %c0_81, %c0_82] : memref<2x20x32xf32, #tpu.memory_space<vmem>>, vector<1x20x32xf32>
    %164 = vector.shape_cast %163 : vector<1x20x32xf32> to vector<20x32xf32>
    %cst_83 = arith.constant dense<0.000000e+00> : vector<16x32xf32>
    %165 = tpu.matmul %162, %164, %cst_83 {dimension_numbers = #tpu.dot_dimension_numbers<[1], [0], [0], [1], [0, 0, 1, 1], [], []>} : vector<16x20xf32>, vector<20x32xf32>, vector<16x32xf32> -> vector<16x32xf32>
    %c0_84 = arith.constant 0 : index
    %c0_85 = arith.constant 0 : index
    %c0_86 = arith.constant 0 : index
    %166 = vector.load %arg18[%c0_84, %c0_85, %c0_86] : memref<2x1x32xf32, #tpu.memory_space<vmem>>, vector<1x1x32xf32>
    %167 = vector.shape_cast %166 : vector<1x1x32xf32> to vector<1x32xf32>
    %168 = vector.broadcast %167 : vector<1x32xf32> to vector<16x32xf32>
    %169 = arith.addf %165, %168 : vector<16x32xf32>
    %cst_87 = arith.constant 0.707106769 : f32
    %170 = vector.broadcast %cst_87 : f32 to vector<16x32xf32>
    %171 = arith.mulf %169, %170 : vector<16x32xf32>
    %172 = math.absf %171 : vector<16x32xf32>
    %cst_88 = arith.constant 0.327591091 : f32
    %173 = vector.broadcast %cst_88 : f32 to vector<16x32xf32>
    %174 = arith.mulf %173, %172 : vector<16x32xf32>
    %cst_89 = arith.constant 1.000000e+00 : f32
    %175 = vector.broadcast %cst_89 : f32 to vector<16x32xf32>
    %176 = arith.addf %175, %174 : vector<16x32xf32>
    %cst_90 = arith.constant 1.000000e+00 : f32
    %177 = vector.broadcast %cst_90 : f32 to vector<16x32xf32>
    %178 = arith.divf %177, %176 : vector<16x32xf32>
    %cst_91 = arith.constant 1.06140542 : f32
    %179 = vector.broadcast %cst_91 : f32 to vector<16x32xf32>
    %180 = arith.mulf %178, %179 : vector<16x32xf32>
    %cst_92 = arith.constant -1.45315206 : f32
    %181 = vector.broadcast %cst_92 : f32 to vector<16x32xf32>
    %182 = arith.addf %181, %180 : vector<16x32xf32>
    %183 = arith.mulf %178, %182 : vector<16x32xf32>
    %cst_93 = arith.constant 1.42141378 : f32
    %184 = vector.broadcast %cst_93 : f32 to vector<16x32xf32>
    %185 = arith.addf %184, %183 : vector<16x32xf32>
    %186 = arith.mulf %178, %185 : vector<16x32xf32>
    %cst_94 = arith.constant -0.284496725 : f32
    %187 = vector.broadcast %cst_94 : f32 to vector<16x32xf32>
    %188 = arith.addf %187, %186 : vector<16x32xf32>
    %189 = arith.mulf %178, %188 : vector<16x32xf32>
    %cst_95 = arith.constant 0.254829586 : f32
    %190 = vector.broadcast %cst_95 : f32 to vector<16x32xf32>
    %191 = arith.addf %190, %189 : vector<16x32xf32>
    %192 = arith.mulf %178, %191 : vector<16x32xf32>
    %cst_96 = arith.constant 0.000000e+00 : f32
    %193 = vector.broadcast %cst_96 : f32 to vector<16x32xf32>
    %194 = arith.subf %193, %172 : vector<16x32xf32>
    %195 = arith.mulf %194, %172 : vector<16x32xf32>
    %196 = math.exp %195 : vector<16x32xf32>
    %197 = arith.mulf %192, %196 : vector<16x32xf32>
    %cst_97 = arith.constant 1.000000e+00 : f32
    %198 = vector.broadcast %cst_97 : f32 to vector<16x32xf32>
    %199 = arith.subf %198, %197 : vector<16x32xf32>
    %cst_98 = arith.constant 0.000000e+00 : f32
    %200 = vector.broadcast %cst_98 : f32 to vector<16x32xf32>
    %201 = arith.cmpf oge, %171, %200 : vector<16x32xf32>
    %cst_99 = arith.constant 0.000000e+00 : f32
    %202 = vector.broadcast %cst_99 : f32 to vector<16x32xf32>
    %203 = arith.subf %202, %199 : vector<16x32xf32>
    %204 = arith.select %201, %199, %203 : vector<16x32xi1>, vector<16x32xf32>
    %cst_100 = arith.constant 5.000000e-01 : f32
    %205 = vector.broadcast %cst_100 : f32 to vector<16x32xf32>
    %206 = arith.mulf %205, %169 : vector<16x32xf32>
    %cst_101 = arith.constant 1.000000e+00 : f32
    %207 = vector.broadcast %cst_101 : f32 to vector<16x32xf32>
    %208 = arith.addf %207, %204 : vector<16x32xf32>
    %209 = arith.mulf %206, %208 : vector<16x32xf32>
    %c0_102 = arith.constant 0 : index
    %c0_103 = arith.constant 0 : index
    %c0_104 = arith.constant 0 : index
    %210 = vector.load %arg19[%c0_102, %c0_103, %c0_104] : memref<2x32x20xf32, #tpu.memory_space<vmem>>, vector<1x32x20xf32>
    %211 = vector.shape_cast %210 : vector<1x32x20xf32> to vector<32x20xf32>
    %cst_105 = arith.constant dense<0.000000e+00> : vector<16x20xf32>
    %212 = tpu.matmul %209, %211, %cst_105 {dimension_numbers = #tpu.dot_dimension_numbers<[1], [0], [0], [1], [0, 0, 1, 1], [], []>} : vector<16x32xf32>, vector<32x20xf32>, vector<16x20xf32> -> vector<16x20xf32>
    %213 = arith.addf %138, %212 : vector<16x20xf32>
    %c0_106 = arith.constant 0 : index
    %c0_107 = arith.constant 0 : index
    %c0_108 = arith.constant 0 : index
    %214 = vector.load %arg20[%c0_106, %c0_107, %c0_108] : memref<2x1x20xf32, #tpu.memory_space<vmem>>, vector<1x1x20xf32>
    %215 = vector.shape_cast %214 : vector<1x1x20xf32> to vector<1x20xf32>
    %216 = vector.broadcast %215 : vector<1x20xf32> to vector<16x20xf32>
    %217 = arith.addf %213, %216 : vector<16x20xf32>
    %c1_109 = arith.constant 1 : index
    %c0_110 = arith.constant 0 : index
    %c0_111 = arith.constant 0 : index
    %218 = vector.load %arg5[%c1_109, %c0_110, %c0_111] : memref<2x1x20xf32, #tpu.memory_space<vmem>>, vector<1x1x20xf32>
    %219 = vector.shape_cast %218 : vector<1x1x20xf32> to vector<1x20xf32>
    %c1_112 = arith.constant 1 : index
    %c0_113 = arith.constant 0 : index
    %c0_114 = arith.constant 0 : index
    %220 = vector.load %arg6[%c1_112, %c0_113, %c0_114] : memref<2x1x20xf32, #tpu.memory_space<vmem>>, vector<1x1x20xf32>
    %221 = vector.shape_cast %220 : vector<1x1x20xf32> to vector<1x20xf32>
    %cst_115 = arith.constant dense<0.000000e+00> : vector<16xf32>
    %222 = vector.multi_reduction <add>, %217, %cst_115 [1] : vector<16x20xf32> to vector<16xf32>
    %223 = vector.shape_cast %222 : vector<16xf32> to vector<16x1xf32>
    %cst_116 = arith.constant 2.000000e+01 : f32
    %224 = vector.broadcast %cst_116 : f32 to vector<16x1xf32>
    %225 = arith.divf %223, %224 : vector<16x1xf32>
    %226 = vector.broadcast %225 : vector<16x1xf32> to vector<16x20xf32>
    %227 = arith.subf %217, %226 : vector<16x20xf32>
    %228 = arith.mulf %227, %227 : vector<16x20xf32>
    %cst_117 = arith.constant dense<0.000000e+00> : vector<16xf32>
    %229 = vector.multi_reduction <add>, %228, %cst_117 [1] : vector<16x20xf32> to vector<16xf32>
    %230 = vector.shape_cast %229 : vector<16xf32> to vector<16x1xf32>
    %cst_118 = arith.constant 2.000000e+01 : f32
    %231 = vector.broadcast %cst_118 : f32 to vector<16x1xf32>
    %232 = arith.divf %230, %231 : vector<16x1xf32>
    %cst_119 = arith.constant 9.99999974E-6 : f32
    %233 = vector.broadcast %cst_119 : f32 to vector<16x1xf32>
    %234 = arith.addf %232, %233 : vector<16x1xf32>
    %235 = math.rsqrt %234 : vector<16x1xf32>
    %236 = vector.broadcast %235 : vector<16x1xf32> to vector<16x20xf32>
    %237 = arith.mulf %227, %236 : vector<16x20xf32>
    %238 = vector.broadcast %219 : vector<1x20xf32> to vector<16x20xf32>
    %239 = arith.mulf %237, %238 : vector<16x20xf32>
    %240 = vector.broadcast %221 : vector<1x20xf32> to vector<16x20xf32>
    %241 = arith.addf %239, %240 : vector<16x20xf32>
    %c1_120 = arith.constant 1 : index
    %c0_121 = arith.constant 0 : index
    %c0_122 = arith.constant 0 : index
    %242 = vector.load %arg7[%c1_120, %c0_121, %c0_122] : memref<2x20x20xf32, #tpu.memory_space<vmem>>, vector<1x20x20xf32>
    %243 = vector.shape_cast %242 : vector<1x20x20xf32> to vector<20x20xf32>
    %cst_123 = arith.constant dense<0.000000e+00> : vector<16x20xf32>
    %244 = tpu.matmul %241, %243, %cst_123 {dimension_numbers = #tpu.dot_dimension_numbers<[1], [0], [0], [1], [0, 0, 1, 1], [], []>} : vector<16x20xf32>, vector<20x20xf32>, vector<16x20xf32> -> vector<16x20xf32>
    %c1_124 = arith.constant 1 : index
    %c0_125 = arith.constant 0 : index
    %c0_126 = arith.constant 0 : index
    %245 = vector.load %arg8[%c1_124, %c0_125, %c0_126] : memref<2x1x20xf32, #tpu.memory_space<vmem>>, vector<1x1x20xf32>
    %246 = vector.shape_cast %245 : vector<1x1x20xf32> to vector<1x20xf32>
    %247 = vector.broadcast %246 : vector<1x20xf32> to vector<16x20xf32>
    %248 = arith.addf %244, %247 : vector<16x20xf32>
    %cst_127 = arith.constant 0.44721359 : f32
    %249 = vector.broadcast %cst_127 : f32 to vector<16x20xf32>
    %250 = arith.mulf %248, %249 : vector<16x20xf32>
    %c1_128 = arith.constant 1 : index
    %c0_129 = arith.constant 0 : index
    %c0_130 = arith.constant 0 : index
    %251 = vector.load %arg9[%c1_128, %c0_129, %c0_130] : memref<2x20x20xf32, #tpu.memory_space<vmem>>, vector<1x20x20xf32>
    %252 = vector.shape_cast %251 : vector<1x20x20xf32> to vector<20x20xf32>
    %cst_131 = arith.constant dense<0.000000e+00> : vector<16x20xf32>
    %253 = tpu.matmul %241, %252, %cst_131 {dimension_numbers = #tpu.dot_dimension_numbers<[1], [0], [0], [1], [0, 0, 1, 1], [], []>} : vector<16x20xf32>, vector<20x20xf32>, vector<16x20xf32> -> vector<16x20xf32>
    %c1_132 = arith.constant 1 : index
    %c0_133 = arith.constant 0 : index
    %c0_134 = arith.constant 0 : index
    %254 = vector.load %arg10[%c1_132, %c0_133, %c0_134] : memref<2x1x20xf32, #tpu.memory_space<vmem>>, vector<1x1x20xf32>
    %255 = vector.shape_cast %254 : vector<1x1x20xf32> to vector<1x20xf32>
    %256 = vector.broadcast %255 : vector<1x20xf32> to vector<16x20xf32>
    %257 = arith.addf %253, %256 : vector<16x20xf32>
    %c1_135 = arith.constant 1 : index
    %c0_136 = arith.constant 0 : index
    %c0_137 = arith.constant 0 : index
    %258 = vector.load %arg11[%c1_135, %c0_136, %c0_137] : memref<2x20x20xf32, #tpu.memory_space<vmem>>, vector<1x20x20xf32>
    %259 = vector.shape_cast %258 : vector<1x20x20xf32> to vector<20x20xf32>
    %cst_138 = arith.constant dense<0.000000e+00> : vector<16x20xf32>
    %260 = tpu.matmul %241, %259, %cst_138 {dimension_numbers = #tpu.dot_dimension_numbers<[1], [0], [0], [1], [0, 0, 1, 1], [], []>} : vector<16x20xf32>, vector<20x20xf32>, vector<16x20xf32> -> vector<16x20xf32>
    %c1_139 = arith.constant 1 : index
    %c0_140 = arith.constant 0 : index
    %c0_141 = arith.constant 0 : index
    %261 = vector.load %arg12[%c1_139, %c0_140, %c0_141] : memref<2x1x20xf32, #tpu.memory_space<vmem>>, vector<1x1x20xf32>
    %262 = vector.shape_cast %261 : vector<1x1x20xf32> to vector<1x20xf32>
    %263 = vector.broadcast %262 : vector<1x20xf32> to vector<16x20xf32>
    %264 = arith.addf %260, %263 : vector<16x20xf32>
    %cst_142 = arith.constant 0.000000e+00 : f32
    %265 = vector.broadcast %cst_142 : f32 to vector<16x20xf32>
    %c0_143 = arith.constant 0 : index
    %c0_144 = arith.constant 0 : index
    %266 = vector.load %arg1[%c0_143, %c0_144] : memref<4x20xf32, #tpu.memory_space<vmem>>, vector<1x20xf32>
    %267 = vector.broadcast %266 : vector<1x20xf32> to vector<16x20xf32>
    %268 = arith.mulf %250, %267 : vector<16x20xf32>
    %cst_145 = arith.constant dense<0.000000e+00> : vector<16x16xf32>
    %269 = tpu.matmul %268, %257, %cst_145 {dimension_numbers = #tpu.dot_dimension_numbers<[1], [1], [0], [0], [0, 0, 1, 0], [], []>} : vector<16x20xf32>, vector<16x20xf32>, vector<16x16xf32> -> vector<16x16xf32>
    %270 = arith.addf %269, %6 : vector<16x16xf32>
    %cst_146 = arith.constant dense<0xFF800000> : vector<16xf32>
    %271 = vector.multi_reduction <maximumf>, %270, %cst_146 [1] : vector<16x16xf32> to vector<16xf32>
    %272 = vector.shape_cast %271 : vector<16xf32> to vector<16x1xf32>
    %273 = vector.broadcast %272 : vector<16x1xf32> to vector<16x16xf32>
    %274 = arith.subf %270, %273 : vector<16x16xf32>
    %275 = math.exp %274 : vector<16x16xf32>
    %cst_147 = arith.constant dense<0.000000e+00> : vector<16xf32>
    %276 = vector.multi_reduction <add>, %275, %cst_147 [1] : vector<16x16xf32> to vector<16xf32>
    %277 = vector.shape_cast %276 : vector<16xf32> to vector<16x1xf32>
    %278 = tpu.reciprocal %277 {approx = true} : vector<16x1xf32> -> vector<16x1xf32>
    %279 = vector.broadcast %278 : vector<16x1xf32> to vector<16x16xf32>
    %280 = arith.mulf %275, %279 : vector<16x16xf32>
    %281 = vector.broadcast %266 : vector<1x20xf32> to vector<16x20xf32>
    %282 = arith.mulf %264, %281 : vector<16x20xf32>
    %cst_148 = arith.constant dense<0.000000e+00> : vector<16x20xf32>
    %283 = tpu.matmul %280, %282, %cst_148 {dimension_numbers = #tpu.dot_dimension_numbers<[1], [0], [0], [1], [0, 0, 1, 1], [], []>} : vector<16x16xf32>, vector<16x20xf32>, vector<16x20xf32> -> vector<16x20xf32>
    %284 = arith.addf %265, %283 : vector<16x20xf32>
    %c1_149 = arith.constant 1 : index
    %c0_150 = arith.constant 0 : index
    %285 = vector.load %arg1[%c1_149, %c0_150] : memref<4x20xf32, #tpu.memory_space<vmem>>, vector<1x20xf32>
    %286 = vector.broadcast %285 : vector<1x20xf32> to vector<16x20xf32>
    %287 = arith.mulf %250, %286 : vector<16x20xf32>
    %cst_151 = arith.constant dense<0.000000e+00> : vector<16x16xf32>
    %288 = tpu.matmul %287, %257, %cst_151 {dimension_numbers = #tpu.dot_dimension_numbers<[1], [1], [0], [0], [0, 0, 1, 0], [], []>} : vector<16x20xf32>, vector<16x20xf32>, vector<16x16xf32> -> vector<16x16xf32>
    %289 = arith.addf %288, %6 : vector<16x16xf32>
    %cst_152 = arith.constant dense<0xFF800000> : vector<16xf32>
    %290 = vector.multi_reduction <maximumf>, %289, %cst_152 [1] : vector<16x16xf32> to vector<16xf32>
    %291 = vector.shape_cast %290 : vector<16xf32> to vector<16x1xf32>
    %292 = vector.broadcast %291 : vector<16x1xf32> to vector<16x16xf32>
    %293 = arith.subf %289, %292 : vector<16x16xf32>
    %294 = math.exp %293 : vector<16x16xf32>
    %cst_153 = arith.constant dense<0.000000e+00> : vector<16xf32>
    %295 = vector.multi_reduction <add>, %294, %cst_153 [1] : vector<16x16xf32> to vector<16xf32>
    %296 = vector.shape_cast %295 : vector<16xf32> to vector<16x1xf32>
    %297 = tpu.reciprocal %296 {approx = true} : vector<16x1xf32> -> vector<16x1xf32>
    %298 = vector.broadcast %297 : vector<16x1xf32> to vector<16x16xf32>
    %299 = arith.mulf %294, %298 : vector<16x16xf32>
    %300 = vector.broadcast %285 : vector<1x20xf32> to vector<16x20xf32>
    %301 = arith.mulf %264, %300 : vector<16x20xf32>
    %cst_154 = arith.constant dense<0.000000e+00> : vector<16x20xf32>
    %302 = tpu.matmul %299, %301, %cst_154 {dimension_numbers = #tpu.dot_dimension_numbers<[1], [0], [0], [1], [0, 0, 1, 1], [], []>} : vector<16x16xf32>, vector<16x20xf32>, vector<16x20xf32> -> vector<16x20xf32>
    %303 = arith.addf %284, %302 : vector<16x20xf32>
    %c2_155 = arith.constant 2 : index
    %c0_156 = arith.constant 0 : index
    %304 = vector.load %arg1[%c2_155, %c0_156] : memref<4x20xf32, #tpu.memory_space<vmem>>, vector<1x20xf32>
    %305 = vector.broadcast %304 : vector<1x20xf32> to vector<16x20xf32>
    %306 = arith.mulf %250, %305 : vector<16x20xf32>
    %cst_157 = arith.constant dense<0.000000e+00> : vector<16x16xf32>
    %307 = tpu.matmul %306, %257, %cst_157 {dimension_numbers = #tpu.dot_dimension_numbers<[1], [1], [0], [0], [0, 0, 1, 0], [], []>} : vector<16x20xf32>, vector<16x20xf32>, vector<16x16xf32> -> vector<16x16xf32>
    %308 = arith.addf %307, %6 : vector<16x16xf32>
    %cst_158 = arith.constant dense<0xFF800000> : vector<16xf32>
    %309 = vector.multi_reduction <maximumf>, %308, %cst_158 [1] : vector<16x16xf32> to vector<16xf32>
    %310 = vector.shape_cast %309 : vector<16xf32> to vector<16x1xf32>
    %311 = vector.broadcast %310 : vector<16x1xf32> to vector<16x16xf32>
    %312 = arith.subf %308, %311 : vector<16x16xf32>
    %313 = math.exp %312 : vector<16x16xf32>
    %cst_159 = arith.constant dense<0.000000e+00> : vector<16xf32>
    %314 = vector.multi_reduction <add>, %313, %cst_159 [1] : vector<16x16xf32> to vector<16xf32>
    %315 = vector.shape_cast %314 : vector<16xf32> to vector<16x1xf32>
    %316 = tpu.reciprocal %315 {approx = true} : vector<16x1xf32> -> vector<16x1xf32>
    %317 = vector.broadcast %316 : vector<16x1xf32> to vector<16x16xf32>
    %318 = arith.mulf %313, %317 : vector<16x16xf32>
    %319 = vector.broadcast %304 : vector<1x20xf32> to vector<16x20xf32>
    %320 = arith.mulf %264, %319 : vector<16x20xf32>
    %cst_160 = arith.constant dense<0.000000e+00> : vector<16x20xf32>
    %321 = tpu.matmul %318, %320, %cst_160 {dimension_numbers = #tpu.dot_dimension_numbers<[1], [0], [0], [1], [0, 0, 1, 1], [], []>} : vector<16x16xf32>, vector<16x20xf32>, vector<16x20xf32> -> vector<16x20xf32>
    %322 = arith.addf %303, %321 : vector<16x20xf32>
    %c3_161 = arith.constant 3 : index
    %c0_162 = arith.constant 0 : index
    %323 = vector.load %arg1[%c3_161, %c0_162] : memref<4x20xf32, #tpu.memory_space<vmem>>, vector<1x20xf32>
    %324 = vector.broadcast %323 : vector<1x20xf32> to vector<16x20xf32>
    %325 = arith.mulf %250, %324 : vector<16x20xf32>
    %cst_163 = arith.constant dense<0.000000e+00> : vector<16x16xf32>
    %326 = tpu.matmul %325, %257, %cst_163 {dimension_numbers = #tpu.dot_dimension_numbers<[1], [1], [0], [0], [0, 0, 1, 0], [], []>} : vector<16x20xf32>, vector<16x20xf32>, vector<16x16xf32> -> vector<16x16xf32>
    %327 = arith.addf %326, %6 : vector<16x16xf32>
    %cst_164 = arith.constant dense<0xFF800000> : vector<16xf32>
    %328 = vector.multi_reduction <maximumf>, %327, %cst_164 [1] : vector<16x16xf32> to vector<16xf32>
    %329 = vector.shape_cast %328 : vector<16xf32> to vector<16x1xf32>
    %330 = vector.broadcast %329 : vector<16x1xf32> to vector<16x16xf32>
    %331 = arith.subf %327, %330 : vector<16x16xf32>
    %332 = math.exp %331 : vector<16x16xf32>
    %cst_165 = arith.constant dense<0.000000e+00> : vector<16xf32>
    %333 = vector.multi_reduction <add>, %332, %cst_165 [1] : vector<16x16xf32> to vector<16xf32>
    %334 = vector.shape_cast %333 : vector<16xf32> to vector<16x1xf32>
    %335 = tpu.reciprocal %334 {approx = true} : vector<16x1xf32> -> vector<16x1xf32>
    %336 = vector.broadcast %335 : vector<16x1xf32> to vector<16x16xf32>
    %337 = arith.mulf %332, %336 : vector<16x16xf32>
    %338 = vector.broadcast %323 : vector<1x20xf32> to vector<16x20xf32>
    %339 = arith.mulf %264, %338 : vector<16x20xf32>
    %cst_166 = arith.constant dense<0.000000e+00> : vector<16x20xf32>
    %340 = tpu.matmul %337, %339, %cst_166 {dimension_numbers = #tpu.dot_dimension_numbers<[1], [0], [0], [1], [0, 0, 1, 1], [], []>} : vector<16x16xf32>, vector<16x20xf32>, vector<16x20xf32> -> vector<16x20xf32>
    %341 = arith.addf %322, %340 : vector<16x20xf32>
    %c1_167 = arith.constant 1 : index
    %c0_168 = arith.constant 0 : index
    %c0_169 = arith.constant 0 : index
    %342 = vector.load %arg13[%c1_167, %c0_168, %c0_169] : memref<2x20x20xf32, #tpu.memory_space<vmem>>, vector<1x20x20xf32>
    %343 = vector.shape_cast %342 : vector<1x20x20xf32> to vector<20x20xf32>
    %cst_170 = arith.constant dense<0.000000e+00> : vector<16x20xf32>
    %344 = tpu.matmul %341, %343, %cst_170 {dimension_numbers = #tpu.dot_dimension_numbers<[1], [0], [0], [1], [0, 0, 1, 1], [], []>} : vector<16x20xf32>, vector<20x20xf32>, vector<16x20xf32> -> vector<16x20xf32>
    %345 = arith.addf %217, %344 : vector<16x20xf32>
    %c1_171 = arith.constant 1 : index
    %c0_172 = arith.constant 0 : index
    %c0_173 = arith.constant 0 : index
    %346 = vector.load %arg14[%c1_171, %c0_172, %c0_173] : memref<2x1x20xf32, #tpu.memory_space<vmem>>, vector<1x1x20xf32>
    %347 = vector.shape_cast %346 : vector<1x1x20xf32> to vector<1x20xf32>
    %348 = vector.broadcast %347 : vector<1x20xf32> to vector<16x20xf32>
    %349 = arith.addf %345, %348 : vector<16x20xf32>
    %c1_174 = arith.constant 1 : index
    %c0_175 = arith.constant 0 : index
    %c0_176 = arith.constant 0 : index
    %350 = vector.load %arg15[%c1_174, %c0_175, %c0_176] : memref<2x1x20xf32, #tpu.memory_space<vmem>>, vector<1x1x20xf32>
    %351 = vector.shape_cast %350 : vector<1x1x20xf32> to vector<1x20xf32>
    %c1_177 = arith.constant 1 : index
    %c0_178 = arith.constant 0 : index
    %c0_179 = arith.constant 0 : index
    %352 = vector.load %arg16[%c1_177, %c0_178, %c0_179] : memref<2x1x20xf32, #tpu.memory_space<vmem>>, vector<1x1x20xf32>
    %353 = vector.shape_cast %352 : vector<1x1x20xf32> to vector<1x20xf32>
    %cst_180 = arith.constant dense<0.000000e+00> : vector<16xf32>
    %354 = vector.multi_reduction <add>, %349, %cst_180 [1] : vector<16x20xf32> to vector<16xf32>
    %355 = vector.shape_cast %354 : vector<16xf32> to vector<16x1xf32>
    %cst_181 = arith.constant 2.000000e+01 : f32
    %356 = vector.broadcast %cst_181 : f32 to vector<16x1xf32>
    %357 = arith.divf %355, %356 : vector<16x1xf32>
    %358 = vector.broadcast %357 : vector<16x1xf32> to vector<16x20xf32>
    %359 = arith.subf %349, %358 : vector<16x20xf32>
    %360 = arith.mulf %359, %359 : vector<16x20xf32>
    %cst_182 = arith.constant dense<0.000000e+00> : vector<16xf32>
    %361 = vector.multi_reduction <add>, %360, %cst_182 [1] : vector<16x20xf32> to vector<16xf32>
    %362 = vector.shape_cast %361 : vector<16xf32> to vector<16x1xf32>
    %cst_183 = arith.constant 2.000000e+01 : f32
    %363 = vector.broadcast %cst_183 : f32 to vector<16x1xf32>
    %364 = arith.divf %362, %363 : vector<16x1xf32>
    %cst_184 = arith.constant 9.99999974E-6 : f32
    %365 = vector.broadcast %cst_184 : f32 to vector<16x1xf32>
    %366 = arith.addf %364, %365 : vector<16x1xf32>
    %367 = math.rsqrt %366 : vector<16x1xf32>
    %368 = vector.broadcast %367 : vector<16x1xf32> to vector<16x20xf32>
    %369 = arith.mulf %359, %368 : vector<16x20xf32>
    %370 = vector.broadcast %351 : vector<1x20xf32> to vector<16x20xf32>
    %371 = arith.mulf %369, %370 : vector<16x20xf32>
    %372 = vector.broadcast %353 : vector<1x20xf32> to vector<16x20xf32>
    %373 = arith.addf %371, %372 : vector<16x20xf32>
    %c1_185 = arith.constant 1 : index
    %c0_186 = arith.constant 0 : index
    %c0_187 = arith.constant 0 : index
    %374 = vector.load %arg17[%c1_185, %c0_186, %c0_187] : memref<2x20x32xf32, #tpu.memory_space<vmem>>, vector<1x20x32xf32>
    %375 = vector.shape_cast %374 : vector<1x20x32xf32> to vector<20x32xf32>
    %cst_188 = arith.constant dense<0.000000e+00> : vector<16x32xf32>
    %376 = tpu.matmul %373, %375, %cst_188 {dimension_numbers = #tpu.dot_dimension_numbers<[1], [0], [0], [1], [0, 0, 1, 1], [], []>} : vector<16x20xf32>, vector<20x32xf32>, vector<16x32xf32> -> vector<16x32xf32>
    %c1_189 = arith.constant 1 : index
    %c0_190 = arith.constant 0 : index
    %c0_191 = arith.constant 0 : index
    %377 = vector.load %arg18[%c1_189, %c0_190, %c0_191] : memref<2x1x32xf32, #tpu.memory_space<vmem>>, vector<1x1x32xf32>
    %378 = vector.shape_cast %377 : vector<1x1x32xf32> to vector<1x32xf32>
    %379 = vector.broadcast %378 : vector<1x32xf32> to vector<16x32xf32>
    %380 = arith.addf %376, %379 : vector<16x32xf32>
    %cst_192 = arith.constant 0.707106769 : f32
    %381 = vector.broadcast %cst_192 : f32 to vector<16x32xf32>
    %382 = arith.mulf %380, %381 : vector<16x32xf32>
    %383 = math.absf %382 : vector<16x32xf32>
    %cst_193 = arith.constant 0.327591091 : f32
    %384 = vector.broadcast %cst_193 : f32 to vector<16x32xf32>
    %385 = arith.mulf %384, %383 : vector<16x32xf32>
    %cst_194 = arith.constant 1.000000e+00 : f32
    %386 = vector.broadcast %cst_194 : f32 to vector<16x32xf32>
    %387 = arith.addf %386, %385 : vector<16x32xf32>
    %cst_195 = arith.constant 1.000000e+00 : f32
    %388 = vector.broadcast %cst_195 : f32 to vector<16x32xf32>
    %389 = arith.divf %388, %387 : vector<16x32xf32>
    %cst_196 = arith.constant 1.06140542 : f32
    %390 = vector.broadcast %cst_196 : f32 to vector<16x32xf32>
    %391 = arith.mulf %389, %390 : vector<16x32xf32>
    %cst_197 = arith.constant -1.45315206 : f32
    %392 = vector.broadcast %cst_197 : f32 to vector<16x32xf32>
    %393 = arith.addf %392, %391 : vector<16x32xf32>
    %394 = arith.mulf %389, %393 : vector<16x32xf32>
    %cst_198 = arith.constant 1.42141378 : f32
    %395 = vector.broadcast %cst_198 : f32 to vector<16x32xf32>
    %396 = arith.addf %395, %394 : vector<16x32xf32>
    %397 = arith.mulf %389, %396 : vector<16x32xf32>
    %cst_199 = arith.constant -0.284496725 : f32
    %398 = vector.broadcast %cst_199 : f32 to vector<16x32xf32>
    %399 = arith.addf %398, %397 : vector<16x32xf32>
    %400 = arith.mulf %389, %399 : vector<16x32xf32>
    %cst_200 = arith.constant 0.254829586 : f32
    %401 = vector.broadcast %cst_200 : f32 to vector<16x32xf32>
    %402 = arith.addf %401, %400 : vector<16x32xf32>
    %403 = arith.mulf %389, %402 : vector<16x32xf32>
    %cst_201 = arith.constant 0.000000e+00 : f32
    %404 = vector.broadcast %cst_201 : f32 to vector<16x32xf32>
    %405 = arith.subf %404, %383 : vector<16x32xf32>
    %406 = arith.mulf %405, %383 : vector<16x32xf32>
    %407 = math.exp %406 : vector<16x32xf32>
    %408 = arith.mulf %403, %407 : vector<16x32xf32>
    %cst_202 = arith.constant 1.000000e+00 : f32
    %409 = vector.broadcast %cst_202 : f32 to vector<16x32xf32>
    %410 = arith.subf %409, %408 : vector<16x32xf32>
    %cst_203 = arith.constant 0.000000e+00 : f32
    %411 = vector.broadcast %cst_203 : f32 to vector<16x32xf32>
    %412 = arith.cmpf oge, %382, %411 : vector<16x32xf32>
    %cst_204 = arith.constant 0.000000e+00 : f32
    %413 = vector.broadcast %cst_204 : f32 to vector<16x32xf32>
    %414 = arith.subf %413, %410 : vector<16x32xf32>
    %415 = arith.select %412, %410, %414 : vector<16x32xi1>, vector<16x32xf32>
    %cst_205 = arith.constant 5.000000e-01 : f32
    %416 = vector.broadcast %cst_205 : f32 to vector<16x32xf32>
    %417 = arith.mulf %416, %380 : vector<16x32xf32>
    %cst_206 = arith.constant 1.000000e+00 : f32
    %418 = vector.broadcast %cst_206 : f32 to vector<16x32xf32>
    %419 = arith.addf %418, %415 : vector<16x32xf32>
    %420 = arith.mulf %417, %419 : vector<16x32xf32>
    %c1_207 = arith.constant 1 : index
    %c0_208 = arith.constant 0 : index
    %c0_209 = arith.constant 0 : index
    %421 = vector.load %arg19[%c1_207, %c0_208, %c0_209] : memref<2x32x20xf32, #tpu.memory_space<vmem>>, vector<1x32x20xf32>
    %422 = vector.shape_cast %421 : vector<1x32x20xf32> to vector<32x20xf32>
    %cst_210 = arith.constant dense<0.000000e+00> : vector<16x20xf32>
    %423 = tpu.matmul %420, %422, %cst_210 {dimension_numbers = #tpu.dot_dimension_numbers<[1], [0], [0], [1], [0, 0, 1, 1], [], []>} : vector<16x32xf32>, vector<32x20xf32>, vector<16x20xf32> -> vector<16x20xf32>
    %424 = arith.addf %349, %423 : vector<16x20xf32>
    %c1_211 = arith.constant 1 : index
    %c0_212 = arith.constant 0 : index
    %c0_213 = arith.constant 0 : index
    %425 = vector.load %arg20[%c1_211, %c0_212, %c0_213] : memref<2x1x20xf32, #tpu.memory_space<vmem>>, vector<1x1x20xf32>
    %426 = vector.shape_cast %425 : vector<1x1x20xf32> to vector<1x20xf32>
    %427 = vector.broadcast %426 : vector<1x20xf32> to vector<16x20xf32>
    %428 = arith.addf %424, %427 : vector<16x20xf32>
    %c0_214 = arith.constant 0 : index
    %c0_215 = arith.constant 0 : index
    %429 = vector.load %arg21[%c0_214, %c0_215] : memref<1x20xf32, #tpu.memory_space<vmem>>, vector<1x20xf32>
    %c0_216 = arith.constant 0 : index
    %c0_217 = arith.constant 0 : index
    %430 = vector.load %arg22[%c0_216, %c0_217] : memref<1x20xf32, #tpu.memory_space<vmem>>, vector<1x20xf32>
    %cst_218 = arith.constant dense<0.000000e+00> : vector<16xf32>
    %431 = vector.multi_reduction <add>, %428, %cst_218 [1] : vector<16x20xf32> to vector<16xf32>
    %432 = vector.shape_cast %431 : vector<16xf32> to vector<16x1xf32>
    %cst_219 = arith.constant 2.000000e+01 : f32
    %433 = vector.broadcast %cst_219 : f32 to vector<16x1xf32>
    %434 = arith.divf %432, %433 : vector<16x1xf32>
    %435 = vector.broadcast %434 : vector<16x1xf32> to vector<16x20xf32>
    %436 = arith.subf %428, %435 : vector<16x20xf32>
    %437 = arith.mulf %436, %436 : vector<16x20xf32>
    %cst_220 = arith.constant dense<0.000000e+00> : vector<16xf32>
    %438 = vector.multi_reduction <add>, %437, %cst_220 [1] : vector<16x20xf32> to vector<16xf32>
    %439 = vector.shape_cast %438 : vector<16xf32> to vector<16x1xf32>
    %cst_221 = arith.constant 2.000000e+01 : f32
    %440 = vector.broadcast %cst_221 : f32 to vector<16x1xf32>
    %441 = arith.divf %439, %440 : vector<16x1xf32>
    %cst_222 = arith.constant 9.99999974E-6 : f32
    %442 = vector.broadcast %cst_222 : f32 to vector<16x1xf32>
    %443 = arith.addf %441, %442 : vector<16x1xf32>
    %444 = math.rsqrt %443 : vector<16x1xf32>
    %445 = vector.broadcast %444 : vector<16x1xf32> to vector<16x20xf32>
    %446 = arith.mulf %436, %445 : vector<16x20xf32>
    %447 = vector.broadcast %429 : vector<1x20xf32> to vector<16x20xf32>
    %448 = arith.mulf %446, %447 : vector<16x20xf32>
    %449 = vector.broadcast %430 : vector<1x20xf32> to vector<16x20xf32>
    %450 = arith.addf %448, %449 : vector<16x20xf32>
    %c0_223 = arith.constant 0 : index
    %c0_224 = arith.constant 0 : index
    %451 = vector.load %arg23[%c0_223, %c0_224] : memref<16x20xf32, #tpu.memory_space<vmem>>, vector<16x20xf32>
    tpu.vector_store %arg23[%c0_223, %c0_224], %450 {strides = array<i32>} : memref<16x20xf32, #tpu.memory_space<vmem>>, vector<16x20xf32>,
    return
  }
}

module attributes {stable_mosaic.version = 11 : i64} {
  func.func @_cnn_head_kernel(%arg0: memref<440x9xf32, #tpu.memory_space<vmem>>, %arg1: memref<9x32xf32, #tpu.memory_space<vmem>>, %arg2: memref<1x32xf32, #tpu.memory_space<vmem>>, %arg3: memref<18x440xf32, #tpu.memory_space<vmem>>, %arg4: memref<9x50x18xf32, #tpu.memory_space<vmem>>, %arg5: memref<288x64xf32, #tpu.memory_space<vmem>>, %arg6: memref<1x64xf32, #tpu.memory_space<vmem>>, %arg7: memref<18x50xf32, #tpu.memory_space<vmem>>, %arg8: memref<576x512xf32, #tpu.memory_space<vmem>>, %arg9: memref<1x512xf32, #tpu.memory_space<vmem>>, %arg10: memref<16x20xf32, #tpu.memory_space<vmem>>, %arg11: memref<2x16xf32, #tpu.memory_space<vmem>>, %arg12: memref<20x1xf32, #tpu.memory_space<vmem>>, %arg13: memref<512x1xf32, #tpu.memory_space<vmem>>, %arg14: memref<1x1xf32, #tpu.memory_space<vmem>>, %arg15: memref<2x1xf32, #tpu.memory_space<vmem>>, %arg16: memref<18x64xf32, #tpu.memory_space<vmem>>) attributes {dimension_semantics = [], scalar_prefetch = 0 : i64, scratch_operands = 1 : i64, tpu.core_type = #tpu.core_type<tc>} {
    %c0 = arith.constant 0 : index
    %c0_0 = arith.constant 0 : index
    %0 = vector.load %arg0[%c0, %c0_0] : memref<440x9xf32, #tpu.memory_space<vmem>>, vector<440x9xf32>
    %c0_1 = arith.constant 0 : index
    %c0_2 = arith.constant 0 : index
    %1 = vector.load %arg1[%c0_1, %c0_2] : memref<9x32xf32, #tpu.memory_space<vmem>>, vector<9x32xf32>
    %cst = arith.constant dense<0.000000e+00> : vector<440x32xf32>
    %2 = tpu.matmul %0, %1, %cst {dimension_numbers = #tpu.dot_dimension_numbers<[1], [0], [0], [1], [0, 0, 1, 1], [], []>} : vector<440x9xf32>, vector<9x32xf32>, vector<440x32xf32> -> vector<440x32xf32>
    %c0_3 = arith.constant 0 : index
    %c0_4 = arith.constant 0 : index
    %3 = vector.load %arg2[%c0_3, %c0_4] : memref<1x32xf32, #tpu.memory_space<vmem>>, vector<1x32xf32>
    %4 = vector.broadcast %3 : vector<1x32xf32> to vector<440x32xf32>
    %5 = arith.addf %2, %4 : vector<440x32xf32>
    %cst_5 = arith.constant 0.000000e+00 : f32
    %6 = vector.broadcast %cst_5 : f32 to vector<440x32xf32>
    %7 = arith.maximumf %5, %6 : vector<440x32xf32>
    %c0_6 = arith.constant 0 : index
    %c0_7 = arith.constant 0 : index
    %8 = vector.load %arg3[%c0_6, %c0_7] : memref<18x440xf32, #tpu.memory_space<vmem>>, vector<18x440xf32>
    %cst_8 = arith.constant dense<0.000000e+00> : vector<18x32xf32>
    %9 = tpu.matmul %8, %7, %cst_8 {dimension_numbers = #tpu.dot_dimension_numbers<[1], [0], [0], [1], [0, 0, 1, 1], [], []>} : vector<18x440xf32>, vector<440x32xf32>, vector<18x32xf32> -> vector<18x32xf32>
    %cst_9 = arith.constant 0.000000e+00 : f32
    %10 = vector.broadcast %cst_9 : f32 to vector<50x64xf32>
    %c0_10 = arith.constant 0 : index
    %c0_11 = arith.constant 0 : index
    %c0_12 = arith.constant 0 : index
    %11 = vector.load %arg4[%c0_10, %c0_11, %c0_12] : memref<9x50x18xf32, #tpu.memory_space<vmem>>, vector<1x50x18xf32>
    %12 = vector.shape_cast %11 : vector<1x50x18xf32> to vector<50x18xf32>
    %cst_13 = arith.constant dense<0.000000e+00> : vector<50x32xf32>
    %13 = tpu.matmul %12, %9, %cst_13 {dimension_numbers = #tpu.dot_dimension_numbers<[1], [0], [0], [1], [0, 0, 1, 1], [], []>} : vector<50x18xf32>, vector<18x32xf32>, vector<50x32xf32> -> vector<50x32xf32>
    %c0_14 = arith.constant 0 : index
    %c0_15 = arith.constant 0 : index
    %14 = vector.load %arg5[%c0_14, %c0_15] : memref<288x64xf32, #tpu.memory_space<vmem>>, vector<32x64xf32>
    %cst_16 = arith.constant dense<0.000000e+00> : vector<50x64xf32>
    %15 = tpu.matmul %13, %14, %cst_16 {dimension_numbers = #tpu.dot_dimension_numbers<[1], [0], [0], [1], [0, 0, 1, 1], [], []>} : vector<50x32xf32>, vector<32x64xf32>, vector<50x64xf32> -> vector<50x64xf32>
    %16 = arith.addf %10, %15 : vector<50x64xf32>
    %c1 = arith.constant 1 : index
    %c0_17 = arith.constant 0 : index
    %c0_18 = arith.constant 0 : index
    %17 = vector.load %arg4[%c1, %c0_17, %c0_18] : memref<9x50x18xf32, #tpu.memory_space<vmem>>, vector<1x50x18xf32>
    %18 = vector.shape_cast %17 : vector<1x50x18xf32> to vector<50x18xf32>
    %cst_19 = arith.constant dense<0.000000e+00> : vector<50x32xf32>
    %19 = tpu.matmul %18, %9, %cst_19 {dimension_numbers = #tpu.dot_dimension_numbers<[1], [0], [0], [1], [0, 0, 1, 1], [], []>} : vector<50x18xf32>, vector<18x32xf32>, vector<50x32xf32> -> vector<50x32xf32>
    %c32 = arith.constant 32 : index
    %c0_20 = arith.constant 0 : index
    %20 = vector.load %arg5[%c32, %c0_20] : memref<288x64xf32, #tpu.memory_space<vmem>>, vector<32x64xf32>
    %cst_21 = arith.constant dense<0.000000e+00> : vector<50x64xf32>
    %21 = tpu.matmul %19, %20, %cst_21 {dimension_numbers = #tpu.dot_dimension_numbers<[1], [0], [0], [1], [0, 0, 1, 1], [], []>} : vector<50x32xf32>, vector<32x64xf32>, vector<50x64xf32> -> vector<50x64xf32>
    %22 = arith.addf %16, %21 : vector<50x64xf32>
    %c2 = arith.constant 2 : index
    %c0_22 = arith.constant 0 : index
    %c0_23 = arith.constant 0 : index
    %23 = vector.load %arg4[%c2, %c0_22, %c0_23] : memref<9x50x18xf32, #tpu.memory_space<vmem>>, vector<1x50x18xf32>
    %24 = vector.shape_cast %23 : vector<1x50x18xf32> to vector<50x18xf32>
    %cst_24 = arith.constant dense<0.000000e+00> : vector<50x32xf32>
    %25 = tpu.matmul %24, %9, %cst_24 {dimension_numbers = #tpu.dot_dimension_numbers<[1], [0], [0], [1], [0, 0, 1, 1], [], []>} : vector<50x18xf32>, vector<18x32xf32>, vector<50x32xf32> -> vector<50x32xf32>
    %c64 = arith.constant 64 : index
    %c0_25 = arith.constant 0 : index
    %26 = vector.load %arg5[%c64, %c0_25] : memref<288x64xf32, #tpu.memory_space<vmem>>, vector<32x64xf32>
    %cst_26 = arith.constant dense<0.000000e+00> : vector<50x64xf32>
    %27 = tpu.matmul %25, %26, %cst_26 {dimension_numbers = #tpu.dot_dimension_numbers<[1], [0], [0], [1], [0, 0, 1, 1], [], []>} : vector<50x32xf32>, vector<32x64xf32>, vector<50x64xf32> -> vector<50x64xf32>
    %28 = arith.addf %22, %27 : vector<50x64xf32>
    %c3 = arith.constant 3 : index
    %c0_27 = arith.constant 0 : index
    %c0_28 = arith.constant 0 : index
    %29 = vector.load %arg4[%c3, %c0_27, %c0_28] : memref<9x50x18xf32, #tpu.memory_space<vmem>>, vector<1x50x18xf32>
    %30 = vector.shape_cast %29 : vector<1x50x18xf32> to vector<50x18xf32>
    %cst_29 = arith.constant dense<0.000000e+00> : vector<50x32xf32>
    %31 = tpu.matmul %30, %9, %cst_29 {dimension_numbers = #tpu.dot_dimension_numbers<[1], [0], [0], [1], [0, 0, 1, 1], [], []>} : vector<50x18xf32>, vector<18x32xf32>, vector<50x32xf32> -> vector<50x32xf32>
    %c96 = arith.constant 96 : index
    %c0_30 = arith.constant 0 : index
    %32 = vector.load %arg5[%c96, %c0_30] : memref<288x64xf32, #tpu.memory_space<vmem>>, vector<32x64xf32>
    %cst_31 = arith.constant dense<0.000000e+00> : vector<50x64xf32>
    %33 = tpu.matmul %31, %32, %cst_31 {dimension_numbers = #tpu.dot_dimension_numbers<[1], [0], [0], [1], [0, 0, 1, 1], [], []>} : vector<50x32xf32>, vector<32x64xf32>, vector<50x64xf32> -> vector<50x64xf32>
    %34 = arith.addf %28, %33 : vector<50x64xf32>
    %c4 = arith.constant 4 : index
    %c0_32 = arith.constant 0 : index
    %c0_33 = arith.constant 0 : index
    %35 = vector.load %arg4[%c4, %c0_32, %c0_33] : memref<9x50x18xf32, #tpu.memory_space<vmem>>, vector<1x50x18xf32>
    %36 = vector.shape_cast %35 : vector<1x50x18xf32> to vector<50x18xf32>
    %cst_34 = arith.constant dense<0.000000e+00> : vector<50x32xf32>
    %37 = tpu.matmul %36, %9, %cst_34 {dimension_numbers = #tpu.dot_dimension_numbers<[1], [0], [0], [1], [0, 0, 1, 1], [], []>} : vector<50x18xf32>, vector<18x32xf32>, vector<50x32xf32> -> vector<50x32xf32>
    %c128 = arith.constant 128 : index
    %c0_35 = arith.constant 0 : index
    %38 = vector.load %arg5[%c128, %c0_35] : memref<288x64xf32, #tpu.memory_space<vmem>>, vector<32x64xf32>
    %cst_36 = arith.constant dense<0.000000e+00> : vector<50x64xf32>
    %39 = tpu.matmul %37, %38, %cst_36 {dimension_numbers = #tpu.dot_dimension_numbers<[1], [0], [0], [1], [0, 0, 1, 1], [], []>} : vector<50x32xf32>, vector<32x64xf32>, vector<50x64xf32> -> vector<50x64xf32>
    %40 = arith.addf %34, %39 : vector<50x64xf32>
    %c5 = arith.constant 5 : index
    %c0_37 = arith.constant 0 : index
    %c0_38 = arith.constant 0 : index
    %41 = vector.load %arg4[%c5, %c0_37, %c0_38] : memref<9x50x18xf32, #tpu.memory_space<vmem>>, vector<1x50x18xf32>
    %42 = vector.shape_cast %41 : vector<1x50x18xf32> to vector<50x18xf32>
    %cst_39 = arith.constant dense<0.000000e+00> : vector<50x32xf32>
    %43 = tpu.matmul %42, %9, %cst_39 {dimension_numbers = #tpu.dot_dimension_numbers<[1], [0], [0], [1], [0, 0, 1, 1], [], []>} : vector<50x18xf32>, vector<18x32xf32>, vector<50x32xf32> -> vector<50x32xf32>
    %c160 = arith.constant 160 : index
    %c0_40 = arith.constant 0 : index
    %44 = vector.load %arg5[%c160, %c0_40] : memref<288x64xf32, #tpu.memory_space<vmem>>, vector<32x64xf32>
    %cst_41 = arith.constant dense<0.000000e+00> : vector<50x64xf32>
    %45 = tpu.matmul %43, %44, %cst_41 {dimension_numbers = #tpu.dot_dimension_numbers<[1], [0], [0], [1], [0, 0, 1, 1], [], []>} : vector<50x32xf32>, vector<32x64xf32>, vector<50x64xf32> -> vector<50x64xf32>
    %46 = arith.addf %40, %45 : vector<50x64xf32>
    %c6 = arith.constant 6 : index
    %c0_42 = arith.constant 0 : index
    %c0_43 = arith.constant 0 : index
    %47 = vector.load %arg4[%c6, %c0_42, %c0_43] : memref<9x50x18xf32, #tpu.memory_space<vmem>>, vector<1x50x18xf32>
    %48 = vector.shape_cast %47 : vector<1x50x18xf32> to vector<50x18xf32>
    %cst_44 = arith.constant dense<0.000000e+00> : vector<50x32xf32>
    %49 = tpu.matmul %48, %9, %cst_44 {dimension_numbers = #tpu.dot_dimension_numbers<[1], [0], [0], [1], [0, 0, 1, 1], [], []>} : vector<50x18xf32>, vector<18x32xf32>, vector<50x32xf32> -> vector<50x32xf32>
    %c192 = arith.constant 192 : index
    %c0_45 = arith.constant 0 : index
    %50 = vector.load %arg5[%c192, %c0_45] : memref<288x64xf32, #tpu.memory_space<vmem>>, vector<32x64xf32>
    %cst_46 = arith.constant dense<0.000000e+00> : vector<50x64xf32>
    %51 = tpu.matmul %49, %50, %cst_46 {dimension_numbers = #tpu.dot_dimension_numbers<[1], [0], [0], [1], [0, 0, 1, 1], [], []>} : vector<50x32xf32>, vector<32x64xf32>, vector<50x64xf32> -> vector<50x64xf32>
    %52 = arith.addf %46, %51 : vector<50x64xf32>
    %c7 = arith.constant 7 : index
    %c0_47 = arith.constant 0 : index
    %c0_48 = arith.constant 0 : index
    %53 = vector.load %arg4[%c7, %c0_47, %c0_48] : memref<9x50x18xf32, #tpu.memory_space<vmem>>, vector<1x50x18xf32>
    %54 = vector.shape_cast %53 : vector<1x50x18xf32> to vector<50x18xf32>
    %cst_49 = arith.constant dense<0.000000e+00> : vector<50x32xf32>
    %55 = tpu.matmul %54, %9, %cst_49 {dimension_numbers = #tpu.dot_dimension_numbers<[1], [0], [0], [1], [0, 0, 1, 1], [], []>} : vector<50x18xf32>, vector<18x32xf32>, vector<50x32xf32> -> vector<50x32xf32>
    %c224 = arith.constant 224 : index
    %c0_50 = arith.constant 0 : index
    %56 = vector.load %arg5[%c224, %c0_50] : memref<288x64xf32, #tpu.memory_space<vmem>>, vector<32x64xf32>
    %cst_51 = arith.constant dense<0.000000e+00> : vector<50x64xf32>
    %57 = tpu.matmul %55, %56, %cst_51 {dimension_numbers = #tpu.dot_dimension_numbers<[1], [0], [0], [1], [0, 0, 1, 1], [], []>} : vector<50x32xf32>, vector<32x64xf32>, vector<50x64xf32> -> vector<50x64xf32>
    %58 = arith.addf %52, %57 : vector<50x64xf32>
    %c8 = arith.constant 8 : index
    %c0_52 = arith.constant 0 : index
    %c0_53 = arith.constant 0 : index
    %59 = vector.load %arg4[%c8, %c0_52, %c0_53] : memref<9x50x18xf32, #tpu.memory_space<vmem>>, vector<1x50x18xf32>
    %60 = vector.shape_cast %59 : vector<1x50x18xf32> to vector<50x18xf32>
    %cst_54 = arith.constant dense<0.000000e+00> : vector<50x32xf32>
    %61 = tpu.matmul %60, %9, %cst_54 {dimension_numbers = #tpu.dot_dimension_numbers<[1], [0], [0], [1], [0, 0, 1, 1], [], []>} : vector<50x18xf32>, vector<18x32xf32>, vector<50x32xf32> -> vector<50x32xf32>
    %c256 = arith.constant 256 : index
    %c0_55 = arith.constant 0 : index
    %62 = vector.load %arg5[%c256, %c0_55] : memref<288x64xf32, #tpu.memory_space<vmem>>, vector<32x64xf32>
    %cst_56 = arith.constant dense<0.000000e+00> : vector<50x64xf32>
    %63 = tpu.matmul %61, %62, %cst_56 {dimension_numbers = #tpu.dot_dimension_numbers<[1], [0], [0], [1], [0, 0, 1, 1], [], []>} : vector<50x32xf32>, vector<32x64xf32>, vector<50x64xf32> -> vector<50x64xf32>
    %64 = arith.addf %58, %63 : vector<50x64xf32>
    %c0_57 = arith.constant 0 : index
    %c0_58 = arith.constant 0 : index
    %65 = vector.load %arg6[%c0_57, %c0_58] : memref<1x64xf32, #tpu.memory_space<vmem>>, vector<1x64xf32>
    %66 = vector.broadcast %65 : vector<1x64xf32> to vector<50x64xf32>
    %67 = arith.addf %64, %66 : vector<50x64xf32>
    %cst_59 = arith.constant 0.000000e+00 : f32
    %68 = vector.broadcast %cst_59 : f32 to vector<50x64xf32>
    %69 = arith.maximumf %67, %68 : vector<50x64xf32>
    %c0_60 = arith.constant 0 : index
    %c0_61 = arith.constant 0 : index
    %70 = vector.load %arg7[%c0_60, %c0_61] : memref<18x50xf32, #tpu.memory_space<vmem>>, vector<18x50xf32>
    %cst_62 = arith.constant dense<0.000000e+00> : vector<18x64xf32>
    %71 = tpu.matmul %70, %69, %cst_62 {dimension_numbers = #tpu.dot_dimension_numbers<[1], [0], [0], [1], [0, 0, 1, 1], [], []>} : vector<18x50xf32>, vector<50x64xf32>, vector<18x64xf32> -> vector<18x64xf32>
    %c0_63 = arith.constant 0 : index
    %c0_64 = arith.constant 0 : index
    %72 = vector.load %arg16[%c0_63, %c0_64] : memref<18x64xf32, #tpu.memory_space<vmem>>, vector<18x64xf32>
    tpu.vector_store %arg16[%c0_63, %c0_64], %71 {strides = array<i32>} : memref<18x64xf32, #tpu.memory_space<vmem>>, vector<18x64xf32>,
    %cst_65 = arith.constant 0.000000e+00 : f32
    %73 = vector.broadcast %cst_65 : f32 to vector<2x512xf32>
    %c0_66 = arith.constant 0 : index
    %c0_67 = arith.constant 0 : index
    %74 = vector.load %arg16[%c0_66, %c0_67] : memref<18x64xf32, #tpu.memory_space<vmem>>, vector<2x64xf32>
    %c0_68 = arith.constant 0 : index
    %c0_69 = arith.constant 0 : index
    %75 = vector.load %arg8[%c0_68, %c0_69] : memref<576x512xf32, #tpu.memory_space<vmem>>, vector<64x512xf32>
    %cst_70 = arith.constant dense<0.000000e+00> : vector<2x512xf32>
    %76 = tpu.matmul %74, %75, %cst_70 {dimension_numbers = #tpu.dot_dimension_numbers<[1], [0], [0], [1], [0, 0, 1, 1], [], []>} : vector<2x64xf32>, vector<64x512xf32>, vector<2x512xf32> -> vector<2x512xf32>
    %77 = arith.addf %73, %76 : vector<2x512xf32>
    %c2_71 = arith.constant 2 : index
    %c0_72 = arith.constant 0 : index
    %78 = vector.load %arg16[%c2_71, %c0_72] : memref<18x64xf32, #tpu.memory_space<vmem>>, vector<2x64xf32>
    %c64_73 = arith.constant 64 : index
    %c0_74 = arith.constant 0 : index
    %79 = vector.load %arg8[%c64_73, %c0_74] : memref<576x512xf32, #tpu.memory_space<vmem>>, vector<64x512xf32>
    %cst_75 = arith.constant dense<0.000000e+00> : vector<2x512xf32>
    %80 = tpu.matmul %78, %79, %cst_75 {dimension_numbers = #tpu.dot_dimension_numbers<[1], [0], [0], [1], [0, 0, 1, 1], [], []>} : vector<2x64xf32>, vector<64x512xf32>, vector<2x512xf32> -> vector<2x512xf32>
    %81 = arith.addf %77, %80 : vector<2x512xf32>
    %c4_76 = arith.constant 4 : index
    %c0_77 = arith.constant 0 : index
    %82 = vector.load %arg16[%c4_76, %c0_77] : memref<18x64xf32, #tpu.memory_space<vmem>>, vector<2x64xf32>
    %c128_78 = arith.constant 128 : index
    %c0_79 = arith.constant 0 : index
    %83 = vector.load %arg8[%c128_78, %c0_79] : memref<576x512xf32, #tpu.memory_space<vmem>>, vector<64x512xf32>
    %cst_80 = arith.constant dense<0.000000e+00> : vector<2x512xf32>
    %84 = tpu.matmul %82, %83, %cst_80 {dimension_numbers = #tpu.dot_dimension_numbers<[1], [0], [0], [1], [0, 0, 1, 1], [], []>} : vector<2x64xf32>, vector<64x512xf32>, vector<2x512xf32> -> vector<2x512xf32>
    %85 = arith.addf %81, %84 : vector<2x512xf32>
    %c6_81 = arith.constant 6 : index
    %c0_82 = arith.constant 0 : index
    %86 = vector.load %arg16[%c6_81, %c0_82] : memref<18x64xf32, #tpu.memory_space<vmem>>, vector<2x64xf32>
    %c192_83 = arith.constant 192 : index
    %c0_84 = arith.constant 0 : index
    %87 = vector.load %arg8[%c192_83, %c0_84] : memref<576x512xf32, #tpu.memory_space<vmem>>, vector<64x512xf32>
    %cst_85 = arith.constant dense<0.000000e+00> : vector<2x512xf32>
    %88 = tpu.matmul %86, %87, %cst_85 {dimension_numbers = #tpu.dot_dimension_numbers<[1], [0], [0], [1], [0, 0, 1, 1], [], []>} : vector<2x64xf32>, vector<64x512xf32>, vector<2x512xf32> -> vector<2x512xf32>
    %89 = arith.addf %85, %88 : vector<2x512xf32>
    %c8_86 = arith.constant 8 : index
    %c0_87 = arith.constant 0 : index
    %90 = vector.load %arg16[%c8_86, %c0_87] : memref<18x64xf32, #tpu.memory_space<vmem>>, vector<2x64xf32>
    %c256_88 = arith.constant 256 : index
    %c0_89 = arith.constant 0 : index
    %91 = vector.load %arg8[%c256_88, %c0_89] : memref<576x512xf32, #tpu.memory_space<vmem>>, vector<64x512xf32>
    %cst_90 = arith.constant dense<0.000000e+00> : vector<2x512xf32>
    %92 = tpu.matmul %90, %91, %cst_90 {dimension_numbers = #tpu.dot_dimension_numbers<[1], [0], [0], [1], [0, 0, 1, 1], [], []>} : vector<2x64xf32>, vector<64x512xf32>, vector<2x512xf32> -> vector<2x512xf32>
    %93 = arith.addf %89, %92 : vector<2x512xf32>
    %c10 = arith.constant 10 : index
    %c0_91 = arith.constant 0 : index
    %94 = vector.load %arg16[%c10, %c0_91] : memref<18x64xf32, #tpu.memory_space<vmem>>, vector<2x64xf32>
    %c320 = arith.constant 320 : index
    %c0_92 = arith.constant 0 : index
    %95 = vector.load %arg8[%c320, %c0_92] : memref<576x512xf32, #tpu.memory_space<vmem>>, vector<64x512xf32>
    %cst_93 = arith.constant dense<0.000000e+00> : vector<2x512xf32>
    %96 = tpu.matmul %94, %95, %cst_93 {dimension_numbers = #tpu.dot_dimension_numbers<[1], [0], [0], [1], [0, 0, 1, 1], [], []>} : vector<2x64xf32>, vector<64x512xf32>, vector<2x512xf32> -> vector<2x512xf32>
    %97 = arith.addf %93, %96 : vector<2x512xf32>
    %c12 = arith.constant 12 : index
    %c0_94 = arith.constant 0 : index
    %98 = vector.load %arg16[%c12, %c0_94] : memref<18x64xf32, #tpu.memory_space<vmem>>, vector<2x64xf32>
    %c384 = arith.constant 384 : index
    %c0_95 = arith.constant 0 : index
    %99 = vector.load %arg8[%c384, %c0_95] : memref<576x512xf32, #tpu.memory_space<vmem>>, vector<64x512xf32>
    %cst_96 = arith.constant dense<0.000000e+00> : vector<2x512xf32>
    %100 = tpu.matmul %98, %99, %cst_96 {dimension_numbers = #tpu.dot_dimension_numbers<[1], [0], [0], [1], [0, 0, 1, 1], [], []>} : vector<2x64xf32>, vector<64x512xf32>, vector<2x512xf32> -> vector<2x512xf32>
    %101 = arith.addf %97, %100 : vector<2x512xf32>
    %c14 = arith.constant 14 : index
    %c0_97 = arith.constant 0 : index
    %102 = vector.load %arg16[%c14, %c0_97] : memref<18x64xf32, #tpu.memory_space<vmem>>, vector<2x64xf32>
    %c448 = arith.constant 448 : index
    %c0_98 = arith.constant 0 : index
    %103 = vector.load %arg8[%c448, %c0_98] : memref<576x512xf32, #tpu.memory_space<vmem>>, vector<64x512xf32>
    %cst_99 = arith.constant dense<0.000000e+00> : vector<2x512xf32>
    %104 = tpu.matmul %102, %103, %cst_99 {dimension_numbers = #tpu.dot_dimension_numbers<[1], [0], [0], [1], [0, 0, 1, 1], [], []>} : vector<2x64xf32>, vector<64x512xf32>, vector<2x512xf32> -> vector<2x512xf32>
    %105 = arith.addf %101, %104 : vector<2x512xf32>
    %c16 = arith.constant 16 : index
    %c0_100 = arith.constant 0 : index
    %106 = vector.load %arg16[%c16, %c0_100] : memref<18x64xf32, #tpu.memory_space<vmem>>, vector<2x64xf32>
    %c512 = arith.constant 512 : index
    %c0_101 = arith.constant 0 : index
    %107 = vector.load %arg8[%c512, %c0_101] : memref<576x512xf32, #tpu.memory_space<vmem>>, vector<64x512xf32>
    %cst_102 = arith.constant dense<0.000000e+00> : vector<2x512xf32>
    %108 = tpu.matmul %106, %107, %cst_102 {dimension_numbers = #tpu.dot_dimension_numbers<[1], [0], [0], [1], [0, 0, 1, 1], [], []>} : vector<2x64xf32>, vector<64x512xf32>, vector<2x512xf32> -> vector<2x512xf32>
    %109 = arith.addf %105, %108 : vector<2x512xf32>
    %c0_103 = arith.constant 0 : index
    %c0_104 = arith.constant 0 : index
    %110 = vector.load %arg9[%c0_103, %c0_104] : memref<1x512xf32, #tpu.memory_space<vmem>>, vector<1x512xf32>
    %111 = vector.broadcast %110 : vector<1x512xf32> to vector<2x512xf32>
    %112 = arith.addf %109, %111 : vector<2x512xf32>
    %c0_105 = arith.constant 0 : index
    %c0_106 = arith.constant 0 : index
    %113 = vector.load %arg11[%c0_105, %c0_106] : memref<2x16xf32, #tpu.memory_space<vmem>>, vector<2x16xf32>
    %c0_107 = arith.constant 0 : index
    %c0_108 = arith.constant 0 : index
    %114 = vector.load %arg10[%c0_107, %c0_108] : memref<16x20xf32, #tpu.memory_space<vmem>>, vector<16x20xf32>
    %cst_109 = arith.constant dense<0.000000e+00> : vector<2x20xf32>
    %115 = tpu.matmul %113, %114, %cst_109 {dimension_numbers = #tpu.dot_dimension_numbers<[1], [0], [0], [1], [0, 0, 1, 1], [], []>} : vector<2x16xf32>, vector<16x20xf32>, vector<2x20xf32> -> vector<2x20xf32>
    %c0_110 = arith.constant 0 : index
    %c0_111 = arith.constant 0 : index
    %116 = vector.load %arg12[%c0_110, %c0_111] : memref<20x1xf32, #tpu.memory_space<vmem>>, vector<20x1xf32>
    %cst_112 = arith.constant dense<0.000000e+00> : vector<2x1xf32>
    %117 = tpu.matmul %115, %116, %cst_112 {dimension_numbers = #tpu.dot_dimension_numbers<[1], [0], [0], [1], [0, 0, 1, 1], [], []>} : vector<2x20xf32>, vector<20x1xf32>, vector<2x1xf32> -> vector<2x1xf32>
    %c0_113 = arith.constant 0 : index
    %c0_114 = arith.constant 0 : index
    %118 = vector.load %arg13[%c0_113, %c0_114] : memref<512x1xf32, #tpu.memory_space<vmem>>, vector<512x1xf32>
    %cst_115 = arith.constant dense<0.000000e+00> : vector<2x1xf32>
    %119 = tpu.matmul %112, %118, %cst_115 {dimension_numbers = #tpu.dot_dimension_numbers<[1], [0], [0], [1], [0, 0, 1, 1], [], []>} : vector<2x512xf32>, vector<512x1xf32>, vector<2x1xf32> -> vector<2x1xf32>
    %120 = arith.addf %117, %119 : vector<2x1xf32>
    %c0_116 = arith.constant 0 : index
    %c0_117 = arith.constant 0 : index
    %121 = vector.load %arg14[%c0_116, %c0_117] : memref<1x1xf32, #tpu.memory_space<vmem>>, vector<1x1xf32>
    %122 = vector.broadcast %121 : vector<1x1xf32> to vector<2x1xf32>
    %123 = arith.addf %120, %122 : vector<2x1xf32>
    %c0_118 = arith.constant 0 : index
    %c0_119 = arith.constant 0 : index
    %124 = vector.load %arg15[%c0_118, %c0_119] : memref<2x1xf32, #tpu.memory_space<vmem>>, vector<2x1xf32>
    tpu.vector_store %arg15[%c0_118, %c0_119], %123 {strides = array<i32>} : memref<2x1xf32, #tpu.memory_space<vmem>>, vector<2x1xf32>,
    return
  }
}

</mosaic_0001>

<bundles_post_ra>
// kernel: tecnn_forward.2
= control target key start
LH: loop header
LB: loop body
LE: loop exit
PB: predicated region body
PF: predicated region fallthrough
CT: control target
= control target key end

     0   :  { %s3376_s0 = inlined_call_operand.hbm [shape: f32[16,16], index: 0, kind: input, shape index: {}]   ;;  %s3377_s1 = inlined_call_operand.hbm [shape: f32[4,20], index: 1, kind: input, shape index: {}]   ;;  %s3378_s2 = inlined_call_operand.hbm [shape: f32[16,16], index: 2, kind: input, shape index: {}]   ;;  %s3379_s3 = inlined_call_operand.hbm [shape: f32[16,20], index: 3, kind: input, shape index: {}]   ;;  %s3380_s4 = inlined_call_operand.hbm [shape: f32[1,20], index: 4, kind: input, shape index: {}]   ;;  %s3381_s5 = inlined_call_operand.hbm [shape: f32[2,1,20], index: 5, kind: input, shape index: {}]   ;;  %s3382_s6 = inlined_call_operand.hbm [shape: f32[2,1,20], index: 6, kind: input, shape index: {}]   ;;  %s3383_s7 = inlined_call_operand.vmem [shape: f32[2,20,20], index: 7, kind: input, shape index: {}]   ;;  %s3384_s8 = inlined_call_operand.hbm [shape: f32[2,1,20], index: 8, kind: input, shape index: {}]   ;;  %s3385_s9 = inlined_call_operand.vmem [shape: f32[2,20,20], index: 9, kind: input, shape index: {}]   ;;  %s3386_s10 = inlined_call_operand.hbm [shape: f32[2,1,20], index: 10, kind: input, shape index: {}]   ;;  %s3387_s11 = inlined_call_operand.vmem [shape: f32[2,20,20], index: 11, kind: input, shape index: {}]   ;;  %s3388_s12 = inlined_call_operand.hbm [shape: f32[2,1,20], index: 12, kind: input, shape index: {}]   ;;  %s3389_s13 = inlined_call_operand.vmem [shape: f32[2,20,20], index: 13, kind: input, shape index: {}]   ;;  %s3390_s14 = inlined_call_operand.hbm [shape: f32[2,1,20], index: 14, kind: input, shape index: {}]   ;;  %s3391_s15 = inlined_call_operand.hbm [shape: f32[2,1,20], index: 15, kind: input, shape index: {}]   ;;  %s3392_s16 = inlined_call_operand.hbm [shape: f32[2,1,20], index: 16, kind: input, shape index: {}]   ;;  %s3393_s17 = inlined_call_operand.vmem [shape: f32[2,20,32], index: 17, kind: input, shape index: {}]   ;;  %s3394_s18 = inlined_call_operand.hbm [shape: f32[2,1,32], index: 18, kind: input, shape index: {}]   ;;  %s3395_s19 = inlined_call_operand.vmem [shape: f32[2,32,20], index: 19, kind: input, shape index: {}]   ;;  %s3396_s20 = inlined_call_operand.hbm [shape: f32[2,1,20], index: 20, kind: input, shape index: {}]   ;;  %s3397_s21 = inlined_call_operand.hbm [shape: f32[1,20], index: 21, kind: input, shape index: {}]   ;;  %s3398_s22 = inlined_call_operand.hbm [shape: f32[1,20], index: 22, kind: input, shape index: {}]   ;;  %s3399_s23 = inlined_call_operand.vmem [shape: f32[16,20], index: 23, kind: output, shape index: {}]  }
   0x1   :  { %3402 = sst [smem:[#allocation37_spill]] %s3376_s0 }
   0x2   :  { %3403 = sst [smem:[#allocation38_spill]] %s3377_s1 }
   0x3   :  { %3404 = sst [smem:[#allocation39_spill]] %s3378_s2 }
   0x4   :  { %3405 = sst [smem:[#allocation40_spill]] %s3379_s3 }
   0x5   :  { %3406 = sst [smem:[#allocation41_spill]] %s3380_s4 }
   0x6   :  { %3407 = sst [smem:[#allocation42_spill]] %s3381_s5 }
   0x7   :  { %3408 = sst [smem:[#allocation43_spill]] %s3382_s6 }
   0x8   :  { %3409 = sst [smem:[#allocation44_spill]] %s3383_s7 }
   0x9   :  { %3410 = sst [smem:[#allocation45_spill]] %s3399_s23 }
   0xa   :  { %28 = vsyncpa [#allocation3], 0 }
   0xb   :  { %29 = vsyncpa [#allocation5], 0 }
   0xc   :  { %30 = vsyncpa [#allocation8], 0 }
   0xd   :  { %31 = vsyncpa [#allocation11], 0 }
   0xe   :  { %32 = vsyncpa [#allocation14], 0 }
   0xf   :  { %33 = vsyncpa [#allocation17], 0 }
  0x10   :  { %34 = vsyncpa [#allocation20], 0 }
  0x11   :  { %35 = vsyncpa [#allocation23], 0  ;;  %s3411_s24 = sld [smem:[#allocation38_spill]] }
  0x17   :  { %s55_s25 = sshll.u32 %s3411_s24, 4  ;;  %s56_s25 = int_to_ptr.hbm [resolvable:$true] %s55_s25 }
  0x18   :  { %36 = vsyncpa [#allocation26], 0  ;;  %s2696_s5 = smov [#allocation4]   ;;  %s3412_s6 = sld [smem:[#allocation40_spill]] }
  0x19   :  { %s57_s1 = sshll.u32 %s2696_s5, 4  ;;  %s2697_s7 = smov [#allocation7]   ;;  %s58_s1 = int_to_ptr.vmem [resolvable:$true] %s57_s1 }
  0x1a   :  { %60 = dma.hbm_to_vmem [thread:$0]  %s56_s25, 64, %s58_s1, [#allocation5]  }
  0x1b   :  { %s80_s28 = sshll.u32 %s2697_s7, 4  ;;  %s3413_s0 = sld [smem:[#allocation42_spill]]  ;;  %s81_s28 = int_to_ptr.vmem [resolvable:$true] %s80_s28 }
  0x1c   :  { %s2698_s4 = smov 128   ;;  %s2699_s30 = smov 8  }
  0x1d   :  { %s2700_s24 = smov [#allocation10]   ;;  %s130_s26 = sshll.u32 %s3384_s8, 4  ;;  %s131_s26 = int_to_ptr.hbm [resolvable:$true] %s130_s26 }
  0x1e   :  { %s78_s27 = sshll.u32 %s3412_s6, 4  ;;  %s104_s25 = sshll.u32 %s2700_s24, 4  ;;  %s79_s27 = int_to_ptr.hbm [resolvable:$true] %s78_s27  ;;  %s105_s25 = int_to_ptr.vmem [resolvable:$true] %s104_s25 }
  0x1f   :  { %86 = dma.hbm_to_vmem [thread:$0]  %s79_s27, 256, %s81_s28, [#allocation8], %s2698_s4, %s2698_s4, %s2699_s30  }
  0x20   :  { %s2701_s2 = smov 16   ;;  %s2702_s6 = smov 1  }
  0x21   :  { %s102_s23 = sshll.u32 %s3413_s0, 4  ;;  %s2703_s7 = smov [#allocation13]   ;;  %s103_s23 = int_to_ptr.hbm [resolvable:$true] %s102_s23 }
  0x22   :  { %110 = dma.hbm_to_vmem [thread:$0]  %s103_s23, 32, %s105_s25, [#allocation11], %s2701_s2, %s2701_s2, %s2702_s6  }
  0x23   :  { %s132_s29 = sshll.u32 %s2703_s7, 4  ;;  %s160_s27 = sshll.u32 %s3388_s12, 4  ;;  %s133_s29 = int_to_ptr.vmem [resolvable:$true] %s132_s29  ;;  %s161_s27 = int_to_ptr.hbm [resolvable:$true] %s160_s27 }
  0x24   :  { %138 = dma.hbm_to_vmem [thread:$0]  %s131_s26, 32, %s133_s29, [#allocation14], %s2701_s2, %s2701_s2, %s2702_s6  }
  0x25   :  { %s188_s24 = sshll.u32 %s3391_s15, 4  ;;  %s2704_s5 = smov [#allocation16]   ;;  %s189_s24 = int_to_ptr.hbm [resolvable:$true] %s188_s24 }
  0x26   :  { %s162_s1 = sshll.u32 %s2704_s5, 4  ;;  %s2705_s23 = smov [#allocation19]   ;;  %s163_s1 = int_to_ptr.vmem [resolvable:$true] %s162_s1 }
  0x27   :  { %168 = dma.hbm_to_vmem [thread:$0]  %s161_s27, 32, %s163_s1, [#allocation17], %s2701_s2, %s2701_s2, %s2702_s6  }
  0x28   :  { %s190_s12 = sshll.u32 %s2705_s23, 4  ;;  %s216_s3 = sshll.u32 %s3394_s18, 4  ;;  %s191_s12 = int_to_ptr.vmem [resolvable:$true] %s190_s12  ;;  %s217_s3 = int_to_ptr.hbm [resolvable:$true] %s216_s3 }
  0x29   :  { %196 = dma.hbm_to_vmem [thread:$0]  %s189_s24, 32, %s191_s12, [#allocation20], %s2701_s2, %s2701_s2, %s2702_s6  }
  0x2a   :  { %s245_s29 = sshll.u32 %s3397_s21, 4  ;;  %s2706_s0 = smov [#allocation22]   ;;  %s246_s29 = int_to_ptr.hbm [resolvable:$true] %s245_s29 }
  0x2b   :  { %s218_s8 = sshll.u32 %s2706_s0, 4  ;;  %s2707_s27 = smov [#allocation25]   ;;  %s219_s8 = int_to_ptr.vmem [resolvable:$true] %s218_s8 }
  0x2c   :  { %224 = dma.hbm_to_vmem [thread:$0]  %s217_s3, 32, %s219_s8, [#allocation23], %s2701_s2, %s2701_s2, %s2702_s6  }
  0x2d   :  { %s247_s18 = sshll.u32 %s2707_s27, 4  ;;  %s3414_s1 = sld [smem:[#allocation37_spill]]  ;;  %s248_s18 = int_to_ptr.vmem [resolvable:$true] %s247_s18 }
  0x2e   :  { %250 = dma.hbm_to_vmem [thread:$0]  %s246_s29, 16, %s248_s18, [#allocation26]  }
  0x2f   :  { %s3415_s21 = sld [smem:[#allocation39_spill]]  ;;  %s2708_s7 = smov [#allocation2]  }
  0x30   :  { %s43_s15 = sshll.u32 %s2708_s7, 4  ;;  %s2709_s3 = smov [#allocation6]   ;;  %s44_s15 = int_to_ptr.vmem [resolvable:$true] %s43_s15 }
  0x31   :  { %s67_s26 = sshll.u32 %s2709_s3, 4  ;;  %s3416_s27 = sld [smem:[#allocation41_spill]]  ;;  %s68_s26 = int_to_ptr.vmem [resolvable:$true] %s67_s26 }
  0x32   :  { %s3417_s5 = sld [smem:[#allocation43_spill]]  ;;  %s2710_s24 = smov [#allocation9]  }
  0x33   :  { %s41_s23 = sshll.u32 %s3414_s1, 4  ;;  %s94_s12 = sshll.u32 %s2710_s24, 4  ;;  %s42_s23 = int_to_ptr.hbm [resolvable:$true] %s41_s23  ;;  %s95_s12 = int_to_ptr.vmem [resolvable:$true] %s94_s12 }
  0x34   :  { %49 = dma.hbm_to_vmem [thread:$0]  %s42_s23, 256, %s44_s15, [#allocation3], %s2698_s4, %s2698_s4, %s2699_s30  }
  0x35   :  { %s65_s25 = sshll.u32 %s3415_s21, 4  ;;  %s2711_s23 = smov [#allocation12]   ;;  %s66_s25 = int_to_ptr.hbm [resolvable:$true] %s65_s25 }
  0x36   :  { %73 = dma.hbm_to_vmem [thread:$0]  %s66_s25, 256, %s68_s26, [#allocation5], %s2698_s4, %s2698_s4, %s2699_s30  }
  0x37   :  { %s92_s28 = sshll.u32 %s3416_s27, 4  ;;  %s117_s21 = sshll.u32 %s2711_s23, 4  ;;  %s93_s28 = int_to_ptr.hbm [resolvable:$true] %s92_s28  ;;  %s118_s21 = int_to_ptr.vmem [resolvable:$true] %s117_s21 }
  0x38   :  { %s115_s1 = sshll.u32 %s3417_s5, 4  ;;  %s145_s3 = sshll.u32 %s3386_s10, 4  ;;  %s116_s1 = int_to_ptr.hbm [resolvable:$true] %s115_s1  ;;  %s146_s3 = int_to_ptr.hbm [resolvable:$true] %s145_s3 }
  0x39   :  { %97 = dma.hbm_to_vmem [thread:$0]  %s93_s28, 16, %s95_s12, [#allocation8]  }
  0x3a   :  { %123 = dma.hbm_to_vmem [thread:$0]  %s116_s1, 32, %s118_s21, [#allocation11], %s2701_s2, %s2701_s2, %s2702_s6  }
  0x3b   :  { %s175_s25 = sshll.u32 %s3390_s14, 4  ;;  %s2712_s26 = smov [#allocation15]   ;;  %s176_s25 = int_to_ptr.hbm [resolvable:$true] %s175_s25 }
  0x3c   :  { %s147_s0 = sshll.u32 %s2712_s26, 4  ;;  %s2713_s8 = smov [#allocation18]   ;;  %s148_s0 = int_to_ptr.vmem [resolvable:$true] %s147_s0 }
  0x3d   :  { %153 = dma.hbm_to_vmem [thread:$0]  %s146_s3, 32, %s148_s0, [#allocation14], %s2701_s2, %s2701_s2, %s2702_s6  }
  0x3e   :  { %s177_s10 = sshll.u32 %s2713_s8, 4  ;;  %s201_s29 = sshll.u32 %s3392_s16, 4  ;;  %s178_s10 = int_to_ptr.vmem [resolvable:$true] %s177_s10  ;;  %s202_s29 = int_to_ptr.hbm [resolvable:$true] %s201_s29 }
  0x3f   :  { %183 = dma.hbm_to_vmem [thread:$0]  %s176_s25, 32, %s178_s10, [#allocation17], %s2701_s2, %s2701_s2, %s2702_s6  }
  0x40   :  { %s231_s5 = sshll.u32 %s3396_s20, 4  ;;  %s2714_s1 = smov [#allocation21]   ;;  %s232_s5 = int_to_ptr.hbm [resolvable:$true] %s231_s5 }
  0x41   :  { %s203_s24 = sshll.u32 %s2714_s1, 4  ;;  %s2715_s12 = smov [#allocation24]   ;;  %s204_s24 = int_to_ptr.vmem [resolvable:$true] %s203_s24 }
  0x42   :  { %209 = dma.hbm_to_vmem [thread:$0]  %s202_s29, 32, %s204_s24, [#allocation20], %s2701_s2, %s2701_s2, %s2702_s6  }
  0x43   :  { %s233_s16 = sshll.u32 %s2715_s12, 4  ;;  %s256_s7 = sshll.u32 %s3398_s22, 4  ;;  %s234_s16 = int_to_ptr.vmem [resolvable:$true] %s233_s16  ;;  %s257_s7 = int_to_ptr.hbm [resolvable:$true] %s256_s7 }
  0x44   :  { %239 = dma.hbm_to_vmem [thread:$0]  %s232_s5, 32, %s234_s16, [#allocation23], %s2701_s2, %s2701_s2, %s2702_s6  }
  0x45   :  { %s2716_s20 = smov [#allocation27]  }
  0x46   :  { %s258_s15 = sshll.u32 %s2716_s20, 4  ;;  %s259_s15 = int_to_ptr.vmem [resolvable:$true] %s258_s15 }
  0x47   :  { %261 = dma.hbm_to_vmem [thread:$0]  %s257_s7, 16, %s259_s15, [#allocation26]  }
  0x48   :  { %2678 = dma.done.wait [#allocation3], 256  }
  0x49   :  { %2679 = vsyncadd [#allocation3], 4294967040 }
  0x4a   :  { %2680 = dma.done.wait [#allocation5], 320  }
  0x4b   :  { %2681 = vsyncadd [#allocation5], 4294966976 }
  0x4c   :  { %2682 = dma.done.wait [#allocation8], 272  }
  0x4d   :  { %2683 = vsyncadd [#allocation8], 4294967024 }
  0x4e   :  { %2684 = dma.done.wait [#allocation11], 64  }
  0x4f   :  { %2685 = vsyncadd [#allocation11], 4294967232 }
  0x50   :  { %2686 = dma.done.wait [#allocation14], 64  }
  0x51   :  { %2687 = vsyncadd [#allocation14], 4294967232 }
  0x52   :  { %2688 = dma.done.wait [#allocation17], 64  }
  0x53   :  { %2689 = vsyncadd [#allocation17], 4294967232 }
  0x54   :  { %2690 = dma.done.wait [#allocation20], 64  }
  0x55   :  { %2691 = vsyncadd [#allocation20], 4294967232 }
  0x56   :  { %2692 = dma.done.wait [#allocation23], 64  }
  0x57   :  { %2693 = vsyncadd [#allocation23], 4294967232 }
  0x58   :  { %2694 = dma.done.wait [#allocation26], 32  }
  0x59   :  { %2695 = vsyncadd [#allocation26], 4294967264  ;;  %v333_v0 = vld [vmem:[#allocation7 + $0x8] sm:$0xff]  ;;  %v332_v1 = vld [vmem:[#allocation7] sm:$0xff]  ;;  %vm338_vm0 = vcmask 130048   ;;  %vm372_vm1 = vcmask 162816  }
  0x5a   :  { %359 = vmatpush.msra.mxu0 %v333_v0  ;;  %v330_v2 = vld [vmem:[#allocation2] sm:$0xff]  ;;  %2114 = vmatpush.msra.mxu1 %v333_v0  ;;  %v331_v3 = vld [vmem:[#allocation2 + $0x8] sm:$0xff]  ;;  %v2138_v4 = vld [vmem:[#allocation9] ss:$0 sm:$0xff]  ;;  %v2717_v11 = vmov 20.0   ;;  %s3418_s6 = sld [smem:[#allocation44_spill]] }
  0x5b   :  { %2165 = vrcp.f32 %v2717_v11  ;;  %vm447_vm3 = vcmask 1043456   ;;  %v478_v29 = vld [vmem:[%s3385_s9 + $0x10] sm:$0xf]  ;;  %v477_v32 = vld [vmem:[%s3385_s9 + $0x8] sm:$0xff]  ;;  %v476_v35 = vld [vmem:[%s3385_s9] sm:$0xff]  ;;  %s3419_s7 = sld [smem:[#allocation45_spill]] }
  0x5c   :  { %360 = vmatpush.msra.mxu0 %v332_v1  ;;  %2115 = vmatpush.msra.mxu1 %v332_v1  ;;  %v511_v30 = vld [vmem:[%s3387_s11 + $0x10] sm:$0xf]  ;;  %v510_v33 = vld [vmem:[%s3387_s11 + $0x8] sm:$0xff]  ;;  %v509_v36 = vld [vmem:[%s3387_s11] sm:$0xff] }
  0x5d   :  { %2011 = vmatmul.msk.f32.vlgmr.msra.gmra.mxu0 %vm338_vm0, %v330_v2  ;;  %2012 = vmatmul.msk.f32.vlgmr.msra.gmra.mxu1 %vm338_vm0, %v331_v3  ;;  %v2139_v51 = vld [vmem:[#allocation10] ss:$0 sm:$0xff]  ;;  %v2140_v55 = vld [vmem:[#allocation12] ss:$0 sm:$0xff] }
  0x5e   :  { %2016 = vmatpush.msk.msra.mxu2 %vm447_vm3, %v478_v29  ;;  %2019 = vmatpush.msk.msra.mxu3 %vm447_vm3, %v511_v30 }
  0x60   :  { %v436_v28 = vld [vmem:[%s3418_s6 + $0x10] sm:$0xf]  ;;  %v435_v31 = vld [vmem:[%s3418_s6 + $0x8] sm:$0xff]  ;;  %500 = vmatpush.msra.mxu2 %v477_v32  ;;  %533 = vmatpush.msra.mxu3 %v510_v33  ;;  %v434_v34 = vld [vmem:[%s3418_s6] sm:$0xff] }
  0x61   :  { %v2166_v12 = vpop.eup %2165  ;;  %2013 = vmatpush.msk.msrb.mxu1 %vm447_vm3, %v436_v28 }
  0x62   :  { %v380_v13 = vmul.f32 20.0, %v2166_v12  ;;  %vm384_vm2 = vweird.f32 %v2166_v12  ;;  %501 = vmatpush.msra.mxu2 %v476_v35  ;;  %534 = vmatpush.msra.mxu3 %v509_v36 }
  0x63   :  { %465 = vmatpush.msrb.mxu1 %v435_v31 }
  0x64   :  { %v381_v14 = vsub.f32 1.0, %v380_v13  ;;  %v2984_v13 = vld [vmem:[#allocation4 + $0x1] ss:$0 sm:$0xff] }
  0x65   :  { %466 = vmatpush.msrb.mxu1 %v434_v34 }
  0x66   :  { %v382_v15 = vmul.f32 %v2166_v12, %v381_v14 }
  0x68   :  { %v383_v16 = vadd.f32 %v2166_v12, %v382_v15 }
  0x6a   :  { %v2938_v17 = vsel %vm384_vm2, %v2166_v12, %v383_v16  ;;  %v2986_v16 = vld [vmem:[#allocation4] ss:$0 sm:$0xff] }
  0xda   :  { %v362_v5 = vpop.f32.mrf.mxu0  ;;  %v365_v7 = vpop.f32.mrf.mxu1 }
  0xdb   :  { %v2930_v6 = vadd.f32 %v2138_v4, %v362_v5  ;;  %v2934_v9 = vadd.f32 %v2138_v4, %v365_v7  ;;  %v2141_v4 = vld [vmem:[#allocation13] ss:$0 sm:$0xff]  ;;  %v2146_v5 = vld [vmem:[#allocation16] ss:$0 sm:$0xff]  ;;  %v2145_v7 = vld [vmem:[#allocation15] ss:$0 sm:$0xff] }
  0xdd   :  { %v373_v8 = vsel %vm372_vm1, %v2930_v6, 0.0  ;;  %v376_v10 = vsel %vm372_vm1, %v2934_v9, 0.0 }
  0xde   :  { %374 = vadd.xlane.f32.xlu0 %v373_v8 }
  0xe6   :  { %377 = vadd.xlane.f32.xlu0 %v376_v10 }
 0x151   :  { %v375_v18 = vpop.xlane.xlu0 %374 }
 0x152   :  { %v386_v19 = vmul.f32 %v2938_v17, %v375_v18 }
 0x154   :  { %v388_v20 = vsub.f32 %v2930_v6, %v386_v19 }
 0x156   :  { %v390_v21 = vmul.f32 %v388_v20, %v388_v20 }
 0x158   :  { %v392_v22 = vsel %vm372_vm1, %v390_v21, 0.0  ;;  %v2994_v21 = vld [vmem:[#allocation4 + $0x2] ss:$0 sm:$0xff] }
 0x159   :  { %393 = vadd.xlane.f32.xlu1 %v392_v22  ;;  %v378_v23 = vpop.xlane.xlu0 %377 }
 0x15a   :  { %v387_v24 = vmul.f32 %v2938_v17, %v378_v23  ;;  %v2996_v23 = vld [vmem:[#allocation4 + $0x3] ss:$0 sm:$0xff] }
 0x15c   :  { %v389_v25 = vsub.f32 %v2934_v9, %v387_v24 }
 0x15e   :  { %v391_v26 = vmul.f32 %v389_v25, %v389_v25 }
 0x160   :  { %v395_v27 = vsel %vm372_vm1, %v391_v26, 0.0 }
 0x161   :  { %396 = vadd.xlane.f32.xlu1 %v395_v27 }
 0x1cc   :  { %v394_v37 = vpop.xlane.xlu1 %393 }
 0x1cd   :  { %v398_v38 = vmul.f32 %v394_v37, %v2938_v17 }
 0x1cf   :  { %v400_v39 = vadd.f32 1e-05, %v398_v38 }
 0x1d1   :  { %2167 = vrsqrt.f32 %v400_v39  ;;  %vm408_vm5 = vweird.f32 %v400_v39 }
 0x1d4   :  { %v397_v40 = vpop.xlane.xlu1 %396 }
 0x1d5   :  { %v399_v41 = vmul.f32 %v397_v40, %v2938_v17 }
 0x1d7   :  { %v2168_v42 = vpop.eup %2167  ;;  %v401_v43 = vadd.f32 1e-05, %v399_v41 }
 0x1d8   :  { %v403_v44 = vmul.f32 %v2168_v42, %v400_v39  ;;  %vm409_vm4 = vweird.f32 %v2168_v42  ;;  %v3030_v39 = vld [vmem:[#allocation6] sm:$0xff] }
 0x1d9   :  { %2169 = vrsqrt.f32 %v401_v43  ;;  %vm410_vm6 = vmor %vm408_vm5, %vm409_vm4  ;;  %vm418_vm8 = vweird.f32 %v401_v43 }
 0x1da   :  { %v404_v45 = vmul.f32 %v2168_v42, %v403_v44  ;;  %v3034_v44 = vld [vmem:[#allocation6 + $0x8] sm:$0xff] }
 0x1dc   :  { %v405_v46 = vmul.f32 0.5, %v404_v45 }
 0x1de   :  { %v406_v47 = vsub.f32 1.5, %v405_v46 }
 0x1df   :  { %v2170_v48 = vpop.eup %2169 }
 0x1e0   :  { %v407_v49 = vmul.f32 %v2168_v42, %v406_v47  ;;  %v413_v50 = vmul.f32 %v2170_v48, %v401_v43  ;;  %vm419_vm7 = vweird.f32 %v2170_v48 }
 0x1e1   :  { %vm420_vm9 = vmor %vm418_vm8, %vm419_vm7 }
 0x1e2   :  { %v411_v52 = vsel %vm410_vm6, %v2168_v42, %v407_v49  ;;  %v414_v53 = vmul.f32 %v2170_v48, %v413_v50 }
 0x1e3   :  { %v422_v54 = vmul.f32 %v411_v52, %v388_v20 }
 0x1e4   :  { %v415_v56 = vmul.f32 0.5, %v414_v53 }
 0x1e5   :  { %v427_v57 = vmul.f32 %v2139_v51, %v422_v54 }
 0x1e6   :  { %v416_v58 = vsub.f32 1.5, %v415_v56 }
 0x1e7   :  { %v432_v59 = vadd.f32 %v2140_v55, %v427_v57 }
 0x1e8   :  { %v417_v60 = vmul.f32 %v2170_v48, %v416_v58 }
 0x1e9   :  { %2014 = vmatmul.msk.f32.vlgmr.msrb.gmra.mxu1 %vm372_vm1, %v432_v59  ;;  %2017 = vmatmul.msk.f32.vlgmr.msra.gmra.mxu2 %vm372_vm1, %v432_v59 }
 0x1ea   :  { %v421_v61 = vsel %vm420_vm9, %v2170_v48, %v417_v60  ;;  %2020 = vmatmul.msk.f32.vlgmr.msra.gmra.mxu3 %vm372_vm1, %v432_v59 }
 0x1eb   :  { %v423_v62 = vmul.f32 %v421_v61, %v389_v25 }
 0x1ed   :  { %v428_v63 = vmul.f32 %v2139_v51, %v423_v62 }
 0x1ef   :  { %v433_v0 = vadd.f32 %v2140_v55, %v428_v63 }
 0x1f1   :  { %2015 = vmatmul.msk.f32.gmra.mxu1 %vm372_vm1, %v433_v0  ;;  %2018 = vmatmul.msk.f32.gmra.mxu2 %vm372_vm1, %v433_v0 }
 0x1f2   :  { %2021 = vmatmul.msk.f32.gmra.mxu3 %vm372_vm1, %v433_v0 }
 0x266   :  { %v468_v3 = vpop.f32.mrf.mxu1 }
 0x267   :  { %v469_v10 = vadd.f32 %v2141_v4, %v468_v3 }
 0x269   :  { %v2992_v20 = vmul.f32 0.4472136, %v469_v10 }
 0x26b   :  { %v607_v29 = vmul.f32 %v2984_v13, %v2992_v20  ;;  %v544_v31 = vmul.f32 %v2986_v16, %v2992_v20  ;;  %v722_v37 = vmul.f32 %v2994_v21, %v2992_v20 }
 0x26c   :  { %v503_v1 = vpop.f32.mrf.mxu2 }
 0x26d   :  { %v536_v2 = vpop.f32.mrf.mxu3  ;;  %v504_v22 = vadd.f32 %v2145_v7, %v503_v1 }
 0x26e   :  { %v537_v14 = vadd.f32 %v2146_v5, %v536_v2  ;;  %v471_v24 = vpop.f32.mrf.mxu1 }
 0x26f   :  { %v472_v30 = vadd.f32 %v2141_v4, %v471_v24 }
 0x270   :  { %v660_v25 = vmul.f32 %v2984_v13, %v537_v14  ;;  %v603_v26 = vmul.f32 %v2986_v16, %v537_v14  ;;  %v775_v32 = vmul.f32 %v2994_v21, %v537_v14  ;;  %v863_v33 = vmul.f32 %v2996_v23, %v537_v14 }
 0x271   :  { %v3014_v34 = vmul.f32 0.4472136, %v472_v30 }
 0x273   :  { %v545_v35 = vmul.f32 %v2986_v16, %v3014_v34  ;;  %v608_v36 = vmul.f32 %v2984_v13, %v3014_v34  ;;  %v723_v38 = vmul.f32 %v2994_v21, %v3014_v34 }
 0x274   :  { %v506_v8 = vpop.f32.mrf.mxu2 }
 0x275   :  { %v507_v11 = vadd.f32 %v2145_v7, %v506_v8  ;;  %v539_v12 = vpop.f32.mrf.mxu3 }
 0x276   :  { %v540_v15 = vadd.f32 %v2146_v5, %v539_v12 }
 0x277   :  { %2022 = vmatpush.xpose.msk.msrb.mxu0 %vm372_vm1, %v507_v11  ;;  %2026 = vmatpush.xpose.msk.msra.mxu1 %vm372_vm1, %v507_v11 }
 0x278   :  { %v661_v18 = vmul.f32 %v2984_v13, %v540_v15  ;;  %v604_v19 = vmul.f32 %v2986_v16, %v540_v15  ;;  %v776_v27 = vmul.f32 %v2994_v21, %v540_v15  ;;  %v864_v28 = vmul.f32 %v2996_v23, %v540_v15 }
 0x27a   :  { %682 = vmatpush.msrb.mxu2 %v661_v18  ;;  %711 = vmatpush.msrb.mxu3 %v604_v19 }
 0x27b   :  { %2023 = vmatpush.xpose.msk.msrb.mxu0 %vm372_vm1, %v504_v22  ;;  %2027 = vmatpush.xpose.msk.msra.mxu1 %vm372_vm1, %v504_v22 }
 0x27c   :  { %683 = vmatpush.msrb.mxu2 %v660_v25  ;;  %712 = vmatpush.msrb.mxu3 %v603_v26 }
 0x27e   :  { %2040 = vmatpush.xpose.msk.msra.mxu2 %vm372_vm1, %v507_v11  ;;  %885 = vmatpush.msra.mxu3 %v864_v28  ;;  %v810_v28 = vmul.f32 %v2996_v23, %v2992_v20 }
 0x27f   :  { %2034 = vmatpush.xpose.msk.msra.mxu0 %vm372_vm1, %v507_v11  ;;  %797 = vmatpush.msrb.mxu1 %v776_v27 }
 0x280   :  { %2024 = vmatmul.msk.f32.vlgmr.msrb.gmra.mxu0 %vm372_vm1, %v544_v31  ;;  %2028 = vmatmul.msk.f32.vlgmr.msra.gmra.mxu1 %vm372_vm1, %v607_v29 }
 0x281   :  { %798 = vmatpush.msrb.mxu1 %v775_v32  ;;  %886 = vmatpush.msra.mxu3 %v863_v33  ;;  %v811_v33 = vmul.f32 %v2996_v23, %v3014_v34 }
 0x282   :  { %2041 = vmatpush.xpose.msk.msra.mxu2 %vm372_vm1, %v504_v22 }
 0x283   :  { %2035 = vmatpush.xpose.msk.msra.mxu0 %vm372_vm1, %v504_v22 }
 0x288   :  { %2025 = vmatmul.msk.f32.gmra.mxu0 %vm372_vm1, %v545_v35  ;;  %2029 = vmatmul.msk.f32.gmra.mxu1 %vm372_vm1, %v608_v36 }
 0x290   :  { %2036 = vmatmul.msk.f32.vlgmr.msra.gmra.mxu0 %vm372_vm1, %v722_v37 }
 0x298   :  { %2037 = vmatmul.msk.f32.gmra.mxu0 %vm372_vm1, %v723_v38 }
 0x2fd   :  { %v575_v40 = vpop.f32.mrf.mxu0  ;;  %v632_v41 = vpop.f32.mrf.mxu1 }
 0x2fe   :  { %v633_v42 = vadd.f32 %v632_v41, %v3030_v39  ;;  %v576_v49 = vadd.f32 %v575_v40, %v3030_v39 }
 0x300   :  { %v638_v43 = vsel %vm338_vm0, %v633_v42, -inf  ;;  %v581_v50 = vsel %vm338_vm0, %v576_v49, -inf }
 0x301   :  { %639 = vmax.xlane.f32.xlu2 %v638_v43 }
 0x305   :  { %v635_v45 = vpop.f32.mrf.mxu1  ;;  %v578_v47 = vpop.f32.mrf.mxu0 }
 0x306   :  { %v636_v46 = vadd.f32 %v635_v45, %v3034_v44  ;;  %v579_v62 = vadd.f32 %v578_v47, %v3034_v44 }
 0x308   :  { %v641_v48 = vsel %vm338_vm0, %v636_v46, -inf  ;;  %v584_v4 = vsel %vm338_vm0, %v579_v62, -inf }
 0x309   :  { %642 = vmax.xlane.f32.xlu2 %v641_v48 }
 0x30d   :  { %v747_v51 = vpop.f32.mrf.mxu0 }
 0x30e   :  { %v748_v52 = vadd.f32 %v747_v51, %v3030_v39 }
 0x310   :  { %v753_v53 = vsel %vm338_vm0, %v748_v52, -inf }
 0x311   :  { %582 = vmax.xlane.f32.xlu2 %v581_v50 }
 0x319   :  { %754 = vmax.xlane.f32.xlu2 %v753_v53 }
 0x374   :  { %v640_v54 = vpop.xlane.xlu2 %639 }
 0x375   :  { %v644_v55 = vsub.f32 %v633_v42, %v640_v54  ;;  %v750_v42 = vpop.f32.mrf.mxu0 }
 0x376   :  { %v751_v34 = vadd.f32 %v750_v42, %v3034_v44 }
 0x377   :  { %v646_v56 = vmul.f32 1.442695, %v644_v55 }
 0x378   :  { %v756_v47 = vsel %vm338_vm0, %v751_v34, -inf }
 0x379   :  { %2171 = vpow2.f32 %v646_v56 }
 0x37c   :  { %v643_v57 = vpop.xlane.xlu2 %642 }
 0x37d   :  { %v645_v58 = vsub.f32 %v636_v46, %v643_v57 }
 0x37f   :  { %v2172_v59 = vpop.eup %2171  ;;  %v648_v60 = vmul.f32 1.442695, %v645_v58 }
 0x380   :  { %v650_v61 = vsel %vm338_vm0, %v2172_v59, 0.0 }
 0x381   :  { %2173 = vpow2.f32 %v648_v60  ;;  %651 = vadd.xlane.f32.xlu0 %v650_v61 }
 0x384   :  { %v583_v63 = vpop.xlane.xlu2 %582 }
 0x385   :  { %v587_v0 = vsub.f32 %v576_v49, %v583_v63 }
 0x387   :  { %v2174_v1 = vpop.eup %2173  ;;  %v589_v2 = vmul.f32 1.442695, %v587_v0 }
 0x388   :  { %v653_v3 = vsel %vm338_vm0, %v2174_v1, 0.0 }
 0x389   :  { %2175 = vpow2.f32 %v589_v2  ;;  %654 = vadd.xlane.f32.xlu1 %v653_v3  ;;  %585 = vmax.xlane.f32.xlu0 %v584_v4 }
 0x38c   :  { %v755_v5 = vpop.xlane.xlu2 %754 }
 0x38d   :  { %v759_v7 = vsub.f32 %v748_v52, %v755_v5  ;;  %v898_v5 = vld [vmem:[%s3389_s13 + $0x10] sm:$0xf] }
 0x38e   :  { %2046 = vmatpush.msk.msrb.mxu0 %vm447_vm3, %v898_v5 }
 0x38f   :  { %v2176_v8 = vpop.eup %2175  ;;  %v761_v10 = vmul.f32 1.442695, %v759_v7 }
 0x390   :  { %v593_v11 = vsel %vm338_vm0, %v2176_v8, 0.0 }
 0x391   :  { %2177 = vpow2.f32 %v761_v10  ;;  %594 = vadd.xlane.f32.xlu2 %v593_v11 }
 0x397   :  { %v2178_v12 = vpop.eup %2177 }
 0x398   :  { %v765_v14 = vsel %vm338_vm0, %v2178_v12, 0.0 }
 0x399   :  { %766 = vadd.xlane.f32.xlu2 %v765_v14 }
 0x3f4   :  { %v652_v15 = vpop.xlane.xlu0 %651 }
 0x3f5   :  { %2179 = vrcp.f32 %v652_v15 }
 0x3fb   :  { %v2180_v18 = vpop.eup %2179 }
 0x3fc   :  { %v655_v19 = vpop.xlane.xlu1 %654  ;;  %v658_v22 = vmul.f32 %v2180_v18, %v2172_v59  ;;  %v586_v20 = vpop.xlane.xlu0 %585 }
 0x3fd   :  { %2181 = vrcp.f32 %v655_v19  ;;  %v588_v40 = vsub.f32 %v579_v62, %v586_v20 }
 0x3fe   :  { %2030 = vmatmul.msk.f32.vlgmr.msrb.gmra.mxu2 %vm338_vm0, %v658_v22  ;;  %v897_v22 = vld [vmem:[%s3389_s13 + $0x8] sm:$0xff] }
 0x3ff   :  { %v591_v43 = vmul.f32 1.442695, %v588_v40  ;;  %922 = vmatpush.msrb.mxu0 %v897_v22  ;;  %v2148_v40 = vld [vmem:[#allocation18] ss:$0 sm:$0xff] }
 0x403   :  { %v2182_v24 = vpop.eup %2181 }
 0x404   :  { %v595_v25 = vpop.xlane.xlu2 %594  ;;  %v659_v26 = vmul.f32 %v2182_v24, %v2174_v1  ;;  %v896_v24 = vld [vmem:[%s3389_s13] sm:$0xff] }
 0x405   :  { %2183 = vrcp.f32 %v595_v25  ;;  %923 = vmatpush.msrb.mxu0 %v896_v24 }
 0x406   :  { %2031 = vmatmul.msk.f32.gmra.mxu2 %vm338_vm0, %v659_v26 }
 0x40b   :  { %v2184_v27 = vpop.eup %2183 }
 0x40c   :  { %v767_v29 = vpop.xlane.xlu2 %766  ;;  %v601_v30 = vmul.f32 %v2184_v27, %v2176_v8 }
 0x40d   :  { %2185 = vrcp.f32 %v767_v29 }
 0x40e   :  { %2032 = vmatmul.msk.f32.vlgmr.msrb.gmra.mxu3 %vm338_vm0, %v601_v30  ;;  %2042 = vmatmul.msk.f32.vlgmr.msra.gmra.mxu2 %vm372_vm1, %v810_v28  ;;  %2187 = vpow2.f32 %v591_v43 }
 0x413   :  { %v2186_v31 = vpop.eup %2185 }
 0x414   :  { %v773_v32 = vmul.f32 %v2186_v31, %v2178_v12  ;;  %v2188_v49 = vpop.eup %2187 }
 0x415   :  { %v596_v50 = vsel %vm338_vm0, %v2188_v49, 0.0 }
 0x416   :  { %2038 = vmatmul.msk.f32.vlgmr.msrb.gmra.mxu1 %vm338_vm0, %v773_v32  ;;  %2043 = vmatmul.msk.f32.gmra.mxu2 %vm372_vm1, %v811_v33 }
 0x481   :  { %v3058_v35 = vpop.f32.mrf.mxu2 }
 0x489   :  { %v3060_v36 = vpop.f32.mrf.mxu2 }
 0x491   :  { %v835_v37 = vpop.f32.mrf.mxu2  ;;  %v714_v25 = vpop.f32.mrf.mxu3 }
 0x492   :  { %v836_v38 = vadd.f32 %v835_v37, %v3030_v39  ;;  %v715_v27 = vadd.f32 %v714_v25, %v3058_v35 }
 0x493   :  { %v800_v28 = vpop.f32.mrf.mxu1 }
 0x494   :  { %v841_v41 = vsel %vm338_vm0, %v836_v38, -inf  ;;  %v806_v29 = vadd.f32 %v800_v28, %v715_v27 }
 0x495   :  { %842 = vmax.xlane.f32.xlu1 %v841_v41 }
 0x499   :  { %v838_v45 = vpop.f32.mrf.mxu2 }
 0x49a   :  { %v839_v46 = vadd.f32 %v838_v45, %v3034_v44 }
 0x49c   :  { %v844_v48 = vsel %vm338_vm0, %v839_v46, -inf }
 0x49d   :  { %757 = vmax.xlane.f32.xlu1 %v756_v47  ;;  %845 = vmax.xlane.f32.xlu0 %v844_v48 }
 0x4a5   :  { %597 = vadd.xlane.f32.xlu0 %v596_v50 }
 0x508   :  { %v843_v51 = vpop.xlane.xlu1 %842 }
 0x509   :  { %v847_v52 = vsub.f32 %v836_v38, %v843_v51 }
 0x50b   :  { %v849_v53 = vmul.f32 1.442695, %v847_v52 }
 0x50d   :  { %2189 = vpow2.f32 %v849_v53 }
 0x510   :  { %v758_v54 = vpop.xlane.xlu1 %757  ;;  %v846_v55 = vpop.xlane.xlu0 %845 }
 0x511   :  { %v760_v56 = vsub.f32 %v751_v34, %v758_v54  ;;  %v848_v57 = vsub.f32 %v839_v46, %v846_v55  ;;  %v997_v55 = vld [vmem:[%s3393_s17 + $0x10] sm:$0xf] }
 0x512   :  { %2049 = vmatpush.msk.msra.mxu1 %vm447_vm3, %v997_v55 }
 0x513   :  { %v2190_v58 = vpop.eup %2189  ;;  %v763_v59 = vmul.f32 1.442695, %v760_v56  ;;  %v851_v60 = vmul.f32 1.442695, %v848_v57  ;;  %v996_v56 = vld [vmem:[%s3393_s17 + $0x8] sm:$0xff]  ;;  %v995_v57 = vld [vmem:[%s3393_s17] sm:$0xff] }
 0x514   :  { %v853_v61 = vsel %vm338_vm0, %v2190_v58, 0.0  ;;  %1025 = vmatpush.msra.mxu1 %v996_v56 }
 0x515   :  { %2191 = vpow2.f32 %v763_v59  ;;  %854 = vadd.xlane.f32.xlu1 %v853_v61 }
 0x516   :  { %2193 = vpow2.f32 %v851_v60  ;;  %1026 = vmatpush.msra.mxu1 %v995_v57 }
 0x518   :  { %v598_v62 = vpop.xlane.xlu0 %597 }
 0x519   :  { %2195 = vrcp.f32 %v598_v62 }
 0x51b   :  { %v2192_v63 = vpop.eup %2191 }
 0x51c   :  { %v2194_v0 = vpop.eup %2193  ;;  %v768_v1 = vsel %vm338_vm0, %v2192_v63, 0.0 }
 0x51d   :  { %769 = vadd.xlane.f32.xlu1 %v768_v1  ;;  %v856_v2 = vsel %vm338_vm0, %v2194_v0, 0.0 }
 0x51e   :  { %857 = vadd.xlane.f32.xlu0 %v856_v2 }
 0x51f   :  { %v2196_v3 = vpop.eup %2195 }
 0x520   :  { %v602_v4 = vmul.f32 %v2196_v3, %v2188_v49 }
 0x522   :  { %2033 = vmatmul.msk.f32.gmra.mxu3 %vm338_vm0, %v602_v4 }
 0x588   :  { %v855_v7 = vpop.xlane.xlu1 %854 }
 0x589   :  { %2197 = vrcp.f32 %v855_v7 }
 0x58f   :  { %v2198_v8 = vpop.eup %2197 }
 0x590   :  { %v861_v10 = vmul.f32 %v2198_v8, %v2190_v58  ;;  %v770_v11 = vpop.xlane.xlu1 %769  ;;  %v2149_v8 = vld [vmem:[#allocation19] ss:$0 sm:$0xff] }
 0x591   :  { %2199 = vrcp.f32 %v770_v11  ;;  %v858_v12 = vpop.xlane.xlu0 %857 }
 0x592   :  { %2201 = vrcp.f32 %v858_v12  ;;  %2044 = vmatmul.msk.f32.vlgmr.msra.gmra.mxu3 %vm338_vm0, %v861_v10 }
 0x597   :  { %v2200_v14 = vpop.eup %2199 }
 0x598   :  { %v2202_v15 = vpop.eup %2201  ;;  %v774_v18 = vmul.f32 %v2200_v14, %v2192_v63 }
 0x599   :  { %v862_v19 = vmul.f32 %v2202_v15, %v2194_v0  ;;  %v2150_v15 = vld [vmem:[#allocation21] ss:$0 sm:$0xff] }
 0x59a   :  { %2039 = vmatmul.msk.f32.gmra.mxu1 %vm338_vm0, %v774_v18 }
 0x59b   :  { %2045 = vmatmul.msk.f32.gmra.mxu3 %vm338_vm0, %v862_v19 }
 0x5a5   :  { %v717_v26 = vpop.f32.mrf.mxu3 }
 0x5a6   :  { %v718_v33 = vadd.f32 %v717_v26, %v3060_v36 }
 0x615   :  { %v888_v30 = vpop.f32.mrf.mxu3 }
 0x616   :  { %v894_v31 = vadd.f32 %v888_v30, %v806_v29  ;;  %v2151_v30 = vld [vmem:[#allocation22] ss:$0 sm:$0xff] }
 0x617   :  { %v803_v32 = vpop.f32.mrf.mxu1 }
 0x618   :  { %2047 = vmatmul.msk.f32.vlgmr.msrb.gmra.mxu0 %vm372_vm1, %v894_v31  ;;  %v807_v20 = vadd.f32 %v803_v32, %v718_v33 }
 0x61e   :  { %v891_v37 = vpop.f32.mrf.mxu3 }
 0x61f   :  { %v895_v38 = vadd.f32 %v891_v37, %v807_v20 }
 0x621   :  { %2048 = vmatmul.msk.f32.gmra.mxu0 %vm372_vm1, %v895_v38 }
 0x695   :  { %v925_v41 = vpop.f32.mrf.mxu0 }
 0x696   :  { %v931_v42 = vadd.f32 %v925_v41, %v2930_v6 }
 0x698   :  { %v3091_v43 = vadd.f32 %v2148_v40, %v931_v42 }
 0x69a   :  { %v941_v35 = vsel %vm372_vm1, %v3091_v43, 0.0 }
 0x69b   :  { %942 = vadd.xlane.f32.xlu2 %v941_v35 }
 0x69e   :  { %v928_v34 = vpop.f32.mrf.mxu0 }
 0x69f   :  { %v932_v45 = vadd.f32 %v928_v34, %v2934_v9 }
 0x6a1   :  { %v3096_v46 = vadd.f32 %v2148_v40, %v932_v45 }
 0x6a3   :  { %v944_v36 = vsel %vm372_vm1, %v3096_v46, 0.0 }
 0x6a4   :  { %945 = vadd.xlane.f32.xlu0 %v944_v36 }
 0x70e   :  { %v943_v47 = vpop.xlane.xlu2 %942 }
 0x70f   :  { %v947_v48 = vmul.f32 %v943_v47, %v2938_v17 }
 0x711   :  { %v949_v6 = vsub.f32 %v3091_v43, %v947_v48  ;;  %v1117_v48 = vld [vmem:[%s3395_s19 + $0x18] sm:$0xff] }
 0x712   :  { %1137 = vmatpush.msrb.mxu2 %v1117_v48 }
 0x713   :  { %v951_v49 = vmul.f32 %v949_v6, %v949_v6 }
 0x715   :  { %v953_v50 = vsel %vm372_vm1, %v951_v49, 0.0 }
 0x716   :  { %954 = vadd.xlane.f32.xlu1 %v953_v50  ;;  %v1116_v50 = vld [vmem:[%s3395_s19 + $0x10] sm:$0xff] }
 0x717   :  { %v946_v51 = vpop.xlane.xlu0 %945  ;;  %1138 = vmatpush.msrb.mxu2 %v1116_v50 }
 0x718   :  { %v948_v52 = vmul.f32 %v946_v51, %v2938_v17 }
 0x71a   :  { %v950_v9 = vsub.f32 %v3096_v46, %v948_v52 }
 0x71c   :  { %v952_v53 = vmul.f32 %v950_v9, %v950_v9 }
 0x71e   :  { %v956_v54 = vsel %vm372_vm1, %v952_v53, 0.0  ;;  %v1114_v53 = vld [vmem:[%s3395_s19] sm:$0xff] }
 0x71f   :  { %957 = vadd.xlane.f32.xlu2 %v956_v54 }
 0x789   :  { %v955_v58 = vpop.xlane.xlu1 %954 }
 0x78a   :  { %v959_v59 = vmul.f32 %v955_v58, %v2938_v17 }
 0x78c   :  { %v961_v60 = vadd.f32 1e-05, %v959_v59 }
 0x78e   :  { %2203 = vrsqrt.f32 %v961_v60  ;;  %vm969_vm11 = vweird.f32 %v961_v60 }
 0x792   :  { %v958_v61 = vpop.xlane.xlu2 %957 }
 0x793   :  { %v960_v62 = vmul.f32 %v958_v61, %v2938_v17 }
 0x794   :  { %v2204_v63 = vpop.eup %2203 }
 0x795   :  { %v964_v0 = vmul.f32 %v2204_v63, %v961_v60  ;;  %v962_v1 = vadd.f32 1e-05, %v960_v62  ;;  %vm970_vm10 = vweird.f32 %v2204_v63 }
 0x796   :  { %vm971_vm12 = vmor %vm969_vm11, %vm970_vm10 }
 0x797   :  { %v965_v2 = vmul.f32 %v2204_v63, %v964_v0  ;;  %2205 = vrsqrt.f32 %v962_v1  ;;  %vm979_vm14 = vweird.f32 %v962_v1 }
 0x799   :  { %v966_v3 = vmul.f32 0.5, %v965_v2 }
 0x79b   :  { %v967_v4 = vsub.f32 1.5, %v966_v3 }
 0x79d   :  { %v2206_v5 = vpop.eup %2205  ;;  %v968_v7 = vmul.f32 %v2204_v63, %v967_v4 }
 0x79e   :  { %v974_v10 = vmul.f32 %v2206_v5, %v962_v1  ;;  %vm980_vm13 = vweird.f32 %v2206_v5 }
 0x79f   :  { %v972_v11 = vsel %vm971_vm12, %v2204_v63, %v968_v7  ;;  %vm981_vm15 = vmor %vm979_vm14, %vm980_vm13  ;;  %vm1118_vm12 = vcmask 261120  }
 0x7a0   :  { %v983_v12 = vmul.f32 %v972_v11, %v949_v6  ;;  %v975_v14 = vmul.f32 %v2206_v5, %v974_v10 }
 0x7a2   :  { %v988_v18 = vmul.f32 %v2149_v8, %v983_v12  ;;  %v976_v19 = vmul.f32 0.5, %v975_v14 }
 0x7a4   :  { %v977_v22 = vsub.f32 1.5, %v976_v19  ;;  %v993_v24 = vadd.f32 %v2150_v15, %v988_v18 }
 0x7a6   :  { %v978_v25 = vmul.f32 %v2206_v5, %v977_v22  ;;  %2050 = vmatmul.msk.f32.vlgmr.msra.gmra.mxu1 %vm372_vm1, %v993_v24 }
 0x7a8   :  { %v982_v26 = vsel %vm981_vm15, %v2206_v5, %v978_v25 }
 0x7a9   :  { %v984_v27 = vmul.f32 %v982_v26, %v950_v9  ;;  %v1115_v9 = vld [vmem:[%s3395_s19 + $0x8] sm:$0xff] }
 0x7aa   :  { %1139 = vmatpush.msrb.mxu2 %v1115_v9 }
 0x7ab   :  { %v989_v28 = vmul.f32 %v2149_v8, %v984_v27 }
 0x7ac   :  { %1140 = vmatpush.msrb.mxu2 %v1114_v53 }
 0x7ad   :  { %v994_v29 = vadd.f32 %v2150_v15, %v989_v28 }
 0x7af   :  { %2051 = vmatmul.msk.f32.gmra.mxu1 %vm372_vm1, %v994_v29 }
 0x823   :  { %v1028_v31 = vpop.f32.mrf.mxu1 }
 0x824   :  { %v3120_v32 = vadd.f32 %v2151_v30, %v1028_v31 }
 0x826   :  { %v3123_v33 = vmul.f32 0.70710677, %v3120_v32  ;;  %v1108_v48 = vmul.f32 0.5, %v3120_v32  ;;  %v2152_v32 = vld [vmem:[#allocation24] ss:$0 sm:$0xff] }
 0x828   :  { %v1036_v20 = vand.u32 2147483647, %v3123_v33  ;;  %vm1102_vm11 = vcmp.ge.f32.partialorder %v3123_v33, 0.0 }
 0x82a   :  { %v1038_v37 = vmul.f32 0.3275911, %v1036_v20  ;;  %v1090_v59 = vsub.f32 0.0, %v1036_v20 }
 0x82c   :  { %v1040_v38 = vadd.f32 1.0, %v1038_v37  ;;  %v1031_v40 = vpop.f32.mrf.mxu1  ;;  %v1092_v1 = vmul.f32 %v1090_v59, %v1036_v20 }
 0x82d   :  { %v3126_v41 = vadd.f32 %v2151_v30, %v1031_v40 }
 0x82e   :  { %2207 = vrcp.f32 %v1040_v38  ;;  %v1053_v49 = vand.u32 2147483648, %v1040_v38  ;;  %v1051_v52 = vand.u32 2147483647, %v1040_v38  ;;  %vm1047_vm4 = vweird.f32 %v1040_v38 }
 0x82f   :  { %v3129_v42 = vmul.f32 0.70710677, %v3126_v41  ;;  %v1094_v10 = vmul.f32 1.442695, %v1092_v1 }
 0x830   :  { %v1054_v55 = vor.u32 1.1754944e-38, %v1053_v49  ;;  %vm1052_vm6 = vcmp.eq.f32.partialorder %v1051_v52, 8.507059e+37 }
 0x831   :  { %v1037_v35 = vand.u32 2147483647, %v3129_v42  ;;  %vm1103_vm13 = vcmp.ge.f32.partialorder %v3129_v42, 0.0 }
 0x833   :  { %v1039_v34 = vmul.f32 0.3275911, %v1037_v35  ;;  %v1091_v14 = vsub.f32 0.0, %v1037_v35 }
 0x834   :  { %v2208_v45 = vpop.eup %2207 }
 0x835   :  { %v1043_v36 = vmul.f32 %v2208_v45, %v1040_v38  ;;  %v1041_v47 = vadd.f32 1.0, %v1039_v34  ;;  %vm1048_vm2 = vweird.f32 %v2208_v45  ;;  %v1093_v25 = vmul.f32 %v1091_v14, %v1037_v35  ;;  %v2067_v14 = vld [vmem:[%s3387_s11 + $0x20] sm:$0xff] }
 0x836   :  { %vm1049_vm5 = vmor %vm1047_vm4, %vm1048_vm2 }
 0x837   :  { %v1044_v6 = vsub.f32 1.0, %v1043_v36  ;;  %2209 = vrcp.f32 %v1041_v47  ;;  %v1068_v0 = vand.u32 2147483648, %v1041_v47  ;;  %v1066_v3 = vand.u32 2147483647, %v1041_v47 }
 0x838   :  { %vm1062_vm8 = vweird.f32 %v1041_v47  ;;  %2211 = vpow2.f32 %v1094_v10  ;;  %v1096_v30 = vmul.f32 1.442695, %v1093_v25  ;;  %v2068_v10 = vld [vmem:[%s3387_s11 + $0x28] sm:$0xf] }
 0x839   :  { %v1045_v51 = vmul.f32 %v2208_v45, %v1044_v6  ;;  %v1069_v8 = vor.u32 1.1754944e-38, %v1068_v0  ;;  %vm1067_vm10 = vcmp.eq.f32.partialorder %v1066_v3, 8.507059e+37  ;;  %2069 = vmatpush.msk.msrb.mxu1 %vm447_vm3, %v2068_v10 }
 0x83a   :  { %2213 = vpow2.f32 %v1096_v30 }
 0x83b   :  { %v1046_v54 = vadd.f32 %v2208_v45, %v1045_v51  ;;  %1318 = vmatpush.msrb.mxu1 %v2067_v14 }
 0x83d   :  { %v2210_v56 = vpop.eup %2209  ;;  %v1050_v57 = vsel %vm1049_vm5, %v2208_v45, %v1046_v54  ;;  %v1109_v54 = vmul.f32 0.5, %v3126_v41 }
 0x83e   :  { %v1055_v58 = vsel %vm1052_vm6, %v1054_v55, %v1050_v57  ;;  %v1058_v60 = vmul.f32 %v2210_v56, %v1041_v47  ;;  %vm1063_vm7 = vweird.f32 %v2210_v56  ;;  %v2212_v31 = vpop.eup %2211 }
 0x83f   :  { %v1072_v61 = vmul.f32 1.0614054, %v1055_v58  ;;  %vm1064_vm9 = vmor %vm1062_vm8, %vm1063_vm7 }
 0x840   :  { %v1059_v62 = vsub.f32 1.0, %v1058_v60  ;;  %v2214_v49 = vpop.eup %2213 }
 0x841   :  { %v1074_v63 = vadd.f32 -1.4531521, %v1072_v61 }
 0x842   :  { %v1060_v2 = vmul.f32 %v2210_v56, %v1059_v62 }
 0x843   :  { %v1076_v4 = vmul.f32 %v1074_v63, %v1055_v58 }
 0x844   :  { %v1061_v5 = vadd.f32 %v2210_v56, %v1060_v2 }
 0x845   :  { %v1078_v7 = vadd.f32 1.4214138, %v1076_v4 }
 0x846   :  { %v1065_v11 = vsel %vm1064_vm9, %v2210_v56, %v1061_v5 }
 0x847   :  { %v1080_v12 = vmul.f32 %v1078_v7, %v1055_v58  ;;  %v1070_v15 = vsel %vm1067_vm10, %v1069_v8, %v1065_v11  ;;  %v2062_v7 = vld [vmem:[%s3385_s9 + $0x28] sm:$0xf]  ;;  %v2055_v11 = vld [vmem:[%s3418_s6 + $0x20] sm:$0xff] }
 0x848   :  { %v1073_v18 = vmul.f32 1.0614054, %v1070_v15  ;;  %v2056_v8 = vld [vmem:[%s3418_s6 + $0x28] sm:$0xf]  ;;  %2063 = vmatpush.msk.msra.mxu0 %vm447_vm3, %v2062_v7 }
 0x849   :  { %v1082_v19 = vadd.f32 -0.28449672, %v1080_v12  ;;  %2057 = vmatpush.msk.msrb.mxu3 %vm447_vm3, %v2056_v8  ;;  %v2061_v12 = vld [vmem:[%s3385_s9 + $0x20] sm:$0xff] }
 0x84a   :  { %v1075_v22 = vadd.f32 -1.4531521, %v1073_v18  ;;  %1283 = vmatpush.msra.mxu0 %v2061_v12  ;;  %v2060_v18 = vld [vmem:[%s3385_s9 + $0x18] sm:$0xff] }
 0x84b   :  { %v1084_v24 = vmul.f32 %v1082_v19, %v1055_v58  ;;  %1246 = vmatpush.msrb.mxu3 %v2055_v11  ;;  %v2066_v19 = vld [vmem:[%s3387_s11 + $0x18] sm:$0xff] }
 0x84c   :  { %v1077_v26 = vmul.f32 %v1075_v22, %v1070_v15  ;;  %1284 = vmatpush.msra.mxu0 %v2060_v18  ;;  %1319 = vmatpush.msrb.mxu1 %v2066_v19 }
 0x84d   :  { %v1086_v27 = vadd.f32 0.2548296, %v1084_v24 }
 0x84e   :  { %v1079_v28 = vadd.f32 1.4214138, %v1077_v26 }
 0x84f   :  { %v1088_v29 = vmul.f32 %v1086_v27, %v1055_v58 }
 0x850   :  { %v1081_v20 = vmul.f32 %v1079_v28, %v1070_v15 }
 0x851   :  { %v1098_v37 = vmul.f32 %v2212_v31, %v1088_v29 }
 0x852   :  { %v1083_v38 = vadd.f32 -0.28449672, %v1081_v20 }
 0x853   :  { %v1100_v40 = vsub.f32 1.0, %v1098_v37 }
 0x854   :  { %v1085_v34 = vmul.f32 %v1083_v38, %v1070_v15 }
 0x855   :  { %v1104_v45 = vsub.f32 0.0, %v1100_v40 }
 0x856   :  { %v1087_v36 = vadd.f32 0.2548296, %v1085_v34  ;;  %v2153_v34 = vld [vmem:[#allocation10 + $0x1] ss:$0 sm:$0xff] }
 0x857   :  { %v1106_v47 = vsel %vm1102_vm11, %v1100_v40, %v1104_v45 }
 0x858   :  { %v1110_v35 = vadd.f32 1.0, %v1106_v47  ;;  %v1089_v6 = vmul.f32 %v1087_v36, %v1070_v15  ;;  %v2054_v15 = vld [vmem:[%s3418_s6 + $0x18] sm:$0xff] }
 0x859   :  { %1247 = vmatpush.msrb.mxu3 %v2054_v15 }
 0x85a   :  { %v1112_v50 = vmul.f32 %v1110_v35, %v1108_v48  ;;  %v1099_v51 = vmul.f32 %v2214_v49, %v1089_v6  ;;  %v2154_v35 = vld [vmem:[#allocation12 + $0x1] ss:$0 sm:$0xff] }
 0x85c   :  { %2052 = vmatmul.msk.f32.vlgmr.msrb.gmra.mxu2 %vm1118_vm12, %v1112_v50  ;;  %v1101_v52 = vsub.f32 1.0, %v1099_v51 }
 0x85e   :  { %v1105_v9 = vsub.f32 0.0, %v1101_v52 }
 0x860   :  { %v1107_v53 = vsel %vm1103_vm13, %v1101_v52, %v1105_v9 }
 0x861   :  { %v1111_v33 = vadd.f32 1.0, %v1107_v53 }
 0x863   :  { %v1113_v55 = vmul.f32 %v1111_v33, %v1109_v54 }
 0x865   :  { %2053 = vmatmul.msk.f32.gmra.mxu2 %vm1118_vm12, %v1113_v55 }
 0x8df   :  { %v1142_v56 = vpop.f32.mrf.mxu2 }
 0x8e0   :  { %v1148_v57 = vadd.f32 %v1142_v56, %v3091_v43 }
 0x8e2   :  { %v3151_v58 = vadd.f32 %v2152_v32, %v1148_v57  ;;  %v2157_v57 = vld [vmem:[#allocation13 + $0x1] ss:$0 sm:$0xff] }
 0x8e4   :  { %v1160_v59 = vsel %vm372_vm1, %v3151_v58, 0.0 }
 0x8e5   :  { %1161 = vadd.xlane.f32.xlu0 %v1160_v59  ;;  %v2155_v59 = vld [vmem:[#allocation15 + $0x1] ss:$0 sm:$0xff] }
 0x8e8   :  { %v1145_v60 = vpop.f32.mrf.mxu2 }
 0x8e9   :  { %v1149_v42 = vadd.f32 %v1145_v60, %v3096_v46  ;;  %v2156_v60 = vld [vmem:[#allocation16 + $0x1] ss:$0 sm:$0xff] }
 0x8eb   :  { %v3156_v61 = vadd.f32 %v2152_v32, %v1149_v42 }
 0x8ed   :  { %v1163_v41 = vsel %vm372_vm1, %v3156_v61, 0.0 }
 0x8ee   :  { %1164 = vadd.xlane.f32.xlu1 %v1163_v41 }
 0x958   :  { %v1162_v62 = vpop.xlane.xlu0 %1161 }
 0x959   :  { %v1166_v63 = vmul.f32 %v1162_v62, %v2938_v17 }
 0x95b   :  { %v1168_v43 = vsub.f32 %v3151_v58, %v1166_v63 }
 0x95d   :  { %v1170_v0 = vmul.f32 %v1168_v43, %v1168_v43 }
 0x95f   :  { %v1172_v1 = vsel %vm372_vm1, %v1170_v0, 0.0 }
 0x960   :  { %1173 = vadd.xlane.f32.xlu2 %v1172_v1 }
 0x961   :  { %v1165_v2 = vpop.xlane.xlu1 %1164 }
 0x962   :  { %v1167_v3 = vmul.f32 %v1165_v2, %v2938_v17 }
 0x964   :  { %v1169_v46 = vsub.f32 %v3156_v61, %v1167_v3 }
 0x966   :  { %v1171_v4 = vmul.f32 %v1169_v46, %v1169_v46 }
 0x968   :  { %v1175_v5 = vsel %vm372_vm1, %v1171_v4, 0.0 }
 0x969   :  { %1176 = vadd.xlane.f32.xlu0 %v1175_v5 }
 0x9d3   :  { %v1174_v22 = vpop.xlane.xlu2 %1173 }
 0x9d4   :  { %v1178_v24 = vmul.f32 %v1174_v22, %v2938_v17 }
 0x9d6   :  { %v1180_v25 = vadd.f32 1e-05, %v1178_v24 }
 0x9d8   :  { %2215 = vrsqrt.f32 %v1180_v25  ;;  %vm1188_vm15 = vweird.f32 %v1180_v25 }
 0x9dc   :  { %v1177_v26 = vpop.xlane.xlu0 %1176 }
 0x9dd   :  { %v1179_v27 = vmul.f32 %v1177_v26, %v2938_v17 }
 0x9de   :  { %v2216_v28 = vpop.eup %2215 }
 0x9df   :  { %v1183_v29 = vmul.f32 %v2216_v28, %v1180_v25  ;;  %v1181_v30 = vadd.f32 1e-05, %v1179_v27  ;;  %vm1189_vm14 = vweird.f32 %v2216_v28 }
 0x9e0   :  { %vm1190_vm2 = vmor %vm1188_vm15, %vm1189_vm14 }
 0x9e1   :  { %v1184_v31 = vmul.f32 %v2216_v28, %v1183_v29  ;;  %2217 = vrsqrt.f32 %v1181_v30  ;;  %vm1198_vm5 = vweird.f32 %v1181_v30 }
 0x9e3   :  { %v1185_v20 = vmul.f32 0.5, %v1184_v31 }
 0x9e5   :  { %v1186_v37 = vsub.f32 1.5, %v1185_v20 }
 0x9e7   :  { %v2218_v38 = vpop.eup %2217  ;;  %v1187_v40 = vmul.f32 %v2216_v28, %v1186_v37 }
 0x9e8   :  { %v1193_v45 = vmul.f32 %v2218_v38, %v1181_v30  ;;  %vm1199_vm4 = vweird.f32 %v2218_v38 }
 0x9e9   :  { %v1191_v36 = vsel %vm1190_vm2, %v2216_v28, %v1187_v40  ;;  %vm1200_vm6 = vmor %vm1198_vm5, %vm1199_vm4 }
 0x9ea   :  { %v1202_v47 = vmul.f32 %v1191_v36, %v1168_v43  ;;  %v1194_v48 = vmul.f32 %v2218_v38, %v1193_v45 }
 0x9ec   :  { %v1207_v6 = vmul.f32 %v2153_v34, %v1202_v47  ;;  %v1195_v49 = vmul.f32 0.5, %v1194_v48 }
 0x9ee   :  { %v1196_v50 = vsub.f32 1.5, %v1195_v49  ;;  %v1212_v51 = vadd.f32 %v2154_v35, %v1207_v6 }
 0x9f0   :  { %v1197_v52 = vmul.f32 %v2218_v38, %v1196_v50  ;;  %2058 = vmatmul.msk.f32.vlgmr.msrb.gmra.mxu3 %vm372_vm1, %v1212_v51  ;;  %2064 = vmatmul.msk.f32.vlgmr.msra.gmra.mxu0 %vm372_vm1, %v1212_v51 }
 0x9f1   :  { %2070 = vmatmul.msk.f32.vlgmr.msrb.gmra.mxu1 %vm372_vm1, %v1212_v51 }
 0x9f2   :  { %v1201_v9 = vsel %vm1200_vm6, %v2218_v38, %v1197_v52 }
 0x9f3   :  { %v1203_v53 = vmul.f32 %v1201_v9, %v1169_v46 }
 0x9f5   :  { %v1208_v54 = vmul.f32 %v2153_v34, %v1203_v53 }
 0x9f7   :  { %v1213_v33 = vadd.f32 %v2154_v35, %v1208_v54 }
 0x9f9   :  { %2059 = vmatmul.msk.f32.gmra.mxu3 %vm372_vm1, %v1213_v33  ;;  %2065 = vmatmul.msk.f32.gmra.mxu0 %vm372_vm1, %v1213_v33 }
 0x9fa   :  { %2071 = vmatmul.msk.f32.gmra.mxu1 %vm372_vm1, %v1213_v33 }
 0xa6d   :  { %v1286_v55 = vpop.f32.mrf.mxu0 }
 0xa6e   :  { %v1321_v32 = vpop.f32.mrf.mxu1  ;;  %v1287_v3 = vadd.f32 %v2155_v59, %v1286_v55 }
 0xa6f   :  { %v1322_v43 = vadd.f32 %v2156_v60, %v1321_v32 }
 0xa71   :  { %v1441_v5 = vmul.f32 %v2984_v13, %v1322_v43  ;;  %v1386_v7 = vmul.f32 %v2986_v16, %v1322_v43  ;;  %v1554_v15 = vmul.f32 %v2994_v21, %v1322_v43  ;;  %v1640_v18 = vmul.f32 %v2996_v23, %v1322_v43 }
 0xa73   :  { %v1249_v56 = vpop.f32.mrf.mxu3 }
 0xa74   :  { %v1250_v63 = vadd.f32 %v2157_v57, %v1249_v56 }
 0xa76   :  { %v1289_v42 = vpop.f32.mrf.mxu0  ;;  %v3208_v46 = vmul.f32 0.4472136, %v1250_v63 }
 0xa77   :  { %v1290_v41 = vadd.f32 %v2155_v59, %v1289_v42  ;;  %v1324_v62 = vpop.f32.mrf.mxu1 }
 0xa78   :  { %v1325_v0 = vadd.f32 %v2156_v60, %v1324_v62  ;;  %v1327_v11 = vmul.f32 %v2986_v16, %v3208_v46  ;;  %v1388_v12 = vmul.f32 %v2984_v13, %v3208_v46 }
 0xa79   :  { %2072 = vmatpush.xpose.msk.msra.mxu2 %vm372_vm1, %v1290_v41  ;;  %2076 = vmatpush.xpose.msk.msra.mxu3 %vm372_vm1, %v1290_v41 }
 0xa7a   :  { %v1442_v1 = vmul.f32 %v2984_v13, %v1325_v0  ;;  %v1387_v2 = vmul.f32 %v2986_v16, %v1325_v0  ;;  %v1555_v8 = vmul.f32 %v2994_v21, %v1325_v0  ;;  %v1641_v10 = vmul.f32 %v2996_v23, %v1325_v0 }
 0xa7b   :  { %v1501_v23 = vmul.f32 %v2994_v21, %v3208_v46 }
 0xa7c   :  { %1463 = vmatpush.msrb.mxu0 %v1442_v1  ;;  %1492 = vmatpush.msra.mxu1 %v1387_v2  ;;  %v1252_v4 = vpop.f32.mrf.mxu3 }
 0xa7d   :  { %2073 = vmatpush.xpose.msk.msra.mxu2 %vm372_vm1, %v1287_v3  ;;  %2077 = vmatpush.xpose.msk.msra.mxu3 %vm372_vm1, %v1287_v3  ;;  %v1253_v14 = vadd.f32 %v2157_v57, %v1252_v4 }
 0xa7e   :  { %1464 = vmatpush.msrb.mxu0 %v1441_v5  ;;  %1493 = vmatpush.msra.mxu1 %v1386_v7  ;;  %v2267_v5 = vld [vmem:[#allocation4 + $0x3] ss:$0 sm:$0xff] }
 0xa7f   :  { %v3226_v19 = vmul.f32 0.4472136, %v1253_v14  ;;  %v1587_v7 = vmul.f32 %v2267_v5, %v3208_v46 }
 0xa80   :  { %2090 = vmatpush.xpose.msk.msra.mxu0 %vm372_vm1, %v1290_v41  ;;  %1662 = vmatpush.msrb.mxu1 %v1641_v10 }
 0xa81   :  { %2084 = vmatpush.xpose.msk.msrb.mxu2 %vm372_vm1, %v1290_v41  ;;  %1576 = vmatpush.msrb.mxu3 %v1555_v8  ;;  %v1328_v22 = vmul.f32 %v2986_v16, %v3226_v19  ;;  %v1389_v24 = vmul.f32 %v2984_v13, %v3226_v19  ;;  %v1502_v25 = vmul.f32 %v2994_v21, %v3226_v19 }
 0xa82   :  { %2074 = vmatmul.msk.f32.vlgmr.msra.gmra.mxu2 %vm372_vm1, %v1327_v11  ;;  %2078 = vmatmul.msk.f32.vlgmr.msra.gmra.mxu3 %vm372_vm1, %v1388_v12  ;;  %v1588_v10 = vmul.f32 %v2267_v5, %v3226_v19 }
 0xa83   :  { %1577 = vmatpush.msrb.mxu3 %v1554_v15  ;;  %1663 = vmatpush.msrb.mxu1 %v1640_v18 }
 0xa84   :  { %2091 = vmatpush.xpose.msk.msra.mxu0 %vm372_vm1, %v1287_v3 }
 0xa85   :  { %2085 = vmatpush.xpose.msk.msrb.mxu2 %vm372_vm1, %v1287_v3 }
 0xa8a   :  { %2075 = vmatmul.msk.f32.gmra.mxu2 %vm372_vm1, %v1328_v22  ;;  %2079 = vmatmul.msk.f32.gmra.mxu3 %vm372_vm1, %v1389_v24 }
 0xa92   :  { %2086 = vmatmul.msk.f32.vlgmr.msrb.gmra.mxu2 %vm372_vm1, %v1501_v23  ;;  %v2268_v23 = vld [vmem:[#allocation6] sm:$0xff] }
 0xa9a   :  { %2087 = vmatmul.msk.f32.gmra.mxu2 %vm372_vm1, %v1502_v25 }
 0xb05   :  { %v1358_v26 = vpop.f32.mrf.mxu2  ;;  %v1413_v27 = vpop.f32.mrf.mxu3 }
 0xb06   :  { %v1414_v16 = vadd.f32 %v1413_v27, %v3030_v39  ;;  %v1359_v20 = vadd.f32 %v1358_v26, %v3030_v39 }
 0xb08   :  { %v1419_v13 = vsel %vm338_vm0, %v1414_v16, -inf  ;;  %v1364_v21 = vsel %vm338_vm0, %v1359_v20, -inf }
 0xb09   :  { %1420 = vmax.xlane.f32.xlu1 %v1419_v13  ;;  %v2269_v13 = vld [vmem:[#allocation6 + $0x8] sm:$0xff] }
 0xb0d   :  { %v1361_v28 = vpop.f32.mrf.mxu2  ;;  %v1416_v29 = vpop.f32.mrf.mxu3 }
 0xb0e   :  { %v1417_v30 = vadd.f32 %v1416_v29, %v3034_v44  ;;  %v1362_v51 = vadd.f32 %v1361_v28, %v3034_v44 }
 0xb10   :  { %v1422_v31 = vsel %vm338_vm0, %v1417_v30, -inf  ;;  %v1367_v55 = vsel %vm338_vm0, %v1362_v51, -inf }
 0xb11   :  { %1423 = vmax.xlane.f32.xlu2 %v1422_v31 }
 0xb15   :  { %v1526_v37 = vpop.f32.mrf.mxu2 }
 0xb16   :  { %v1527_v32 = vadd.f32 %v1526_v37, %v3030_v39 }
 0xb19   :  { %1365 = vmax.xlane.f32.xlu2 %v1364_v21 }
 0xb1d   :  { %v1529_v38 = vpop.f32.mrf.mxu2 }
 0xb1e   :  { %v1530_v40 = vadd.f32 %v1529_v38, %v3034_v44  ;;  %v1532_v44 = vsel %vm338_vm0, %v1527_v32, -inf }
 0xb20   :  { %v1535_v34 = vsel %vm338_vm0, %v1530_v40, -inf }
 0xb21   :  { %1536 = vmax.xlane.f32.xlu2 %v1535_v34 }
 0xb7c   :  { %v1421_v45 = vpop.xlane.xlu1 %1420 }
 0xb7d   :  { %v1425_v36 = vsub.f32 %v1414_v16, %v1421_v45 }
 0xb7f   :  { %v1427_v47 = vmul.f32 1.442695, %v1425_v36 }
 0xb81   :  { %2219 = vpow2.f32 %v1427_v47 }
 0xb84   :  { %v1424_v48 = vpop.xlane.xlu2 %1423 }
 0xb85   :  { %v1426_v35 = vsub.f32 %v1417_v30, %v1424_v48 }
 0xb87   :  { %v2220_v6 = vpop.eup %2219  ;;  %v1429_v49 = vmul.f32 1.442695, %v1426_v35 }
 0xb88   :  { %v1431_v50 = vsel %vm338_vm0, %v2220_v6, 0.0 }
 0xb89   :  { %2221 = vpow2.f32 %v1429_v49  ;;  %1432 = vadd.xlane.f32.xlu0 %v1431_v50 }
 0xb8c   :  { %v1366_v52 = vpop.xlane.xlu2 %1365 }
 0xb8d   :  { %v1370_v9 = vsub.f32 %v1359_v20, %v1366_v52 }
 0xb8f   :  { %v2222_v53 = vpop.eup %2221  ;;  %v1372_v54 = vmul.f32 1.442695, %v1370_v9 }
 0xb90   :  { %v1434_v33 = vsel %vm338_vm0, %v2222_v53, 0.0 }
 0xb91   :  { %2223 = vpow2.f32 %v1372_v54  ;;  %1435 = vadd.xlane.f32.xlu1 %v1434_v33  ;;  %1368 = vmax.xlane.f32.xlu0 %v1367_v55 }
 0xb94   :  { %v1537_v56 = vpop.xlane.xlu2 %1536 }
 0xb95   :  { %v1539_v57 = vsub.f32 %v1530_v40, %v1537_v56 }
 0xb97   :  { %v2224_v59 = vpop.eup %2223  ;;  %v1542_v60 = vmul.f32 1.442695, %v1539_v57 }
 0xb98   :  { %v1376_v42 = vsel %vm338_vm0, %v2224_v59, 0.0 }
 0xb99   :  { %2225 = vpow2.f32 %v1542_v60  ;;  %1377 = vadd.xlane.f32.xlu2 %v1376_v42  ;;  %1533 = vmax.xlane.f32.xlu1 %v1532_v44  ;;  %v2097_v44 = vld [vmem:[%s3389_s13 + $0x20] sm:$0xff] }
 0xb9f   :  { %v3257_v41 = vpop.eup %2225 }
 0xba0   :  { %v1547_v62 = vsel %vm338_vm0, %v3257_v41, 0.0 }
 0xba1   :  { %1548 = vadd.xlane.f32.xlu2 %v1547_v62 }
 0xbfc   :  { %v1433_v63 = vpop.xlane.xlu0 %1432 }
 0xbfd   :  { %2227 = vrcp.f32 %v1433_v63 }
 0xc03   :  { %v2228_v39 = vpop.eup %2227 }
 0xc04   :  { %v1439_v43 = vmul.f32 %v2228_v39, %v2220_v6  ;;  %v1436_v0 = vpop.xlane.xlu1 %1435  ;;  %v1369_v12 = vpop.xlane.xlu0 %1368 }
 0xc05   :  { %2229 = vrcp.f32 %v1436_v0  ;;  %v1371_v15 = vsub.f32 %v1362_v51, %v1369_v12 }
 0xc06   :  { %2080 = vmatmul.msk.f32.vlgmr.msrb.gmra.mxu0 %vm338_vm0, %v1439_v43 }
 0xc07   :  { %v1374_v18 = vmul.f32 1.442695, %v1371_v15 }
 0xc0b   :  { %v2230_v1 = vpop.eup %2229 }
 0xc0c   :  { %v1378_v2 = vpop.xlane.xlu2 %1377  ;;  %v1440_v3 = vmul.f32 %v2230_v1, %v2222_v53  ;;  %v1534_v22 = vpop.xlane.xlu1 %1533 }
 0xc0d   :  { %2231 = vrcp.f32 %v1378_v2  ;;  %v1538_v25 = vsub.f32 %v1527_v32, %v1534_v22  ;;  %v2098_v32 = vld [vmem:[%s3389_s13 + $0x28] sm:$0xf] }
 0xc0e   :  { %2081 = vmatmul.msk.f32.gmra.mxu0 %vm338_vm0, %v1440_v3  ;;  %2233 = vpow2.f32 %v1374_v18  ;;  %2099 = vmatpush.msk.msra.mxu2 %vm447_vm3, %v2098_v32 }
 0xc0f   :  { %v1540_v27 = vmul.f32 1.442695, %v1538_v25 }
 0xc10   :  { %1700 = vmatpush.msra.mxu2 %v2097_v44 }
 0xc11   :  { %2235 = vpow2.f32 %v1540_v27 }
 0xc13   :  { %v2232_v4 = vpop.eup %2231 }
 0xc14   :  { %v1384_v8 = vmul.f32 %v2232_v4, %v2224_v59  ;;  %v2234_v19 = vpop.eup %2233  ;;  %v1549_v51 = vpop.xlane.xlu2 %1548 }
 0xc15   :  { %v1379_v30 = vsel %vm338_vm0, %v2234_v19, 0.0 }
 0xc16   :  { %2082 = vmatmul.msk.f32.vlgmr.msra.gmra.mxu1 %vm338_vm0, %v1384_v8  ;;  %2092 = vmatmul.msk.f32.vlgmr.msra.gmra.mxu0 %vm372_vm1, %v1587_v7 }
 0xc17   :  { %v2236_v31 = vpop.eup %2235 }
 0xc18   :  { %v1544_v20 = vsel %vm338_vm0, %v2236_v31, 0.0 }
 0xc1e   :  { %2093 = vmatmul.msk.f32.gmra.mxu0 %vm372_vm1, %v1588_v10  ;;  %v2158_v10 = vld [vmem:[#allocation18 + $0x1] ss:$0 sm:$0xff] }
 0xc83   :  { %v3268_v11 = vpop.f32.mrf.mxu0 }
 0xc8b   :  { %v3270_v14 = vpop.f32.mrf.mxu0 }
 0xc93   :  { %v1612_v24 = vpop.f32.mrf.mxu0  ;;  %v1495_v62 = vpop.f32.mrf.mxu1 }
 0xc94   :  { %v1613_v46 = vadd.f32 %v2268_v23, %v1612_v24  ;;  %v1496_v43 = vadd.f32 %v1495_v62, %v3268_v11 }
 0xc96   :  { %v1618_v26 = vsel %vm338_vm0, %v1613_v46, -inf }
 0xc97   :  { %1619 = vmax.xlane.f32.xlu0 %v1618_v26 }
 0xc9b   :  { %v1615_v16 = vpop.f32.mrf.mxu0 }
 0xc9c   :  { %v1616_v28 = vadd.f32 %v2269_v13, %v1615_v16 }
 0xc9e   :  { %v1621_v29 = vsel %vm338_vm0, %v1616_v28, -inf }
 0xc9f   :  { %1622 = vmax.xlane.f32.xlu1 %v1621_v29  ;;  %1380 = vadd.xlane.f32.xlu0 %v1379_v30  ;;  %v2104_v29 = vld [vmem:[%s3393_s17 + $0x28] sm:$0xf]  ;;  %v2103_v30 = vld [vmem:[%s3393_s17 + $0x20] sm:$0xff] }
 0xca0   :  { %2105 = vmatpush.msk.msra.mxu3 %vm447_vm3, %v2104_v29 }
 0xca2   :  { %1808 = vmatpush.msra.mxu3 %v2103_v30 }
 0xca7   :  { %1545 = vadd.xlane.f32.xlu1 %v1544_v20 }
 0xd0a   :  { %v1620_v37 = vpop.xlane.xlu0 %1619 }
 0xd0b   :  { %v1624_v21 = vsub.f32 %v1613_v46, %v1620_v37 }
 0xd0d   :  { %v1626_v38 = vmul.f32 1.442695, %v1624_v21 }
 0xd0f   :  { %2237 = vpow2.f32 %v1626_v38 }
 0xd12   :  { %v1623_v40 = vpop.xlane.xlu1 %1622  ;;  %v1381_v34 = vpop.xlane.xlu0 %1380 }
 0xd13   :  { %v1625_v45 = vsub.f32 %v1616_v28, %v1623_v40  ;;  %2239 = vrcp.f32 %v1381_v34 }
 0xd15   :  { %v2238_v36 = vpop.eup %2237  ;;  %v1628_v47 = vmul.f32 1.442695, %v1625_v45 }
 0xd16   :  { %v1630_v48 = vsel %vm338_vm0, %v2238_v36, 0.0 }
 0xd17   :  { %2241 = vpow2.f32 %v1628_v47  ;;  %1631 = vadd.xlane.f32.xlu0 %v1630_v48 }
 0xd19   :  { %v2240_v35 = vpop.eup %2239 }
 0xd1a   :  { %v1546_v6 = vpop.xlane.xlu1 %1545  ;;  %v1385_v49 = vmul.f32 %v2240_v35, %v2234_v19 }
 0xd1b   :  { %2243 = vrcp.f32 %v1546_v6 }
 0xd1c   :  { %2083 = vmatmul.msk.f32.gmra.mxu1 %vm338_vm0, %v1385_v49  ;;  %2245 = vrcp.f32 %v1549_v51  ;;  %v2159_v51 = vld [vmem:[#allocation19 + $0x1] ss:$0 sm:$0xff] }
 0xd1d   :  { %v2242_v50 = vpop.eup %2241 }
 0xd1e   :  { %v1633_v52 = vsel %vm338_vm0, %v2242_v50, 0.0 }
 0xd1f   :  { %1634 = vadd.xlane.f32.xlu1 %v1633_v52 }
 0xd21   :  { %v2244_v9 = vpop.eup %2243 }
 0xd22   :  { %v1552_v53 = vmul.f32 %v2244_v9, %v2236_v31  ;;  %v2246_v54 = vpop.eup %2245  ;;  %v2102_v31 = vld [vmem:[%s3393_s17 + $0x18] sm:$0xff] }
 0xd23   :  { %v1553_v33 = vmul.f32 %v2246_v54, %v3257_v41  ;;  %v2096_v41 = vld [vmem:[%s3389_s13 + $0x18] sm:$0xff]  ;;  %1809 = vmatpush.msra.mxu3 %v2102_v31  ;;  %v2160_v54 = vld [vmem:[#allocation21 + $0x1] ss:$0 sm:$0xff] }
 0xd24   :  { %2088 = vmatmul.msk.f32.vlgmr.msrb.gmra.mxu3 %vm338_vm0, %v1552_v53  ;;  %1701 = vmatpush.msra.mxu2 %v2096_v41  ;;  %v2161_v41 = vld [vmem:[#allocation22 + $0x1] ss:$0 sm:$0xff] }
 0xd2c   :  { %2089 = vmatmul.msk.f32.gmra.mxu3 %vm338_vm0, %v1553_v33 }
 0xd8a   :  { %v1632_v55 = vpop.xlane.xlu0 %1631 }
 0xd8b   :  { %2247 = vrcp.f32 %v1632_v55 }
 0xd91   :  { %v2248_v56 = vpop.eup %2247 }
 0xd92   :  { %v1638_v57 = vmul.f32 %v2248_v56, %v2238_v36  ;;  %v1635_v59 = vpop.xlane.xlu1 %1634 }
 0xd93   :  { %2249 = vrcp.f32 %v1635_v59 }
 0xd94   :  { %2094 = vmatmul.msk.f32.vlgmr.msrb.gmra.mxu1 %vm338_vm0, %v1638_v57 }
 0xd99   :  { %v2250_v60 = vpop.eup %2249  ;;  %v1498_v63 = vpop.f32.mrf.mxu1 }
 0xd9a   :  { %v1639_v42 = vmul.f32 %v2250_v60, %v2242_v50  ;;  %v1499_v4 = vadd.f32 %v1498_v63, %v3270_v14 }
 0xd9c   :  { %2095 = vmatmul.msk.f32.gmra.mxu1 %vm338_vm0, %v1639_v42 }
 0xda7   :  { %v1579_v39 = vpop.f32.mrf.mxu3 }
 0xda8   :  { %v1585_v0 = vadd.f32 %v1579_v39, %v1496_v43 }
 0xdaf   :  { %v1582_v3 = vpop.f32.mrf.mxu3 }
 0xdb0   :  { %v1586_v5 = vadd.f32 %v1582_v3, %v1499_v4 }
 0xe11   :  { %v1665_v1 = vpop.f32.mrf.mxu1 }
 0xe12   :  { %v1671_v2 = vadd.f32 %v1665_v1, %v1585_v0 }
 0xe14   :  { %2100 = vmatmul.msk.f32.vlgmr.msra.gmra.mxu2 %vm372_vm1, %v1671_v2 }
 0xe19   :  { %v1668_v7 = vpop.f32.mrf.mxu1 }
 0xe1a   :  { %v1672_v8 = vadd.f32 %v1668_v7, %v1586_v5 }
 0xe1c   :  { %2101 = vmatmul.msk.f32.gmra.mxu2 %vm372_vm1, %v1672_v8 }
 0xe97   :  { %v1703_v12 = vpop.f32.mrf.mxu2 }
 0xe98   :  { %v1709_v15 = vadd.f32 %v1703_v12, %v3151_v58 }
 0xe9a   :  { %v3299_v18 = vadd.f32 %v2158_v10, %v1709_v15  ;;  %v2111_v15 = vld [vmem:[%s3395_s19 + $0x38] sm:$0xff] }
 0xe9b   :  { %1920 = vmatpush.msrb.mxu0 %v2111_v15 }
 0xe9c   :  { %v1722_v11 = vsel %vm372_vm1, %v3299_v18, 0.0 }
 0xe9d   :  { %1723 = vadd.xlane.f32.xlu2 %v1722_v11 }
 0xe9f   :  { %v1706_v22 = vpop.f32.mrf.mxu2 }
 0xea0   :  { %v1710_v24 = vadd.f32 %v1706_v22, %v3156_v61 }
 0xea2   :  { %v3304_v23 = vadd.f32 %v2158_v10, %v1710_v24  ;;  %v2110_v24 = vld [vmem:[%s3395_s19 + $0x30] sm:$0xff] }
 0xea3   :  { %1921 = vmatpush.msrb.mxu0 %v2110_v24 }
 0xea4   :  { %v1725_v14 = vsel %vm372_vm1, %v3304_v23, 0.0 }
 0xea5   :  { %1726 = vadd.xlane.f32.xlu0 %v1725_v14 }
 0xf10   :  { %v1724_v46 = vpop.xlane.xlu2 %1723 }
 0xf11   :  { %v1728_v25 = vmul.f32 %v1724_v46, %v2938_v17 }
 0xf13   :  { %v1730_v58 = vsub.f32 %v3299_v18, %v1728_v25  ;;  %v2109_v25 = vld [vmem:[%s3395_s19 + $0x28] sm:$0xff] }
 0xf14   :  { %1922 = vmatpush.msrb.mxu0 %v2109_v25 }
 0xf15   :  { %v1732_v26 = vmul.f32 %v1730_v58, %v1730_v58 }
 0xf17   :  { %v1734_v27 = vsel %vm372_vm1, %v1732_v26, 0.0 }
 0xf18   :  { %1735 = vadd.xlane.f32.xlu1 %v1734_v27  ;;  %v1727_v19 = vpop.xlane.xlu0 %1726 }
 0xf19   :  { %v1729_v16 = vmul.f32 %v1727_v19, %v2938_v17 }
 0xf1b   :  { %v1731_v61 = vsub.f32 %v3304_v23, %v1729_v16 }
 0xf1d   :  { %v1733_v13 = vmul.f32 %v1731_v61, %v1731_v61 }
 0xf1f   :  { %v1737_v28 = vsel %vm372_vm1, %v1733_v13, 0.0 }
 0xf20   :  { %1738 = vadd.xlane.f32.xlu2 %v1737_v28 }
 0xf8b   :  { %v1736_v20 = vpop.xlane.xlu1 %1735 }
 0xf8c   :  { %v1740_v37 = vmul.f32 %v1736_v20, %v2938_v17 }
 0xf8e   :  { %v1742_v21 = vadd.f32 1e-05, %v1740_v37 }
 0xf90   :  { %2251 = vrsqrt.f32 %v1742_v21  ;;  %vm1750_vm3 = vweird.f32 %v1742_v21 }
 0xf93   :  { %v1739_v38 = vpop.xlane.xlu2 %1738 }
 0xf94   :  { %v1741_v40 = vmul.f32 %v1739_v38, %v2938_v17 }
 0xf96   :  { %v2252_v34 = vpop.eup %2251  ;;  %v1743_v45 = vadd.f32 1e-05, %v1741_v40 }
 0xf97   :  { %v1745_v36 = vmul.f32 %v2252_v34, %v1742_v21  ;;  %vm1751_vm0 = vweird.f32 %v2252_v34 }
 0xf98   :  { %2253 = vrsqrt.f32 %v1743_v45  ;;  %vm1752_vm7 = vmor %vm1750_vm3, %vm1751_vm0  ;;  %vm1760_vm9 = vweird.f32 %v1743_v45 }
 0xf99   :  { %v1746_v47 = vmul.f32 %v2252_v34, %v1745_v36 }
 0xf9b   :  { %v1747_v48 = vmul.f32 0.5, %v1746_v47 }
 0xf9d   :  { %v1748_v35 = vsub.f32 1.5, %v1747_v48 }
 0xf9e   :  { %v2254_v6 = vpop.eup %2253 }
 0xf9f   :  { %v1749_v49 = vmul.f32 %v2252_v34, %v1748_v35  ;;  %v1755_v50 = vmul.f32 %v2254_v6, %v1743_v45  ;;  %vm1761_vm8 = vweird.f32 %v2254_v6 }
 0xfa0   :  { %vm1762_vm10 = vmor %vm1760_vm9, %vm1761_vm8 }
 0xfa1   :  { %v1753_v52 = vsel %vm1752_vm7, %v2252_v34, %v1749_v49  ;;  %v1756_v9 = vmul.f32 %v2254_v6, %v1755_v50 }
 0xfa2   :  { %v1764_v53 = vmul.f32 %v1753_v52, %v1730_v58  ;;  %v2108_v58 = vld [vmem:[%s3395_s19 + $0x20] sm:$0xff] }
 0xfa3   :  { %v1757_v33 = vmul.f32 0.5, %v1756_v9  ;;  %1923 = vmatpush.msrb.mxu0 %v2108_v58 }
 0xfa4   :  { %v1769_v55 = vmul.f32 %v2159_v51, %v1764_v53 }
 0xfa5   :  { %v1758_v32 = vsub.f32 1.5, %v1757_v33 }
 0xfa6   :  { %v1774_v56 = vadd.f32 %v2160_v54, %v1769_v55 }
 0xfa7   :  { %v1759_v57 = vmul.f32 %v2254_v6, %v1758_v32 }
 0xfa8   :  { %2106 = vmatmul.msk.f32.vlgmr.msra.gmra.mxu3 %vm372_vm1, %v1774_v56 }
 0xfa9   :  { %v1763_v59 = vsel %vm1762_vm10, %v2254_v6, %v1759_v57 }
 0xfaa   :  { %v1765_v60 = vmul.f32 %v1763_v59, %v1731_v61 }
 0xfac   :  { %v1770_v42 = vmul.f32 %v2159_v51, %v1765_v60 }
 0xfae   :  { %v1775_v44 = vadd.f32 %v2160_v54, %v1770_v42 }
 0xfb0   :  { %2107 = vmatmul.msk.f32.gmra.mxu3 %vm372_vm1, %v1775_v44 }
0x102b   :  { %v1811_v62 = vpop.f32.mrf.mxu3 }
0x102c   :  { %v3328_v63 = vadd.f32 %v2161_v41, %v1811_v62 }
0x102e   :  { %v3331_v39 = vmul.f32 0.70710677, %v3328_v63 }
0x1030   :  { %v1819_v43 = vand.u32 2147483647, %v3331_v39  ;;  %vm1885_vm0 = vcmp.ge.f32.partialorder %v3331_v39, 0.0 }
0x1032   :  { %v1821_v0 = vmul.f32 0.3275911, %v1819_v43  ;;  %v1873_v13 = vsub.f32 0.0, %v1819_v43 }
0x1033   :  { %v1814_v1 = vpop.f32.mrf.mxu3 }
0x1034   :  { %v1823_v2 = vadd.f32 1.0, %v1821_v0  ;;  %v3334_v3 = vadd.f32 %v2161_v41, %v1814_v1  ;;  %v1875_v37 = vmul.f32 %v1873_v13, %v1819_v43  ;;  %v1891_v1 = vmul.f32 0.5, %v3328_v63 }
0x1036   :  { %2255 = vrcp.f32 %v1823_v2  ;;  %v3337_v4 = vmul.f32 0.70710677, %v3334_v3  ;;  %v1836_v22 = vand.u32 2147483648, %v1823_v2  ;;  %v1834_v46 = vand.u32 2147483647, %v1823_v2 }
0x1037   :  { %vm1830_vm13 = vweird.f32 %v1823_v2  ;;  %v1877_v47 = vmul.f32 1.442695, %v1875_v37 }
0x1038   :  { %v1820_v5 = vand.u32 2147483647, %v3337_v4  ;;  %v1837_v27 = vor.u32 1.1754944e-38, %v1836_v22  ;;  %vm1835_vm15 = vcmp.eq.f32.partialorder %v1834_v46, 8.507059e+37  ;;  %vm1886_vm3 = vcmp.ge.f32.partialorder %v3337_v4, 0.0 }
0x1039   :  { %v1892_v22 = vmul.f32 0.5, %v3334_v3 }
0x103a   :  { %v1822_v7 = vmul.f32 0.3275911, %v1820_v5  ;;  %v1874_v6 = vsub.f32 0.0, %v1820_v5 }
0x103c   :  { %v2256_v8 = vpop.eup %2255  ;;  %v1824_v12 = vadd.f32 1.0, %v1822_v7  ;;  %v1876_v53 = vmul.f32 %v1874_v6, %v1820_v5 }
0x103d   :  { %v1826_v10 = vmul.f32 %v2256_v8, %v1823_v2  ;;  %vm1831_vm11 = vweird.f32 %v2256_v8 }
0x103e   :  { %2257 = vrcp.f32 %v1824_v12  ;;  %vm1832_vm14 = vmor %vm1830_vm13, %vm1831_vm11  ;;  %v1851_v20 = vand.u32 2147483648, %v1824_v12  ;;  %v1849_v38 = vand.u32 2147483647, %v1824_v12  ;;  %vm1845_vm4 = vweird.f32 %v1824_v12 }
0x103f   :  { %v1827_v11 = vsub.f32 1.0, %v1826_v10  ;;  %2259 = vpow2.f32 %v1877_v47  ;;  %v1879_v56 = vmul.f32 1.442695, %v1876_v53 }
0x1040   :  { %v1852_v36 = vor.u32 1.1754944e-38, %v1851_v20  ;;  %vm1850_vm6 = vcmp.eq.f32.partialorder %v1849_v38, 8.507059e+37 }
0x1041   :  { %v1828_v14 = vmul.f32 %v2256_v8, %v1827_v11  ;;  %2261 = vpow2.f32 %v1879_v56 }
0x1043   :  { %v1829_v26 = vadd.f32 %v2256_v8, %v1828_v14  ;;  %v2162_v14 = vld [vmem:[#allocation24 + $0x1] ss:$0 sm:$0xff] }
0x1044   :  { %v2258_v19 = vpop.eup %2257 }
0x1045   :  { %v1833_v16 = vsel %vm1832_vm14, %v2256_v8, %v1829_v26  ;;  %v1841_v28 = vmul.f32 %v2258_v19, %v1824_v12  ;;  %vm1846_vm2 = vweird.f32 %v2258_v19  ;;  %v2260_v57 = vpop.eup %2259 }
0x1046   :  { %v1838_v61 = vsel %vm1835_vm15, %v1837_v27, %v1833_v16  ;;  %vm1847_vm5 = vmor %vm1845_vm4, %vm1846_vm2 }
0x1047   :  { %v1855_v29 = vmul.f32 1.0614054, %v1838_v61  ;;  %v1842_v30 = vsub.f32 1.0, %v1841_v28  ;;  %v2262_v7 = vpop.eup %2261 }
0x1049   :  { %v1857_v31 = vadd.f32 -1.4531521, %v1855_v29  ;;  %v1843_v21 = vmul.f32 %v2258_v19, %v1842_v30 }
0x104b   :  { %v1859_v40 = vmul.f32 %v1857_v31, %v1838_v61  ;;  %v1844_v34 = vadd.f32 %v2258_v19, %v1843_v21 }
0x104d   :  { %v1861_v45 = vadd.f32 1.4214138, %v1859_v40  ;;  %v1848_v48 = vsel %vm1847_vm5, %v2258_v19, %v1844_v34 }
0x104e   :  { %v1853_v49 = vsel %vm1850_vm6, %v1852_v36, %v1848_v48 }
0x104f   :  { %v1863_v35 = vmul.f32 %v1861_v45, %v1838_v61  ;;  %v1856_v50 = vmul.f32 1.0614054, %v1853_v49 }
0x1051   :  { %v1865_v51 = vadd.f32 -0.28449672, %v1863_v35  ;;  %v1858_v52 = vadd.f32 -1.4531521, %v1856_v50  ;;  %v2163_v50 = vld [vmem:[#allocation25] ss:$0 sm:$0xff] }
0x1053   :  { %v1867_v9 = vmul.f32 %v1865_v51, %v1838_v61  ;;  %v1860_v54 = vmul.f32 %v1858_v52, %v1853_v49 }
0x1055   :  { %v1869_v33 = vadd.f32 0.2548296, %v1867_v9  ;;  %v1862_v55 = vadd.f32 1.4214138, %v1860_v54  ;;  %v2164_v9 = vld [vmem:[#allocation27] ss:$0 sm:$0xff] }
0x1057   :  { %v1871_v32 = vmul.f32 %v1869_v33, %v1838_v61  ;;  %v1864_v59 = vmul.f32 %v1862_v55, %v1853_v49 }
0x1059   :  { %v1881_v60 = vmul.f32 %v2260_v57, %v1871_v32  ;;  %v1866_v42 = vadd.f32 -0.28449672, %v1864_v59 }
0x105b   :  { %v1883_v44 = vsub.f32 1.0, %v1881_v60  ;;  %v1868_v41 = vmul.f32 %v1866_v42, %v1853_v49 }
0x105d   :  { %v1887_v62 = vsub.f32 0.0, %v1883_v44  ;;  %v1870_v43 = vadd.f32 0.2548296, %v1868_v41 }
0x105f   :  { %v1889_v0 = vsel %vm1885_vm0, %v1883_v44, %v1887_v62  ;;  %v1872_v5 = vmul.f32 %v1870_v43, %v1853_v49 }
0x1060   :  { %v1893_v2 = vadd.f32 1.0, %v1889_v0 }
0x1061   :  { %v1882_v10 = vmul.f32 %v2262_v7, %v1872_v5 }
0x1062   :  { %v1895_v8 = vmul.f32 %v1893_v2, %v1891_v1 }
0x1063   :  { %v1884_v12 = vsub.f32 1.0, %v1882_v10 }
0x1064   :  { %2112 = vmatmul.msk.f32.vlgmr.msrb.gmra.mxu0 %vm1118_vm12, %v1895_v8 }
0x1065   :  { %v1888_v15 = vsub.f32 0.0, %v1884_v12 }
0x1067   :  { %v1890_v11 = vsel %vm1886_vm3, %v1884_v12, %v1888_v15 }
0x1068   :  { %v1894_v24 = vadd.f32 1.0, %v1890_v11 }
0x106a   :  { %v1896_v39 = vmul.f32 %v1894_v24, %v1892_v22 }
0x106c   :  { %2113 = vmatmul.msk.f32.gmra.mxu0 %vm1118_vm12, %v1896_v39 }
0x10e1   :  { %v1925_v63 = vpop.f32.mrf.mxu0 }
0x10e2   :  { %v1931_v46 = vadd.f32 %v1925_v63, %v3299_v18 }
0x10e4   :  { %v1938_v25 = vadd.f32 %v2162_v14, %v1931_v46 }
0x10e6   :  { %v1942_v58 = vsel %vm372_vm1, %v1938_v25, 0.0 }
0x10e7   :  { %1943 = vadd.xlane.f32.xlu0 %v1942_v58 }
0x10e9   :  { %v1928_v26 = vpop.f32.mrf.mxu0 }
0x10ea   :  { %v1932_v27 = vadd.f32 %v1928_v26, %v3304_v23 }
0x10ec   :  { %v1939_v19 = vadd.f32 %v2162_v14, %v1932_v27 }
0x10ee   :  { %v1945_v4 = vsel %vm372_vm1, %v1939_v19, 0.0 }
0x10ef   :  { %1946 = vadd.xlane.f32.xlu1 %v1945_v4 }
0x115a   :  { %v1944_v3 = vpop.xlane.xlu0 %1943 }
0x115b   :  { %v1948_v16 = vmul.f32 %v1944_v3, %v2938_v17 }
0x115d   :  { %v1950_v61 = vsub.f32 %v1938_v25, %v1948_v16 }
0x115f   :  { %v1952_v13 = vmul.f32 %v1950_v61, %v1950_v61 }
0x1161   :  { %v1954_v28 = vsel %vm372_vm1, %v1952_v13, 0.0 }
0x1162   :  { %1955 = vadd.xlane.f32.xlu2 %v1954_v28  ;;  %v1947_v18 = vpop.xlane.xlu1 %1946 }
0x1163   :  { %v1949_v29 = vmul.f32 %v1947_v18, %v2938_v17 }
0x1165   :  { %v1951_v30 = vsub.f32 %v1939_v19, %v1949_v29 }
0x1167   :  { %v1953_v31 = vmul.f32 %v1951_v30, %v1951_v30 }
0x1169   :  { %v1957_v20 = vsel %vm372_vm1, %v1953_v31, 0.0 }
0x116a   :  { %1958 = vadd.xlane.f32.xlu0 %v1957_v20 }
0x11d5   :  { %v1956_v23 = vpop.xlane.xlu2 %1955 }
0x11d6   :  { %v1960_v37 = vmul.f32 %v1956_v23, %v2938_v17 }
0x11d8   :  { %v1962_v21 = vadd.f32 1e-05, %v1960_v37 }
0x11da   :  { %2263 = vrsqrt.f32 %v1962_v21  ;;  %vm1970_vm7 = vweird.f32 %v1962_v21 }
0x11dd   :  { %v1959_v38 = vpop.xlane.xlu0 %1958 }
0x11de   :  { %v1961_v40 = vmul.f32 %v1959_v38, %v2938_v17 }
0x11e0   :  { %v2264_v34 = vpop.eup %2263  ;;  %v1963_v36 = vadd.f32 1e-05, %v1961_v40 }
0x11e1   :  { %v1965_v45 = vmul.f32 %v2264_v34, %v1962_v21  ;;  %vm1971_vm12 = vweird.f32 %v2264_v34 }
0x11e2   :  { %2265 = vrsqrt.f32 %v1963_v36  ;;  %vm1972_vm8 = vmor %vm1970_vm7, %vm1971_vm12  ;;  %vm1980_vm10 = vweird.f32 %v1963_v36 }
0x11e3   :  { %v1966_v47 = vmul.f32 %v2264_v34, %v1965_v45 }
0x11e5   :  { %v1967_v48 = vmul.f32 0.5, %v1966_v47 }
0x11e7   :  { %v1968_v35 = vsub.f32 1.5, %v1967_v48 }
0x11e8   :  { %v2266_v6 = vpop.eup %2265 }
0x11e9   :  { %v1969_v49 = vmul.f32 %v2264_v34, %v1968_v35  ;;  %v1975_v51 = vmul.f32 %v2266_v6, %v1963_v36  ;;  %vm1981_vm9 = vweird.f32 %v2266_v6 }
0x11ea   :  { %vm1982_vm11 = vmor %vm1980_vm10, %vm1981_vm9 }
0x11eb   :  { %v1973_v52 = vsel %vm1972_vm8, %v2264_v34, %v1969_v49  ;;  %v1976_v54 = vmul.f32 %v2266_v6, %v1975_v51 }
0x11ec   :  { %v1984_v53 = vmul.f32 %v1973_v52, %v1950_v61 }
0x11ed   :  { %v1977_v17 = vmul.f32 0.5, %v1976_v54 }
0x11ee   :  { %v1989_v33 = vmul.f32 %v2163_v50, %v1984_v53 }
0x11ef   :  { %v1978_v32 = vsub.f32 1.5, %v1977_v17 }
0x11f0   :  { %v1994_v55 = vadd.f32 %v2164_v9, %v1989_v33 }
0x11f1   :  { %v1979_v56 = vmul.f32 %v2266_v6, %v1978_v32 }
0x11f2   :  { %1996 = vst.msk [vmem:[%s3419_s7] sm:$0xff] %vm372_vm1, %v1994_v55 }
0x11f3   :  { %v1983_v57 = vsel %vm1982_vm11, %v2266_v6, %v1979_v56 }
0x11f4   :  { %v1985_v59 = vmul.f32 %v1983_v57, %v1951_v30 }
0x11f6   :  { %v1990_v60 = vmul.f32 %v2163_v50, %v1985_v59 }
0x11f8   :  { %v1995_v42 = vadd.f32 %v2164_v9, %v1990_v60 }
0x11fa   :  { %1997 = vst.msk [vmem:[%s3419_s7 + $0x8] sm:$0xff] %vm372_vm1, %v1995_v42 }
0x11fb   :  { %2002 = vsyncpa [#allocation3], 1 }
0x11fc   :  { %2003 = vsyncpa [#allocation5], 1 }
0x11fd   :  { %2004 = vsyncpa [#allocation8], 1 }
0x11fe   :  { %2005 = vsyncpa [#allocation11], 1 }
0x11ff   :  { %2006 = vsyncpa [#allocation14], 1 }
0x1200   :  { %2007 = vsyncpa [#allocation17], 1 }
0x1201   :  { %2008 = vsyncpa [#allocation20], 1 }
0x1202   :  { %2009 = vsyncpa [#allocation23], 1 }
0x1203   :  { %2010 = vsyncpa [#allocation26], 1 }

// kernel: tecnn_forward.3
= control target key start
LH: loop header
LB: loop body
LE: loop exit
PB: predicated region body
PF: predicated region fallthrough
CT: control target
= control target key end

     0   :  { %s5975_s0 = inlined_call_operand.vmem [shape: f32[440,9], index: 0, kind: input, shape index: {}]   ;;  %s5976_s1 = inlined_call_operand.hbm [shape: f32[9,32], index: 1, kind: input, shape index: {}]   ;;  %s5977_s2 = inlined_call_operand.hbm [shape: f32[1,32], index: 2, kind: input, shape index: {}]   ;;  %s5978_s3 = inlined_call_operand.hbm [shape: f32[18,440], index: 3, kind: input, shape index: {}]   ;;  %s5979_s4 = inlined_call_operand.vmem [shape: f32[9,50,18], index: 4, kind: input, shape index: {}]   ;;  %s5980_s5 = inlined_call_operand.vmem [shape: f32[288,64], index: 5, kind: input, shape index: {}]   ;;  %s5981_s6 = inlined_call_operand.hbm [shape: f32[1,64], index: 6, kind: input, shape index: {}]   ;;  %s5982_s7 = inlined_call_operand.vmem [shape: f32[18,50], index: 7, kind: input, shape index: {}]   ;;  %s5983_s8 = inlined_call_operand.vmem [shape: f32[576,512], index: 8, kind: input, shape index: {}]   ;;  %s5984_s9 = inlined_call_operand.vmem [shape: f32[1,512], index: 9, kind: input, shape index: {}]   ;;  %s5985_s10 = inlined_call_operand.vmem [shape: f32[16,20], index: 10, kind: input, shape index: {}]   ;;  %s5986_s11 = inlined_call_operand.vmem [shape: f32[2,16], index: 11, kind: input, shape index: {}]   ;;  %s5987_s12 = inlined_call_operand.vmem [shape: f32[20,1], index: 12, kind: input, shape index: {}]   ;;  %s5988_s13 = inlined_call_operand.vmem [shape: f32[512,1], index: 13, kind: input, shape index: {}]   ;;  %s5989_s14 = inlined_call_operand.<no memory space> [shape: f32[1,1], index: 14, kind: input, shape index: {}]   ;;  %s5990_s15 = inlined_call_operand.vmem [shape: f32[2,1], index: 15, kind: output, shape index: {}]  }
   0x1   :  { %v20_v0 = vstv %s5989_s14 }
   0x2   :  { %21 = vst [vmem:[#allocation3] sm:$0x1] %v20_v0 }
   0x3   :  { %22 = vsyncpa [#allocation5], 0 }
   0x4   :  { %23 = vsyncpa [#allocation7], 0  ;;  %s45_s22 = sshll.u32 %s5977_s2, 4  ;;  %s46_s22 = int_to_ptr.hbm [resolvable:$true] %s45_s22 }
   0x5   :  { %24 = vsyncpa [#allocation10], 0  ;;  %s3702_s23 = smov [#allocation6]   ;;  %s31_s27 = sshll.u32 %s5976_s1, 4  ;;  %s32_s27 = int_to_ptr.hbm [resolvable:$true] %s31_s27 }
   0x6   :  { %s47_s24 = sshll.u32 %s3702_s23, 4  ;;  %s3703_s28 = smov [#allocation4]   ;;  %s48_s24 = int_to_ptr.vmem [resolvable:$true] %s47_s24 }
   0x7   :  { %50 = dma.hbm_to_vmem [thread:$0]  %s46_s22, 16, %s48_s24, [#allocation7]  }
   0x8   :  { %s33_s14 = sshll.u32 %s3703_s28, 4  ;;  %s3704_s29 = smov 128   ;;  %s34_s14 = int_to_ptr.vmem [resolvable:$true] %s33_s14 }
   0x9   :  { %s3705_s30 = smov 8   ;;  %s55_s2 = sshll.u32 %s5978_s3, 4  ;;  %s56_s2 = int_to_ptr.hbm [resolvable:$true] %s55_s2 }
   0xa   :  { %39 = dma.hbm_to_vmem [thread:$0]  %s32_s27, 256, %s34_s14, [#allocation5], %s3704_s29, %s3704_s29, %s3705_s30  }
   0xb   :  { %s3706_s18 = smov [#allocation8]   ;;  %s73_s1 = sshll.u32 %s5981_s6, 4  ;;  %s74_s1 = int_to_ptr.hbm [resolvable:$true] %s73_s1 }
   0xc   :  { %s57_s19 = sshll.u32 %s3706_s18, 4  ;;  %s3707_s22 = smov 512   ;;  %s58_s19 = int_to_ptr.vmem [resolvable:$true] %s57_s19 }
   0xd   :  { %s3708_s23 = smov 32   ;;  %s3709_s24 = smov [#allocation9]  }
   0xe   :  { %63 = dma.hbm_to_vmem [thread:$0]  %s56_s2, 1536, %s58_s19, [#allocation7], %s3707_s22, %s3707_s22, %s3708_s23  }
   0xf   :  { %s75_s25 = sshll.u32 %s3709_s24, 4  ;;  %s76_s25 = int_to_ptr.vmem [resolvable:$true] %s75_s25 }
  0x10   :  { %78 = dma.hbm_to_vmem [thread:$0]  %s74_s1, 16, %s76_s25, [#allocation10]  }
  0x11   :  { %3696 = dma.done.wait [#allocation5], 256  }
  0x12   :  { %3697 = vsyncadd [#allocation5], 4294967040 }
  0x13   :  { %3698 = dma.done.wait [#allocation7], 1552  }
  0x14   :  { %3699 = vsyncadd [#allocation7], 4294965744 }
  0x15   :  { %3700 = dma.done.wait [#allocation10], 16  }
  0x16   :  { %3701 = vsyncadd [#allocation10], 4294967280  ;;  %vm338_vm0 = vcmask 1040384   ;;  %v167_v1 = vld [vmem:[#allocation4 + $0x8] sm:$0x1]  ;;  %v166_v2 = vld [vmem:[#allocation4] sm:$0xff] }
  0x17   :  { %3296 = vmatpush.msk.msra.mxu0 %vm338_vm0, %v167_v1  ;;  %v111_v3 = vld [vmem:[%s5975_s0] sm:$0xff]  ;;  %vm172_vm1 = vcmask 72704   ;;  %v112_v4 = vld [vmem:[%s5975_s0 + $0x8] sm:$0xff]  ;;  %v113_v5 = vld [vmem:[%s5975_s0 + $0x10] sm:$0xff]  ;;  %vm591_vm2 = vcmask 457728   ;;  %vm734_vm3 = vcmask 1041408  }
  0x18   :  { %v114_v6 = vld [vmem:[%s5975_s0 + $0x18] sm:$0xff]  ;;  %v115_v7 = vld [vmem:[%s5975_s0 + $0x20] sm:$0xff]  ;;  %v116_v8 = vld [vmem:[%s5975_s0 + $0x28] sm:$0xff]  ;;  %vm712_vm4 = vcmask 146432   ;;  %vm851_vm5 = vcmask 261120   ;;  %vm1950_vm6 = vcmask 408576  }
  0x19   :  { %357 = vmatpush.msra.mxu0 %v166_v2  ;;  %v117_v9 = vld [vmem:[%s5975_s0 + $0x30] sm:$0xff]  ;;  %v118_v10 = vld [vmem:[%s5975_s0 + $0x38] sm:$0xff]  ;;  %v119_v11 = vld [vmem:[%s5975_s0 + $0x40] sm:$0xff]  ;;  %vm1989_vm7 = vcmask 523264   ;;  %vm1992_vm8 = vcmask 517120   ;;  %vm3083_vm9 = vcmask 130048  }
  0x1a   :  { %3297 = vmatmul.msk.f32.vlgmr.msra.gmra.mxu0 %vm172_vm1, %v111_v3  ;;  %v120_v12 = vld [vmem:[%s5975_s0 + $0x48] sm:$0xff]  ;;  %v121_v13 = vld [vmem:[%s5975_s0 + $0x50] sm:$0xff]  ;;  %v122_v14 = vld [vmem:[%s5975_s0 + $0x58] sm:$0xff]  ;;  %vm3258_vm10 = vcmask 1043456   ;;  %vm3254_vm11 = vcmask 162816   ;;  %vm3287_vm12 = vcmask 1024  }
  0x1b   :  { %v123_v15 = vld [vmem:[%s5975_s0 + $0x60] sm:$0xff]  ;;  %v124_v16 = vld [vmem:[%s5975_s0 + $0x68] sm:$0xff]  ;;  %v125_v17 = vld [vmem:[%s5975_s0 + $0x70] sm:$0xff] }
  0x1c   :  { %v126_v18 = vld [vmem:[%s5975_s0 + $0x78] sm:$0xff]  ;;  %v127_v20 = vld [vmem:[%s5975_s0 + $0x80] sm:$0xff]  ;;  %v128_v22 = vld [vmem:[%s5975_s0 + $0x88] sm:$0xff] }
  0x1d   :  { %v129_v24 = vld [vmem:[%s5975_s0 + $0x90] sm:$0xff]  ;;  %v130_v26 = vld [vmem:[%s5975_s0 + $0x98] sm:$0xff]  ;;  %v131_v28 = vld [vmem:[%s5975_s0 + $0xa0] sm:$0xff] }
  0x1e   :  { %v132_v30 = vld [vmem:[%s5975_s0 + $0xa8] sm:$0xff]  ;;  %v133_v32 = vld [vmem:[%s5975_s0 + $0xb0] sm:$0xff]  ;;  %v134_v34 = vld [vmem:[%s5975_s0 + $0xb8] sm:$0xff] }
  0x1f   :  { %v135_v36 = vld [vmem:[%s5975_s0 + $0xc0] sm:$0xff]  ;;  %v136_v38 = vld [vmem:[%s5975_s0 + $0xc8] sm:$0xff]  ;;  %v137_v40 = vld [vmem:[%s5975_s0 + $0xd0] sm:$0xff] }
  0x20   :  { %v138_v42 = vld [vmem:[%s5975_s0 + $0xd8] sm:$0xff]  ;;  %v139_v44 = vld [vmem:[%s5975_s0 + $0xe0] sm:$0xff]  ;;  %v140_v46 = vld [vmem:[%s5975_s0 + $0xe8] sm:$0xff] }
  0x21   :  { %v141_v48 = vld [vmem:[%s5975_s0 + $0xf0] sm:$0xff]  ;;  %v3941_v49 = vld [vmem:[#allocation6] ss:$0 sm:$0xff]  ;;  %v142_v51 = vld [vmem:[%s5975_s0 + $0xf8] sm:$0xff] }
  0x22   :  { %3298 = vmatmul.msk.f32.gmra.mxu0 %vm172_vm1, %v112_v4  ;;  %v143_v61 = vld [vmem:[%s5975_s0 + $0x100] sm:$0xff] }
  0x2a   :  { %3299 = vmatmul.msk.f32.gmra.mxu0 %vm172_vm1, %v113_v5 }
  0x32   :  { %3300 = vmatmul.msk.f32.gmra.mxu0 %vm172_vm1, %v114_v6 }
  0x3a   :  { %3301 = vmatmul.msk.f32.gmra.mxu0 %vm172_vm1, %v115_v7  ;;  %v144_v7 = vld [vmem:[%s5975_s0 + $0x108] sm:$0xff] }
  0x42   :  { %3302 = vmatmul.msk.f32.gmra.mxu0 %vm172_vm1, %v116_v8 }
  0x4a   :  { %3303 = vmatmul.msk.f32.gmra.mxu0 %vm172_vm1, %v117_v9 }
  0x52   :  { %3304 = vmatmul.msk.f32.gmra.mxu0 %vm172_vm1, %v118_v10 }
  0x5a   :  { %3305 = vmatmul.msk.f32.gmra.mxu0 %vm172_vm1, %v119_v11 }
  0x62   :  { %3306 = vmatmul.msk.f32.gmra.mxu0 %vm172_vm1, %v120_v12 }
  0x6a   :  { %3307 = vmatmul.msk.f32.gmra.mxu0 %vm172_vm1, %v121_v13 }
  0x72   :  { %3308 = vmatmul.msk.f32.gmra.mxu0 %vm172_vm1, %v122_v14 }
  0x7a   :  { %3309 = vmatmul.msk.f32.gmra.mxu0 %vm172_vm1, %v123_v15 }
  0x82   :  { %3310 = vmatmul.msk.f32.gmra.mxu0 %vm172_vm1, %v124_v16 }
  0x8a   :  { %3311 = vmatmul.msk.f32.gmra.mxu0 %vm172_vm1, %v125_v17  ;;  %v145_v17 = vld [vmem:[%s5975_s0 + $0x110] sm:$0xff] }
  0x92   :  { %3312 = vmatmul.msk.f32.gmra.mxu0 %vm172_vm1, %v126_v18 }
  0x97   :  { %v3869_v19 = vpop.f32.mrf.mxu0 }
  0x9a   :  { %3313 = vmatmul.msk.f32.gmra.mxu0 %vm172_vm1, %v127_v20 }
  0x9f   :  { %v3875_v21 = vpop.f32.mrf.mxu0 }
  0xa2   :  { %3314 = vmatmul.msk.f32.gmra.mxu0 %vm172_vm1, %v128_v22  ;;  %v363_v22 = vadd.f32 %v3941_v49, %v3875_v21 }
  0xa7   :  { %v3881_v23 = vpop.f32.mrf.mxu0 }
  0xa8   :  { %v366_v18 = vadd.f32 %v3941_v49, %v3881_v23  ;;  %v146_v23 = vld [vmem:[%s5975_s0 + $0x118] sm:$0xff] }
  0xaa   :  { %3315 = vmatmul.msk.f32.gmra.mxu0 %vm172_vm1, %v129_v24 }
  0xaf   :  { %v3887_v25 = vpop.f32.mrf.mxu0 }
  0xb0   :  { %v369_v14 = vadd.f32 %v3941_v49, %v3887_v25  ;;  %v360_v25 = vadd.f32 %v3941_v49, %v3869_v19  ;;  %v147_v19 = vld [vmem:[%s5975_s0 + $0x120] sm:$0xff] }
  0xb2   :  { %3316 = vmatmul.msk.f32.gmra.mxu0 %vm172_vm1, %v130_v26  ;;  %v527_v24 = vmax.f32 %v369_v14, 0.0  ;;  %v526_v26 = vmax.f32 %v366_v18, 0.0 }
  0xb7   :  { %v3893_v27 = vpop.f32.mrf.mxu0 }
  0xb8   :  { %v372_v12 = vadd.f32 %v3941_v49, %v3893_v27  ;;  %v525_v27 = vmax.f32 %v363_v22, 0.0 }
  0xba   :  { %3317 = vmatmul.msk.f32.gmra.mxu0 %vm172_vm1, %v131_v28  ;;  %v528_v20 = vmax.f32 %v372_v12, 0.0 }
  0xbf   :  { %v3899_v29 = vpop.f32.mrf.mxu0 }
  0xc0   :  { %v375_v10 = vadd.f32 %v3941_v49, %v3899_v29  ;;  %v524_v29 = vmax.f32 %v360_v25, 0.0 }
  0xc2   :  { %3318 = vmatmul.msk.f32.gmra.mxu0 %vm172_vm1, %v132_v30  ;;  %v529_v15 = vmax.f32 %v375_v10, 0.0  ;;  %v160_v10 = vld [vmem:[%s5975_s0 + $0x188] sm:$0xff] }
  0xc7   :  { %v377_v31 = vpop.f32.mrf.mxu0 }
  0xc8   :  { %v378_v8 = vadd.f32 %v3941_v49, %v377_v31  ;;  %v148_v31 = vld [vmem:[%s5975_s0 + $0x128] sm:$0xff] }
  0xca   :  { %3319 = vmatmul.msk.f32.gmra.mxu0 %vm172_vm1, %v133_v32  ;;  %v530_v13 = vmax.f32 %v378_v8, 0.0 }
  0xcf   :  { %v380_v33 = vpop.f32.mrf.mxu0 }
  0xd0   :  { %v381_v4 = vadd.f32 %v3941_v49, %v380_v33  ;;  %v149_v33 = vld [vmem:[%s5975_s0 + $0x130] sm:$0xff] }
  0xd2   :  { %3320 = vmatmul.msk.f32.gmra.mxu0 %vm172_vm1, %v134_v34  ;;  %v531_v11 = vmax.f32 %v381_v4, 0.0 }
  0xd7   :  { %v383_v35 = vpop.f32.mrf.mxu0 }
  0xd8   :  { %v384_v2 = vadd.f32 %v3941_v49, %v383_v35  ;;  %v150_v35 = vld [vmem:[%s5975_s0 + $0x138] sm:$0xff] }
  0xda   :  { %3321 = vmatmul.msk.f32.gmra.mxu0 %vm172_vm1, %v135_v36  ;;  %v532_v9 = vmax.f32 %v384_v2, 0.0 }
  0xdf   :  { %v386_v37 = vpop.f32.mrf.mxu0 }
  0xe0   :  { %v387_v0 = vadd.f32 %v3941_v49, %v386_v37  ;;  %v151_v37 = vld [vmem:[%s5975_s0 + $0x140] sm:$0xff] }
  0xe2   :  { %3322 = vmatmul.msk.f32.gmra.mxu0 %vm172_vm1, %v136_v38  ;;  %v533_v5 = vmax.f32 %v387_v0, 0.0 }
  0xe7   :  { %v389_v39 = vpop.f32.mrf.mxu0 }
  0xe8   :  { %v390_v62 = vadd.f32 %v3941_v49, %v389_v39  ;;  %v152_v39 = vld [vmem:[%s5975_s0 + $0x148] sm:$0xff] }
  0xea   :  { %3323 = vmatmul.msk.f32.gmra.mxu0 %vm172_vm1, %v137_v40  ;;  %v534_v3 = vmax.f32 %v390_v62, 0.0 }
  0xef   :  { %v392_v41 = vpop.f32.mrf.mxu0 }
  0xf0   :  { %v393_v58 = vadd.f32 %v3941_v49, %v392_v41  ;;  %v153_v41 = vld [vmem:[%s5975_s0 + $0x150] sm:$0xff] }
  0xf2   :  { %3324 = vmatmul.msk.f32.gmra.mxu0 %vm172_vm1, %v138_v42  ;;  %v535_v1 = vmax.f32 %v393_v58, 0.0 }
  0xf7   :  { %v395_v43 = vpop.f32.mrf.mxu0 }
  0xf8   :  { %v396_v56 = vadd.f32 %v3941_v49, %v395_v43  ;;  %v154_v43 = vld [vmem:[%s5975_s0 + $0x158] sm:$0xff] }
  0xfa   :  { %3325 = vmatmul.msk.f32.gmra.mxu0 %vm172_vm1, %v139_v44  ;;  %v536_v63 = vmax.f32 %v396_v56, 0.0 }
  0xff   :  { %v398_v45 = vpop.f32.mrf.mxu0 }
 0x100   :  { %v399_v54 = vadd.f32 %v3941_v49, %v398_v45  ;;  %v155_v45 = vld [vmem:[%s5975_s0 + $0x160] sm:$0xff] }
 0x102   :  { %3326 = vmatmul.msk.f32.gmra.mxu0 %vm172_vm1, %v140_v46  ;;  %v537_v59 = vmax.f32 %v399_v54, 0.0 }
 0x107   :  { %v401_v47 = vpop.f32.mrf.mxu0 }
 0x108   :  { %v402_v52 = vadd.f32 %v3941_v49, %v401_v47  ;;  %v156_v47 = vld [vmem:[%s5975_s0 + $0x168] sm:$0xff] }
 0x10a   :  { %3327 = vmatmul.msk.f32.gmra.mxu0 %vm172_vm1, %v141_v48  ;;  %v538_v57 = vmax.f32 %v402_v52, 0.0  ;;  %v158_v52 = vld [vmem:[%s5975_s0 + $0x178] sm:$0xff] }
 0x10f   :  { %v404_v50 = vpop.f32.mrf.mxu0 }
 0x110   :  { %v405_v53 = vadd.f32 %v3941_v49, %v404_v50  ;;  %v157_v50 = vld [vmem:[%s5975_s0 + $0x170] sm:$0xff] }
 0x112   :  { %3328 = vmatmul.msk.f32.gmra.mxu0 %vm172_vm1, %v142_v51  ;;  %v539_v55 = vmax.f32 %v405_v53, 0.0 }
 0x114   :  { %601 = vmatpush.msra.mxu1 %v539_v55 }
 0x116   :  { %602 = vmatpush.msra.mxu1 %v538_v57 }
 0x117   :  { %v3952_v60 = vpop.f32.mrf.mxu0 }
 0x118   :  { %603 = vmatpush.msra.mxu1 %v537_v59 }
 0x11a   :  { %3329 = vmatmul.msk.f32.gmra.mxu0 %vm172_vm1, %v143_v61  ;;  %604 = vmatpush.msra.mxu1 %v536_v63  ;;  %v159_v63 = vld [vmem:[%s5975_s0 + $0x180] sm:$0xff] }
 0x11c   :  { %605 = vmatpush.msra.mxu1 %v535_v1 }
 0x11e   :  { %606 = vmatpush.msra.mxu1 %v534_v3 }
 0x11f   :  { %v3962_v6 = vpop.f32.mrf.mxu0 }
 0x120   :  { %607 = vmatpush.msra.mxu1 %v533_v5 }
 0x122   :  { %3330 = vmatmul.msk.f32.gmra.mxu0 %vm172_vm1, %v144_v7  ;;  %608 = vmatpush.msra.mxu1 %v532_v9 }
 0x124   :  { %609 = vmatpush.msra.mxu1 %v531_v11 }
 0x126   :  { %610 = vmatpush.msra.mxu1 %v530_v13 }
 0x127   :  { %v3975_v16 = vpop.f32.mrf.mxu0 }
 0x128   :  { %611 = vmatpush.msra.mxu1 %v529_v15  ;;  %v414_v25 = vadd.f32 %v3941_v49, %v3975_v16  ;;  %v162_v16 = vld [vmem:[%s5975_s0 + $0x198] sm:$0xff] }
 0x12a   :  { %3331 = vmatmul.msk.f32.gmra.mxu0 %vm172_vm1, %v145_v17  ;;  %612 = vmatpush.msra.mxu1 %v528_v20 }
 0x12c   :  { %613 = vmatpush.msra.mxu1 %v527_v24  ;;  %v161_v24 = vld [vmem:[%s5975_s0 + $0x190] sm:$0xff] }
 0x12e   :  { %614 = vmatpush.msra.mxu1 %v526_v26 }
 0x12f   :  { %v3987_v28 = vpop.f32.mrf.mxu0 }
 0x130   :  { %615 = vmatpush.msra.mxu1 %v525_v27  ;;  %v417_v18 = vadd.f32 %v3941_v49, %v3987_v28  ;;  %v411_v27 = vadd.f32 %v3941_v49, %v3962_v6 }
 0x132   :  { %3332 = vmatmul.msk.f32.gmra.mxu0 %vm172_vm1, %v146_v23  ;;  %616 = vmatpush.msra.mxu1 %v524_v29  ;;  %v543_v28 = vmax.f32 %v417_v18, 0.0  ;;  %v408_v23 = vadd.f32 %v3941_v49, %v3952_v60  ;;  %v542_v29 = vmax.f32 %v414_v25, 0.0  ;;  %v163_v60 = vld [vmem:[%s5975_s0 + $0x1a0] sm:$0xff]  ;;  %v583_v18 = vld [vmem:[#allocation8 + $0x20] sm:$0xff]  ;;  %v588_v25 = vld [vmem:[#allocation8 + $0x48] sm:$0x3] }
 0x137   :  { %v3993_v21 = vpop.f32.mrf.mxu0 }
 0x138   :  { %v420_v15 = vadd.f32 %v3941_v49, %v3993_v21  ;;  %v541_v21 = vmax.f32 %v411_v27, 0.0 }
 0x13a   :  { %3333 = vmatmul.msk.f32.gmra.mxu0 %vm172_vm1, %v147_v19  ;;  %v544_v26 = vmax.f32 %v420_v15, 0.0 }
 0x13f   :  { %v3999_v30 = vpop.f32.mrf.mxu0 }
 0x140   :  { %v423_v13 = vadd.f32 %v3941_v49, %v3999_v30  ;;  %v540_v30 = vmax.f32 %v408_v23, 0.0 }
 0x142   :  { %3334 = vmatmul.msk.f32.gmra.mxu0 %vm172_vm1, %v148_v31  ;;  %v545_v20 = vmax.f32 %v423_v13, 0.0 }
 0x147   :  { %v425_v32 = vpop.f32.mrf.mxu0 }
 0x148   :  { %v426_v11 = vadd.f32 %v3941_v49, %v425_v32  ;;  %v164_v32 = vld [vmem:[%s5975_s0 + $0x1a8] sm:$0xff] }
 0x14a   :  { %3335 = vmatmul.msk.f32.gmra.mxu0 %vm172_vm1, %v149_v33  ;;  %v546_v17 = vmax.f32 %v426_v11, 0.0 }
 0x14f   :  { %v428_v34 = vpop.f32.mrf.mxu0 }
 0x150   :  { %v429_v7 = vadd.f32 %v3941_v49, %v428_v34  ;;  %v165_v34 = vld [vmem:[%s5975_s0 + $0x1b0] sm:$0xff] }
 0x152   :  { %3336 = vmatmul.msk.f32.gmra.mxu0 %vm172_vm1, %v150_v35  ;;  %v547_v14 = vmax.f32 %v429_v7, 0.0 }
 0x157   :  { %v431_v36 = vpop.f32.mrf.mxu0 }
 0x158   :  { %v432_v4 = vadd.f32 %v3941_v49, %v431_v36 }
 0x15a   :  { %3337 = vmatmul.msk.f32.gmra.mxu0 %vm172_vm1, %v151_v37  ;;  %v548_v12 = vmax.f32 %v432_v4, 0.0  ;;  %v579_v4 = vld [vmem:[#allocation8] sm:$0xff] }
 0x15b   :  { %617 = vmatmul.f32.vlgmr.msra.gmra.mxu1 %v579_v4 }
 0x15f   :  { %v434_v38 = vpop.f32.mrf.mxu0 }
 0x160   :  { %v435_v2 = vadd.f32 %v3941_v49, %v434_v38 }
 0x162   :  { %3338 = vmatmul.msk.f32.gmra.mxu0 %vm172_vm1, %v152_v39  ;;  %v549_v8 = vmax.f32 %v435_v2, 0.0 }
 0x163   :  { %620 = vmatmul.f32.gmra.mxu1 %v583_v18  ;;  %v1177_v18 = vld [vmem:[%s5980_s5 + $0x78] sm:$0xff] }
 0x167   :  { %v437_v40 = vpop.f32.mrf.mxu0 }
 0x168   :  { %v438_v0 = vadd.f32 %v3941_v49, %v437_v40 }
 0x16a   :  { %3339 = vmatmul.msk.f32.gmra.mxu0 %vm172_vm1, %v153_v41  ;;  %v550_v5 = vmax.f32 %v438_v0, 0.0 }
 0x16f   :  { %v440_v42 = vpop.f32.mrf.mxu0 }
 0x170   :  { %v441_v59 = vadd.f32 %v3941_v49, %v440_v42 }
 0x172   :  { %3340 = vmatmul.msk.f32.gmra.mxu0 %vm172_vm1, %v154_v43  ;;  %v551_v3 = vmax.f32 %v441_v59, 0.0 }
 0x177   :  { %v443_v44 = vpop.f32.mrf.mxu0 }
 0x178   :  { %v444_v57 = vadd.f32 %v3941_v49, %v443_v44 }
 0x17a   :  { %3341 = vmatmul.msk.f32.gmra.mxu0 %vm172_vm1, %v155_v45  ;;  %v552_v1 = vmax.f32 %v444_v57, 0.0 }
 0x17f   :  { %v446_v46 = vpop.f32.mrf.mxu0 }
 0x180   :  { %v447_v55 = vadd.f32 %v3941_v49, %v446_v46 }
 0x182   :  { %3342 = vmatmul.msk.f32.gmra.mxu0 %vm172_vm1, %v156_v47  ;;  %v553_v61 = vmax.f32 %v447_v55, 0.0 }
 0x187   :  { %v449_v48 = vpop.f32.mrf.mxu0 }
 0x188   :  { %v450_v53 = vadd.f32 %v3941_v49, %v449_v48 }
 0x18a   :  { %3343 = vmatmul.msk.f32.gmra.mxu0 %vm172_vm1, %v157_v50  ;;  %v554_v58 = vmax.f32 %v450_v53, 0.0 }
 0x18f   :  { %v452_v51 = vpop.f32.mrf.mxu0 }
 0x190   :  { %v453_v54 = vadd.f32 %v3941_v49, %v452_v51 }
 0x192   :  { %3344 = vmatmul.msk.f32.gmra.mxu0 %vm172_vm1, %v158_v52  ;;  %v555_v56 = vmax.f32 %v453_v54, 0.0 }
 0x194   :  { %627 = vmatpush.msra.mxu2 %v555_v56 }
 0x196   :  { %628 = vmatpush.msra.mxu2 %v554_v58  ;;  %v580_v58 = vld [vmem:[#allocation8 + $0x8] sm:$0xff] }
 0x197   :  { %v4050_v62 = vpop.f32.mrf.mxu0 }
 0x198   :  { %629 = vmatpush.msra.mxu2 %v553_v61 }
 0x19a   :  { %3345 = vmatmul.msk.f32.gmra.mxu0 %vm172_vm1, %v159_v63  ;;  %630 = vmatpush.msra.mxu2 %v552_v1 }
 0x19c   :  { %631 = vmatpush.msra.mxu2 %v551_v3 }
 0x19e   :  { %632 = vmatpush.msra.mxu2 %v550_v5 }
 0x19f   :  { %v4060_v9 = vpop.f32.mrf.mxu0 }
 0x1a0   :  { %633 = vmatpush.msra.mxu2 %v549_v8  ;;  %v584_v8 = vld [vmem:[#allocation8 + $0x28] sm:$0xff] }
 0x1a2   :  { %3346 = vmatmul.msk.f32.gmra.mxu0 %vm172_vm1, %v160_v10  ;;  %634 = vmatpush.msra.mxu2 %v548_v12 }
 0x1a4   :  { %635 = vmatpush.msra.mxu2 %v547_v14 }
 0x1a6   :  { %636 = vmatpush.msra.mxu2 %v546_v17 }
 0x1a7   :  { %v4073_v22 = vpop.f32.mrf.mxu0 }
 0x1a8   :  { %637 = vmatpush.msra.mxu2 %v545_v20  ;;  %v462_v15 = vadd.f32 %v3941_v49, %v4073_v22  ;;  %v459_v20 = vadd.f32 %v3941_v49, %v4060_v9 }
 0x1aa   :  { %3347 = vmatmul.msk.f32.gmra.mxu0 %vm172_vm1, %v161_v24  ;;  %638 = vmatpush.msra.mxu2 %v544_v26  ;;  %v456_v26 = vadd.f32 %v3941_v49, %v4050_v62  ;;  %v558_v27 = vmax.f32 %v462_v15, 0.0  ;;  %v3365_v15 = vld [vmem:[%s5979_s4 + $0x48] sm:$0xff] }
 0x1ac   :  { %639 = vmatpush.msra.mxu2 %v543_v28  ;;  %v557_v28 = vmax.f32 %v459_v20, 0.0  ;;  %v556_v22 = vmax.f32 %v456_v26, 0.0  ;;  %v1176_v20 = vld [vmem:[%s5980_s5 + $0x70] sm:$0xff]  ;;  %v708_v26 = vld [vmem:[%s5979_s4 + $0x18] sm:$0xff] }
 0x1ae   :  { %640 = vmatpush.msra.mxu2 %v542_v29  ;;  %v581_v29 = vld [vmem:[#allocation8 + $0x10] sm:$0xff] }
 0x1af   :  { %v4085_v19 = vpop.f32.mrf.mxu0 }
 0x1b0   :  { %641 = vmatpush.msra.mxu2 %v541_v21  ;;  %v465_v12 = vadd.f32 %v3941_v49, %v4085_v19  ;;  %v587_v21 = vld [vmem:[#allocation8 + $0x40] sm:$0x3]  ;;  %v585_v19 = vld [vmem:[#allocation8 + $0x30] sm:$0xff] }
 0x1b1   :  { %623 = vmatmul.f32.gmra.mxu1 %v587_v21  ;;  %v3369_v21 = vld [vmem:[%s5979_s4 + $0x68] sm:$0x3] }
 0x1b2   :  { %3348 = vmatmul.msk.f32.gmra.mxu0 %vm172_vm1, %v162_v16  ;;  %642 = vmatpush.msra.mxu2 %v540_v30  ;;  %v559_v24 = vmax.f32 %v465_v12, 0.0  ;;  %v589_v30 = vld [vmem:[#allocation8 + $0x50] sm:$0x3]  ;;  %v776_v12 = vld [vmem:[%s5980_s5] sm:$0xff] }
 0x1b3   :  { %643 = vmatmul.f32.vlgmr.msra.gmra.mxu2 %v580_v58 }
 0x1b7   :  { %v467_v6 = vpop.f32.mrf.mxu0 }
 0x1b8   :  { %v468_v10 = vadd.f32 %v3941_v49, %v467_v6 }
 0x1ba   :  { %3349 = vmatmul.msk.f32.gmra.mxu0 %vm172_vm1, %v163_v60  ;;  %v560_v17 = vmax.f32 %v468_v10, 0.0  ;;  %v778_v10 = vld [vmem:[%s5980_s5 + $0x10] sm:$0xff] }
 0x1bb   :  { %646 = vmatmul.f32.gmra.mxu2 %v584_v8  ;;  %v779_v8 = vld [vmem:[%s5980_s5 + $0x18] sm:$0xff] }
 0x1bf   :  { %v470_v31 = vpop.f32.mrf.mxu0 }
 0x1c0   :  { %v471_v5 = vadd.f32 %v3941_v49, %v470_v31 }
 0x1c2   :  { %3350 = vmatmul.msk.f32.gmra.mxu0 %vm172_vm1, %v164_v32  ;;  %v561_v13 = vmax.f32 %v471_v5, 0.0  ;;  %v705_v5 = vld [vmem:[%s5979_s4] sm:$0xff] }
 0x1c3   :  { %649 = vmatmul.f32.gmra.mxu2 %v588_v25  ;;  %v3366_v25 = vld [vmem:[%s5979_s4 + $0x50] sm:$0xff] }
 0x1c7   :  { %v473_v33 = vpop.f32.mrf.mxu0 }
 0x1c8   :  { %v474_v2 = vadd.f32 %v3941_v49, %v473_v33 }
 0x1ca   :  { %3351 = vmatmul.msk.f32.gmra.mxu0 %vm172_vm1, %v165_v34  ;;  %v562_v11 = vmax.f32 %v474_v2, 0.0 }
 0x1cf   :  { %v476_v35 = vpop.f32.mrf.mxu0 }
 0x1d0   :  { %v477_v63 = vadd.f32 %v3941_v49, %v476_v35 }
 0x1d2   :  { %v563_v7 = vmax.f32 %v477_v63, 0.0 }
 0x1d7   :  { %v479_v36 = vpop.f32.mrf.mxu0 }
 0x1d8   :  { %v480_v59 = vadd.f32 %v3941_v49, %v479_v36 }
 0x1da   :  { %v564_v3 = vmax.f32 %v480_v59, 0.0 }
 0x1df   :  { %v482_v37 = vpop.f32.mrf.mxu0 }
 0x1e0   :  { %v483_v56 = vadd.f32 %v3941_v49, %v482_v37 }
 0x1e2   :  { %v565_v0 = vmax.f32 %v483_v56, 0.0 }
 0x1e7   :  { %v485_v38 = vpop.f32.mrf.mxu0 }
 0x1e8   :  { %v486_v54 = vadd.f32 %v3941_v49, %v485_v38 }
 0x1ea   :  { %v566_v61 = vmax.f32 %v486_v54, 0.0 }
 0x1ef   :  { %v488_v39 = vpop.f32.mrf.mxu0 }
 0x1f0   :  { %v489_v51 = vadd.f32 %v3941_v49, %v488_v39 }
 0x1f2   :  { %v567_v57 = vmax.f32 %v489_v51, 0.0 }
 0x1f7   :  { %v491_v40 = vpop.f32.mrf.mxu0 }
 0x1f8   :  { %v492_v48 = vadd.f32 %v3941_v49, %v491_v40 }
 0x1fa   :  { %v568_v55 = vmax.f32 %v492_v48, 0.0 }
 0x1ff   :  { %v494_v41 = vpop.f32.mrf.mxu0 }
 0x200   :  { %v495_v46 = vadd.f32 %v3941_v49, %v494_v41 }
 0x202   :  { %v569_v52 = vmax.f32 %v495_v46, 0.0  ;;  %v618_v46 = vpop.f32.mrf.mxu1 }
 0x207   :  { %v497_v42 = vpop.f32.mrf.mxu0 }
 0x208   :  { %v498_v44 = vadd.f32 %v3941_v49, %v497_v42 }
 0x20a   :  { %v570_v50 = vmax.f32 %v498_v44, 0.0  ;;  %v586_v44 = vld [vmem:[#allocation8 + $0x38] sm:$0xff] }
 0x20f   :  { %v500_v43 = vpop.f32.mrf.mxu0 }
 0x210   :  { %v501_v45 = vadd.f32 %v3941_v49, %v500_v43  ;;  %v582_v43 = vld [vmem:[#allocation8 + $0x18] sm:$0xff] }
 0x212   :  { %v571_v47 = vmax.f32 %v501_v45, 0.0  ;;  %v590_v45 = vld [vmem:[#allocation8 + $0x58] sm:$0x3] }
 0x214   :  { %653 = vmatpush.msra.mxu3 %v571_v47  ;;  %v621_v47 = vpop.f32.mrf.mxu1 }
 0x216   :  { %654 = vmatpush.msra.mxu3 %v570_v50 }
 0x217   :  { %v4108_v53 = vpop.f32.mrf.mxu0 }
 0x218   :  { %655 = vmatpush.msra.mxu3 %v569_v52  ;;  %v504_v39 = vadd.f32 %v3941_v49, %v4108_v53 }
 0x21a   :  { %656 = vmatpush.msra.mxu3 %v568_v55  ;;  %v572_v42 = vmax.f32 %v504_v39, 0.0  ;;  %v3398_v39 = vld [vmem:[%s5979_s4 + $0xa0] sm:$0x3] }
 0x21c   :  { %657 = vmatpush.msra.mxu3 %v567_v57 }
 0x21e   :  { %658 = vmatpush.msra.mxu3 %v566_v61 }
 0x21f   :  { %v506_v1 = vpop.f32.mrf.mxu0 }
 0x220   :  { %659 = vmatpush.msra.mxu3 %v565_v0  ;;  %v507_v37 = vadd.f32 %v3941_v49, %v506_v1 }
 0x222   :  { %660 = vmatpush.msra.mxu3 %v564_v3  ;;  %v573_v41 = vmax.f32 %v507_v37, 0.0  ;;  %v3397_v37 = vld [vmem:[%s5979_s4 + $0x98] sm:$0xff] }
 0x224   :  { %661 = vmatpush.msra.mxu3 %v563_v7  ;;  %v3363_v7 = vld [vmem:[%s5979_s4 + $0x38] sm:$0xff] }
 0x226   :  { %662 = vmatpush.msra.mxu3 %v562_v11  ;;  %v777_v11 = vld [vmem:[%s5980_s5 + $0x8] sm:$0xff] }
 0x227   :  { %v509_v14 = vpop.f32.mrf.mxu0 }
 0x228   :  { %663 = vmatpush.msra.mxu3 %v561_v13  ;;  %v510_v35 = vadd.f32 %v3941_v49, %v509_v14  ;;  %v3364_v13 = vld [vmem:[%s5979_s4 + $0x40] sm:$0xff]  ;;  %v706_v14 = vld [vmem:[%s5979_s4 + $0x8] sm:$0xff] }
 0x22a   :  { %664 = vmatpush.msra.mxu3 %v560_v17  ;;  %v574_v40 = vmax.f32 %v510_v35, 0.0  ;;  %v707_v17 = vld [vmem:[%s5979_s4 + $0x10] sm:$0xff]  ;;  %v1038_v35 = vld [vmem:[%s5980_s5 + $0x48] sm:$0xff] }
 0x22c   :  { %665 = vmatpush.msra.mxu3 %v559_v24  ;;  %v1175_v24 = vld [vmem:[%s5980_s5 + $0x68] sm:$0xff] }
 0x22e   :  { %666 = vmatpush.msra.mxu3 %v558_v27  ;;  %v624_v50 = vpop.f32.mrf.mxu1  ;;  %v1174_v27 = vld [vmem:[%s5980_s5 + $0x60] sm:$0xff] }
 0x22f   :  { %v512_v23 = vpop.f32.mrf.mxu0 }
 0x230   :  { %667 = vmatpush.msra.mxu3 %v557_v28  ;;  %v513_v33 = vadd.f32 %v3941_v49, %v512_v23  ;;  %v3367_v28 = vld [vmem:[%s5979_s4 + $0x58] sm:$0xff]  ;;  %v709_v23 = vld [vmem:[%s5979_s4 + $0x20] sm:$0xff] }
 0x232   :  { %668 = vmatpush.msra.mxu3 %v556_v22  ;;  %v575_v38 = vmax.f32 %v513_v33, 0.0  ;;  %v3368_v22 = vld [vmem:[%s5979_s4 + $0x60] sm:$0xff]  ;;  %v1040_v33 = vld [vmem:[%s5980_s5 + $0x58] sm:$0xff] }
 0x233   :  { %669 = vmatmul.f32.vlgmr.msra.gmra.mxu3 %v581_v29  ;;  %v710_v29 = vld [vmem:[%s5979_s4 + $0x28] sm:$0xff] }
 0x236   :  { %v644_v48 = vpop.f32.mrf.mxu2 }
 0x237   :  { %v515_v9 = vpop.f32.mrf.mxu0  ;;  %v645_v59 = vadd.f32 %v644_v48, %v618_v46  ;;  %v1314_v46 = vld [vmem:[%s5980_s5 + $0x98] sm:$0xff]  ;;  %v1312_v48 = vld [vmem:[%s5980_s5 + $0x88] sm:$0xff] }
 0x238   :  { %v516_v31 = vadd.f32 %v3941_v49, %v515_v9  ;;  %v711_v9 = vld [vmem:[%s5979_s4 + $0x30] sm:$0x3] }
 0x23a   :  { %v576_v36 = vmax.f32 %v516_v31, 0.0  ;;  %v847_v31 = vld [vmem:[%s5980_s5 + $0x20] sm:$0xff] }
 0x23b   :  { %672 = vmatmul.f32.gmra.mxu3 %v585_v19  ;;  %v3392_v19 = vld [vmem:[%s5979_s4 + $0x70] sm:$0xff] }
 0x23f   :  { %v518_v16 = vpop.f32.mrf.mxu0 }
 0x240   :  { %v519_v62 = vadd.f32 %v3941_v49, %v518_v16  ;;  %v3393_v16 = vld [vmem:[%s5979_s4 + $0x78] sm:$0xff] }
 0x242   :  { %v577_v34 = vmax.f32 %v519_v62, 0.0  ;;  %v849_v62 = vld [vmem:[%s5980_s5 + $0x30] sm:$0xff] }
 0x243   :  { %675 = vmatmul.f32.gmra.mxu3 %v589_v30  ;;  %v3394_v30 = vld [vmem:[%s5979_s4 + $0x80] sm:$0xff] }
 0x247   :  { %v521_v6 = vpop.f32.mrf.mxu0 }
 0x248   :  { %v522_v60 = vadd.f32 %v3941_v49, %v521_v6  ;;  %v647_v49 = vpop.f32.mrf.mxu2  ;;  %v850_v6 = vld [vmem:[%s5980_s5 + $0x38] sm:$0xff] }
 0x249   :  { %v648_v58 = vadd.f32 %v647_v49, %v621_v47  ;;  %v1313_v47 = vld [vmem:[%s5980_s5 + $0x90] sm:$0xff] }
 0x24a   :  { %v578_v32 = vmax.f32 %v522_v60, 0.0  ;;  %v848_v60 = vld [vmem:[%s5980_s5 + $0x28] sm:$0xff] }
 0x24c   :  { %688 = vmatpush.msrb.mxu1 %v578_v32  ;;  %v3395_v32 = vld [vmem:[%s5979_s4 + $0x88] sm:$0xff] }
 0x24e   :  { %689 = vmatpush.msrb.mxu1 %v577_v34  ;;  %v1039_v34 = vld [vmem:[%s5980_s5 + $0x50] sm:$0xff] }
 0x250   :  { %690 = vmatpush.msrb.mxu1 %v576_v36  ;;  %v650_v54 = vpop.f32.mrf.mxu2  ;;  %v3396_v36 = vld [vmem:[%s5979_s4 + $0x90] sm:$0xff] }
 0x251   :  { %v651_v56 = vadd.f32 %v650_v54, %v624_v50 }
 0x252   :  { %691 = vmatpush.msrb.mxu1 %v575_v38  ;;  %v1037_v38 = vld [vmem:[%s5980_s5 + $0x40] sm:$0xff] }
 0x254   :  { %692 = vmatpush.msrb.mxu1 %v574_v40 }
 0x256   :  { %693 = vmatpush.msrb.mxu1 %v573_v41 }
 0x258   :  { %694 = vmatpush.msrb.mxu1 %v572_v42 }
 0x259   :  { %3352 = vmatmul.msk.f32.vlgmr.msrb.gmra.mxu1 %vm591_vm2, %v582_v43 }
 0x25a   :  { %885 = vmatpush.msra.mxu1 %v850_v6 }
 0x25c   :  { %886 = vmatpush.msra.mxu1 %v849_v62 }
 0x25e   :  { %887 = vmatpush.msra.mxu1 %v848_v60  ;;  %v3442_v60 = vld [vmem:[%s5979_s4 + $0x110] sm:$0x3] }
 0x260   :  { %888 = vmatpush.msra.mxu1 %v847_v31 }
 0x261   :  { %3353 = vmatmul.msk.f32.gmra.mxu1 %vm591_vm2, %v586_v44 }
 0x262   :  { %1074 = vmatpush.msrb.mxu1 %v1040_v33 }
 0x264   :  { %1075 = vmatpush.msrb.mxu1 %v1039_v34 }
 0x266   :  { %1076 = vmatpush.msrb.mxu1 %v1038_v35 }
 0x268   :  { %1077 = vmatpush.msrb.mxu1 %v1037_v38 }
 0x269   :  { %3354 = vmatmul.msk.f32.gmra.mxu1 %vm591_vm2, %v590_v45 }
 0x2b6   :  { %v670_v51 = vpop.f32.mrf.mxu3 }
 0x2b7   :  { %v671_v2 = vadd.f32 %v670_v51, %v645_v59  ;;  %v1311_v51 = vld [vmem:[%s5980_s5 + $0x80] sm:$0xff] }
 0x2be   :  { %v673_v53 = vpop.f32.mrf.mxu3 }
 0x2bf   :  { %v674_v0 = vadd.f32 %v673_v53, %v648_v58  ;;  %v3414_v58 = vld [vmem:[%s5979_s4 + $0xa8] sm:$0xff] }
 0x2c6   :  { %v676_v57 = vpop.f32.mrf.mxu3 }
 0x2c7   :  { %v677_v61 = vadd.f32 %v676_v57, %v651_v56 }
 0x2d6   :  { %v696_v52 = vpop.f32.mrf.mxu1 }
 0x2d7   :  { %v4141_v4 = vadd.f32 %v696_v52, %v671_v2 }
 0x2de   :  { %v699_v55 = vpop.f32.mrf.mxu1 }
 0x2df   :  { %v4135_v3 = vadd.f32 %v699_v55, %v674_v0  ;;  %v3416_v0 = vld [vmem:[%s5979_s4 + $0xb8] sm:$0xff] }
 0x2e6   :  { %v702_v63 = vpop.f32.mrf.mxu1 }
 0x2e7   :  { %v4133_v1 = vadd.f32 %v702_v63, %v677_v61  ;;  %v3415_v61 = vld [vmem:[%s5979_s4 + $0xb0] sm:$0xff] }
 0x2e9   :  { %3355 = vmatpush.msk.msrb.mxu2 %vm734_vm3, %v4133_v1  ;;  %3370 = vmatpush.msk.msrb.mxu3 %vm734_vm3, %v4133_v1 }
 0x2eb   :  { %752 = vmatpush.msrb.mxu2 %v4135_v3  ;;  %823 = vmatpush.msrb.mxu3 %v4135_v3 }
 0x2ed   :  { %753 = vmatpush.msrb.mxu2 %v4141_v4  ;;  %824 = vmatpush.msrb.mxu3 %v4141_v4 }
 0x2ee   :  { %3356 = vmatmul.msk.f32.vlgmr.msrb.gmra.mxu2 %vm712_vm4, %v705_v5  ;;  %3371 = vmatmul.msk.f32.vlgmr.msrb.gmra.mxu3 %vm712_vm4, %v3363_v7  ;;  %v1451_v5 = vld [vmem:[%s5980_s5 + $0xb8] sm:$0xff]  ;;  %v1450_v7 = vld [vmem:[%s5980_s5 + $0xb0] sm:$0xff] }
 0x2ef   :  { %944 = vmatpush.msra.mxu2 %v779_v8  ;;  %3399 = vmatpush.msk.msra.mxu3 %vm734_vm3, %v4133_v1  ;;  %v1449_v8 = vld [vmem:[%s5980_s5 + $0xa8] sm:$0xff] }
 0x2f1   :  { %945 = vmatpush.msra.mxu2 %v778_v10  ;;  %1013 = vmatpush.msra.mxu3 %v4135_v3  ;;  %v3417_v10 = vld [vmem:[%s5979_s4 + $0xc0] sm:$0xff] }
 0x2f3   :  { %946 = vmatpush.msra.mxu2 %v777_v11  ;;  %1014 = vmatpush.msra.mxu3 %v4141_v4  ;;  %v1448_v11 = vld [vmem:[%s5980_s5 + $0xa0] sm:$0xff] }
 0x2f5   :  { %947 = vmatpush.msra.mxu2 %v776_v12  ;;  %1211 = vmatpush.msrb.mxu3 %v1177_v18  ;;  %v3420_v18 = vld [vmem:[%s5979_s4 + $0xd8] sm:$0x3] }
 0x2f6   :  { %3372 = vmatmul.msk.f32.gmra.mxu3 %vm712_vm4, %v3364_v13  ;;  %3357 = vmatmul.msk.f32.gmra.mxu2 %vm712_vm4, %v706_v14  ;;  %v3418_v13 = vld [vmem:[%s5979_s4 + $0xc8] sm:$0xff] }
 0x2f7   :  { %3421 = vmatpush.msk.msrb.mxu2 %vm734_vm3, %v4133_v1  ;;  %1212 = vmatpush.msrb.mxu3 %v1176_v20 }
 0x2f9   :  { %1150 = vmatpush.msrb.mxu2 %v4135_v3  ;;  %1213 = vmatpush.msrb.mxu3 %v1175_v24  ;;  %v3436_v24 = vld [vmem:[%s5979_s4 + $0xe0] sm:$0xff] }
 0x2fb   :  { %1151 = vmatpush.msrb.mxu2 %v4141_v4  ;;  %1214 = vmatpush.msrb.mxu3 %v1174_v27  ;;  %v3438_v27 = vld [vmem:[%s5979_s4 + $0xf0] sm:$0xff] }
 0x2fe   :  { %3373 = vmatmul.msk.f32.gmra.mxu3 %vm712_vm4, %v3365_v15  ;;  %3358 = vmatmul.msk.f32.gmra.mxu2 %vm712_vm4, %v707_v17  ;;  %v3419_v15 = vld [vmem:[%s5979_s4 + $0xd0] sm:$0xff] }
 0x306   :  { %3374 = vmatmul.msk.f32.gmra.mxu3 %vm712_vm4, %v3366_v25  ;;  %3359 = vmatmul.msk.f32.gmra.mxu2 %vm712_vm4, %v708_v26  ;;  %v3437_v25 = vld [vmem:[%s5979_s4 + $0xe8] sm:$0xff] }
 0x30e   :  { %3375 = vmatmul.msk.f32.gmra.mxu3 %vm712_vm4, %v3367_v28  ;;  %3360 = vmatmul.msk.f32.gmra.mxu2 %vm712_vm4, %v709_v23 }
 0x316   :  { %3376 = vmatmul.msk.f32.gmra.mxu3 %vm712_vm4, %v3368_v22  ;;  %3361 = vmatmul.msk.f32.gmra.mxu2 %vm712_vm4, %v710_v29  ;;  %v3439_v22 = vld [vmem:[%s5979_s4 + $0xf8] sm:$0xff] }
 0x31e   :  { %3377 = vmatmul.msk.f32.gmra.mxu3 %vm712_vm4, %v3369_v21  ;;  %3362 = vmatmul.msk.f32.gmra.mxu2 %vm712_vm4, %v711_v9  ;;  %v3440_v9 = vld [vmem:[%s5979_s4 + $0x100] sm:$0xff] }
 0x326   :  { %3400 = vmatmul.msk.f32.vlgmr.msra.gmra.mxu3 %vm712_vm4, %v3392_v19 }
 0x327   :  { %3465 = vmatpush.msk.msra.mxu3 %vm734_vm3, %v4133_v1 }
 0x329   :  { %1424 = vmatpush.msra.mxu3 %v4135_v3 }
 0x32b   :  { %1425 = vmatpush.msra.mxu3 %v4141_v4 }
 0x32e   :  { %3401 = vmatmul.msk.f32.gmra.mxu3 %vm712_vm4, %v3393_v16 }
 0x336   :  { %3402 = vmatmul.msk.f32.gmra.mxu3 %vm712_vm4, %v3394_v30  ;;  %v3441_v30 = vld [vmem:[%s5979_s4 + $0x108] sm:$0xff] }
 0x33e   :  { %3403 = vmatmul.msk.f32.gmra.mxu3 %vm712_vm4, %v3395_v32 }
 0x346   :  { %3404 = vmatmul.msk.f32.gmra.mxu3 %vm712_vm4, %v3396_v36 }
 0x34e   :  { %3405 = vmatmul.msk.f32.gmra.mxu3 %vm712_vm4, %v3397_v37 }
 0x356   :  { %3406 = vmatmul.msk.f32.gmra.mxu3 %vm712_vm4, %v3398_v39 }
 0x371   :  { %v755_v40 = vpop.f32.mrf.mxu2  ;;  %v826_v41 = vpop.f32.mrf.mxu3 }
 0x372   :  { %3378 = vmatmul.msk.f32.vlgmr.msra.gmra.mxu1 %vm851_vm5, %v826_v41  ;;  %3385 = vmatmul.msk.f32.vlgmr.msra.gmra.mxu2 %vm851_vm5, %v755_v40 }
 0x373   :  { %3443 = vmatpush.msk.msra.mxu1 %vm734_vm3, %v4133_v1  ;;  %1348 = vmatpush.msra.mxu2 %v1314_v46  ;;  %v1585_v46 = vld [vmem:[%s5980_s5 + $0xc0] sm:$0xff] }
 0x375   :  { %1287 = vmatpush.msra.mxu1 %v4135_v3  ;;  %1349 = vmatpush.msra.mxu2 %v1313_v47 }
 0x377   :  { %1288 = vmatpush.msra.mxu1 %v4141_v4  ;;  %1350 = vmatpush.msra.mxu2 %v1312_v48 }
 0x379   :  { %v829_v42 = vpop.f32.mrf.mxu3  ;;  %v758_v43 = vpop.f32.mrf.mxu2  ;;  %1351 = vmatpush.msra.mxu2 %v1311_v51 }
 0x37a   :  { %3379 = vmatmul.msk.f32.gmra.mxu1 %vm851_vm5, %v829_v42  ;;  %3386 = vmatmul.msk.f32.gmra.mxu2 %vm851_vm5, %v758_v43  ;;  %v1588_v43 = vld [vmem:[%s5980_s5 + $0xd8] sm:$0xff] }
 0x381   :  { %v832_v44 = vpop.f32.mrf.mxu3  ;;  %v761_v45 = vpop.f32.mrf.mxu2 }
 0x382   :  { %3380 = vmatmul.msk.f32.gmra.mxu1 %vm851_vm5, %v832_v44  ;;  %3387 = vmatmul.msk.f32.gmra.mxu2 %vm851_vm5, %v761_v45  ;;  %v1587_v44 = vld [vmem:[%s5980_s5 + $0xd0] sm:$0xff]  ;;  %v1586_v45 = vld [vmem:[%s5980_s5 + $0xc8] sm:$0xff] }
 0x389   :  { %v835_v50 = vpop.f32.mrf.mxu3  ;;  %v764_v49 = vpop.f32.mrf.mxu2 }
 0x38a   :  { %3381 = vmatmul.msk.f32.gmra.mxu1 %vm851_vm5, %v835_v50  ;;  %3388 = vmatmul.msk.f32.gmra.mxu2 %vm851_vm5, %v764_v49 }
 0x391   :  { %v838_v52 = vpop.f32.mrf.mxu3  ;;  %v767_v53 = vpop.f32.mrf.mxu2 }
 0x392   :  { %3382 = vmatmul.msk.f32.gmra.mxu1 %vm851_vm5, %v838_v52  ;;  %3389 = vmatmul.msk.f32.gmra.mxu2 %vm851_vm5, %v767_v53 }
 0x399   :  { %v841_v54 = vpop.f32.mrf.mxu3  ;;  %v770_v55 = vpop.f32.mrf.mxu2 }
 0x39a   :  { %3383 = vmatmul.msk.f32.gmra.mxu1 %vm851_vm5, %v841_v54  ;;  %3390 = vmatmul.msk.f32.gmra.mxu2 %vm851_vm5, %v770_v55  ;;  %v3458_v55 = vld [vmem:[%s5979_s4 + $0x118] sm:$0xff] }
 0x3a1   :  { %v844_v56 = vpop.f32.mrf.mxu3  ;;  %v773_v57 = vpop.f32.mrf.mxu2 }
 0x3a2   :  { %3384 = vmatmul.msk.f32.gmra.mxu1 %vm851_vm5, %v844_v56  ;;  %3391 = vmatmul.msk.f32.gmra.mxu2 %vm851_vm5, %v773_v57  ;;  %v3459_v57 = vld [vmem:[%s5979_s4 + $0x120] sm:$0xff] }
 0x3a9   :  { %v1016_v59 = vpop.f32.mrf.mxu3 }
 0x3aa   :  { %3407 = vmatmul.msk.f32.vlgmr.msrb.gmra.mxu1 %vm851_vm5, %v1016_v59  ;;  %3422 = vmatmul.msk.f32.vlgmr.msrb.gmra.mxu2 %vm712_vm4, %v3414_v58  ;;  %v3460_v59 = vld [vmem:[%s5979_s4 + $0x128] sm:$0xff] }
 0x3ab   :  { %3487 = vmatpush.msk.msrb.mxu2 %vm734_vm3, %v4133_v1  ;;  %1485 = vmatpush.msrb.mxu1 %v1451_v5  ;;  %v3464_v5 = vld [vmem:[%s5979_s4 + $0x148] sm:$0x3] }
 0x3ad   :  { %1561 = vmatpush.msrb.mxu2 %v4135_v3  ;;  %1486 = vmatpush.msrb.mxu1 %v1450_v7  ;;  %v3480_v7 = vld [vmem:[%s5979_s4 + $0x150] sm:$0xff] }
 0x3af   :  { %1562 = vmatpush.msrb.mxu2 %v4141_v4  ;;  %1487 = vmatpush.msrb.mxu1 %v1449_v8  ;;  %v3481_v8 = vld [vmem:[%s5979_s4 + $0x158] sm:$0xff] }
 0x3b1   :  { %v1019_v63 = vpop.f32.mrf.mxu3  ;;  %1488 = vmatpush.msrb.mxu1 %v1448_v11  ;;  %v3483_v11 = vld [vmem:[%s5979_s4 + $0x168] sm:$0xff] }
 0x3b2   :  { %3408 = vmatmul.msk.f32.gmra.mxu1 %vm851_vm5, %v1019_v63  ;;  %3423 = vmatmul.msk.f32.gmra.mxu2 %vm712_vm4, %v3415_v61  ;;  %v3462_v61 = vld [vmem:[%s5979_s4 + $0x138] sm:$0xff] }
 0x3b9   :  { %v1022_v2 = vpop.f32.mrf.mxu3 }
 0x3ba   :  { %3409 = vmatmul.msk.f32.gmra.mxu1 %vm851_vm5, %v1022_v2  ;;  %3424 = vmatmul.msk.f32.gmra.mxu2 %vm712_vm4, %v3416_v0  ;;  %v3463_v0 = vld [vmem:[%s5979_s4 + $0x140] sm:$0xff] }
 0x3c1   :  { %v1025_v12 = vpop.f32.mrf.mxu3 }
 0x3c2   :  { %3410 = vmatmul.msk.f32.gmra.mxu1 %vm851_vm5, %v1025_v12  ;;  %3425 = vmatmul.msk.f32.gmra.mxu2 %vm712_vm4, %v3417_v10  ;;  %v3482_v10 = vld [vmem:[%s5979_s4 + $0x160] sm:$0xff] }
 0x3c9   :  { %v1028_v14 = vpop.f32.mrf.mxu3 }
 0x3ca   :  { %3411 = vmatmul.msk.f32.gmra.mxu1 %vm851_vm5, %v1028_v14  ;;  %3426 = vmatmul.msk.f32.gmra.mxu2 %vm712_vm4, %v3418_v13  ;;  %v3484_v13 = vld [vmem:[%s5979_s4 + $0x170] sm:$0xff] }
 0x3d1   :  { %v1031_v17 = vpop.f32.mrf.mxu3 }
 0x3d2   :  { %3412 = vmatmul.msk.f32.gmra.mxu1 %vm851_vm5, %v1031_v17  ;;  %3427 = vmatmul.msk.f32.gmra.mxu2 %vm712_vm4, %v3419_v15  ;;  %v3485_v15 = vld [vmem:[%s5979_s4 + $0x178] sm:$0xff] }
 0x3d9   :  { %v1034_v20 = vpop.f32.mrf.mxu3 }
 0x3da   :  { %3413 = vmatmul.msk.f32.gmra.mxu1 %vm851_vm5, %v1034_v20  ;;  %3428 = vmatmul.msk.f32.gmra.mxu2 %vm712_vm4, %v3420_v18  ;;  %v3486_v18 = vld [vmem:[%s5979_s4 + $0x180] sm:$0x3] }
 0x3e2   :  { %3444 = vmatmul.msk.f32.vlgmr.msra.gmra.mxu1 %vm712_vm4, %v3436_v24 }
 0x3e3   :  { %3509 = vmatpush.msk.msra.mxu1 %vm734_vm3, %v4133_v1 }
 0x3e5   :  { %1698 = vmatpush.msra.mxu1 %v4135_v3 }
 0x3e7   :  { %1699 = vmatpush.msra.mxu1 %v4141_v4 }
 0x3ea   :  { %3445 = vmatmul.msk.f32.gmra.mxu1 %vm712_vm4, %v3437_v25 }
 0x3ef   :  { %v4384_v26 = vpop.f32.mrf.mxu1 }
 0x3f2   :  { %3446 = vmatmul.msk.f32.gmra.mxu1 %vm712_vm4, %v3438_v27 }
 0x3f5   :  { %v4390_v28 = vpop.f32.mrf.mxu2 }
 0x3f7   :  { %v4392_v23 = vpop.f32.mrf.mxu1 }
 0x3fa   :  { %3447 = vmatmul.msk.f32.gmra.mxu1 %vm712_vm4, %v3439_v22 }
 0x3fd   :  { %v4398_v29 = vpop.f32.mrf.mxu2 }
 0x3ff   :  { %v4400_v21 = vpop.f32.mrf.mxu1 }
 0x402   :  { %3448 = vmatmul.msk.f32.gmra.mxu1 %vm712_vm4, %v3440_v9 }
 0x405   :  { %v4406_v19 = vpop.f32.mrf.mxu2 }
 0x407   :  { %v4408_v16 = vpop.f32.mrf.mxu1 }
 0x40a   :  { %3449 = vmatmul.msk.f32.gmra.mxu1 %vm712_vm4, %v3441_v30 }
 0x40d   :  { %v4414_v6 = vpop.f32.mrf.mxu2 }
 0x40f   :  { %v4416_v62 = vpop.f32.mrf.mxu1 }
 0x412   :  { %3450 = vmatmul.msk.f32.gmra.mxu1 %vm712_vm4, %v3442_v60 }
 0x415   :  { %v4422_v31 = vpop.f32.mrf.mxu2 }
 0x417   :  { %v4424_v32 = vpop.f32.mrf.mxu1 }
 0x41d   :  { %v4426_v33 = vpop.f32.mrf.mxu2 }
 0x41f   :  { %v4428_v34 = vpop.f32.mrf.mxu1 }
 0x425   :  { %v4430_v35 = vpop.f32.mrf.mxu2 }
 0x427   :  { %v4432_v36 = vpop.f32.mrf.mxu1 }
 0x42d   :  { %v1153_v37 = vpop.f32.mrf.mxu2 }
 0x42e   :  { %3429 = vmatmul.msk.f32.vlgmr.msrb.gmra.mxu3 %vm851_vm5, %v1153_v37 }
 0x42f   :  { %v4435_v38 = vpop.f32.mrf.mxu1  ;;  %1622 = vmatpush.msrb.mxu3 %v1588_v43 }
 0x431   :  { %1623 = vmatpush.msrb.mxu3 %v1587_v44 }
 0x433   :  { %1624 = vmatpush.msrb.mxu3 %v1586_v45 }
 0x435   :  { %v1156_v39 = vpop.f32.mrf.mxu2  ;;  %1625 = vmatpush.msrb.mxu3 %v1585_v46 }
 0x436   :  { %3430 = vmatmul.msk.f32.gmra.mxu3 %vm851_vm5, %v1156_v39 }
 0x437   :  { %v4438_v40 = vpop.f32.mrf.mxu1 }
 0x43d   :  { %v1159_v41 = vpop.f32.mrf.mxu2 }
 0x43e   :  { %3431 = vmatmul.msk.f32.gmra.mxu3 %vm851_vm5, %v1159_v41 }
 0x43f   :  { %v4441_v42 = vpop.f32.mrf.mxu1 }
 0x445   :  { %v1162_v47 = vpop.f32.mrf.mxu2 }
 0x446   :  { %3432 = vmatmul.msk.f32.gmra.mxu3 %vm851_vm5, %v1162_v47 }
 0x447   :  { %v4456_v48 = vpop.f32.mrf.mxu1 }
 0x44d   :  { %v1165_v50 = vpop.f32.mrf.mxu2 }
 0x44e   :  { %3433 = vmatmul.msk.f32.gmra.mxu3 %vm851_vm5, %v1165_v50 }
 0x44f   :  { %v4459_v51 = vpop.f32.mrf.mxu1 }
 0x455   :  { %v1168_v49 = vpop.f32.mrf.mxu2 }
 0x456   :  { %3434 = vmatmul.msk.f32.gmra.mxu3 %vm851_vm5, %v1168_v49 }
 0x457   :  { %v4462_v52 = vpop.f32.mrf.mxu1 }
 0x45d   :  { %v1171_v53 = vpop.f32.mrf.mxu2 }
 0x45e   :  { %3435 = vmatmul.msk.f32.gmra.mxu3 %vm851_vm5, %v1171_v53 }
 0x45f   :  { %v1290_v54 = vpop.f32.mrf.mxu1 }
 0x460   :  { %3451 = vmatmul.msk.f32.vlgmr.msra.gmra.mxu2 %vm851_vm5, %v1290_v54  ;;  %v3502_v54 = vld [vmem:[%s5979_s4 + $0x188] sm:$0xff] }
 0x466   :  { %3466 = vmatmul.msk.f32.vlgmr.msra.gmra.mxu3 %vm712_vm4, %v3458_v55 }
 0x467   :  { %v1293_v56 = vpop.f32.mrf.mxu1  ;;  %3531 = vmatpush.msk.msra.mxu3 %vm734_vm3, %v4133_v1 }
 0x468   :  { %3452 = vmatmul.msk.f32.gmra.mxu2 %vm851_vm5, %v1293_v56  ;;  %v3503_v56 = vld [vmem:[%s5979_s4 + $0x190] sm:$0xff] }
 0x469   :  { %1835 = vmatpush.msra.mxu3 %v4135_v3  ;;  %v3461_v3 = vld [vmem:[%s5979_s4 + $0x130] sm:$0xff] }
 0x46b   :  { %1836 = vmatpush.msra.mxu3 %v4141_v4 }
 0x46e   :  { %3467 = vmatmul.msk.f32.gmra.mxu3 %vm712_vm4, %v3459_v57 }
 0x46f   :  { %v1296_v58 = vpop.f32.mrf.mxu1 }
 0x470   :  { %3453 = vmatmul.msk.f32.gmra.mxu2 %vm851_vm5, %v1296_v58  ;;  %v3504_v58 = vld [vmem:[%s5979_s4 + $0x198] sm:$0xff] }
 0x476   :  { %3468 = vmatmul.msk.f32.gmra.mxu3 %vm712_vm4, %v3460_v59 }
 0x477   :  { %v1299_v1 = vpop.f32.mrf.mxu1 }
 0x478   :  { %3454 = vmatmul.msk.f32.gmra.mxu2 %vm851_vm5, %v1299_v1  ;;  %v3505_v1 = vld [vmem:[%s5979_s4 + $0x1a0] sm:$0xff] }
 0x47e   :  { %3469 = vmatmul.msk.f32.gmra.mxu3 %vm712_vm4, %v3461_v3 }
 0x47f   :  { %v1302_v4 = vpop.f32.mrf.mxu1 }
 0x480   :  { %3455 = vmatmul.msk.f32.gmra.mxu2 %vm851_vm5, %v1302_v4  ;;  %v3506_v4 = vld [vmem:[%s5979_s4 + $0x1a8] sm:$0xff] }
 0x486   :  { %3470 = vmatmul.msk.f32.gmra.mxu3 %vm712_vm4, %v3462_v61 }
 0x487   :  { %v1305_v63 = vpop.f32.mrf.mxu1 }
 0x488   :  { %3456 = vmatmul.msk.f32.gmra.mxu2 %vm851_vm5, %v1305_v63  ;;  %v3507_v63 = vld [vmem:[%s5979_s4 + $0x1b0] sm:$0xff] }
 0x48e   :  { %3471 = vmatmul.msk.f32.gmra.mxu3 %vm712_vm4, %v3463_v0 }
 0x48f   :  { %v1308_v2 = vpop.f32.mrf.mxu1 }
 0x490   :  { %3457 = vmatmul.msk.f32.gmra.mxu2 %vm851_vm5, %v1308_v2  ;;  %v3508_v2 = vld [vmem:[%s5979_s4 + $0x1b8] sm:$0x3] }
 0x496   :  { %3472 = vmatmul.msk.f32.gmra.mxu3 %vm712_vm4, %v3464_v5  ;;  %v3524_v5 = vld [vmem:[%s5979_s4 + $0x1c0] sm:$0xff] }
 0x498   :  { %3488 = vmatmul.msk.f32.vlgmr.msrb.gmra.mxu2 %vm712_vm4, %v3480_v7  ;;  %v3525_v7 = vld [vmem:[%s5979_s4 + $0x1c8] sm:$0xff] }
 0x4a0   :  { %3489 = vmatmul.msk.f32.gmra.mxu2 %vm712_vm4, %v3481_v8  ;;  %v3526_v8 = vld [vmem:[%s5979_s4 + $0x1d0] sm:$0xff] }
 0x4a8   :  { %3490 = vmatmul.msk.f32.gmra.mxu2 %vm712_vm4, %v3482_v10 }
 0x4b0   :  { %3491 = vmatmul.msk.f32.gmra.mxu2 %vm712_vm4, %v3483_v11  ;;  %v3527_v11 = vld [vmem:[%s5979_s4 + $0x1d8] sm:$0xff] }
 0x4b1   :  { %v4520_v12 = vpop.f32.mrf.mxu3 }
 0x4b8   :  { %3492 = vmatmul.msk.f32.gmra.mxu2 %vm712_vm4, %v3484_v13 }
 0x4b9   :  { %v4526_v14 = vpop.f32.mrf.mxu3 }
 0x4c0   :  { %3493 = vmatmul.msk.f32.gmra.mxu2 %vm712_vm4, %v3485_v15  ;;  %v3528_v15 = vld [vmem:[%s5979_s4 + $0x1e0] sm:$0xff] }
 0x4c1   :  { %v4532_v17 = vpop.f32.mrf.mxu3 }
 0x4c8   :  { %3494 = vmatmul.msk.f32.gmra.mxu2 %vm712_vm4, %v3486_v18 }
 0x4c9   :  { %v4538_v20 = vpop.f32.mrf.mxu3 }
 0x4d1   :  { %v4540_v24 = vpop.f32.mrf.mxu3 }
 0x4d9   :  { %v4542_v25 = vpop.f32.mrf.mxu3 }
 0x4e1   :  { %v4544_v27 = vpop.f32.mrf.mxu3 }
 0x4e3   :  { %v4546_v22 = vpop.f32.mrf.mxu2 }
 0x4e9   :  { %v1427_v9 = vpop.f32.mrf.mxu3 }
 0x4ea   :  { %3473 = vmatmul.msk.f32.vlgmr.msrb.gmra.mxu1 %vm851_vm5, %v1427_v9  ;;  %v3529_v9 = vld [vmem:[%s5979_s4 + $0x1e8] sm:$0xff] }
 0x4eb   :  { %v4549_v30 = vpop.f32.mrf.mxu2 }
 0x4f1   :  { %v1430_v60 = vpop.f32.mrf.mxu3 }
 0x4f2   :  { %3474 = vmatmul.msk.f32.gmra.mxu1 %vm851_vm5, %v1430_v60  ;;  %v1725_v60 = vld [vmem:[%s5980_s5 + $0xf8] sm:$0xff] }
 0x4f3   :  { %v4552_v37 = vpop.f32.mrf.mxu2  ;;  %1759 = vmatpush.msra.mxu2 %v1725_v60 }
 0x4f9   :  { %v1433_v39 = vpop.f32.mrf.mxu3 }
 0x4fa   :  { %3475 = vmatmul.msk.f32.gmra.mxu1 %vm851_vm5, %v1433_v39  ;;  %v1724_v39 = vld [vmem:[%s5980_s5 + $0xf0] sm:$0xff] }
 0x4fb   :  { %v4555_v41 = vpop.f32.mrf.mxu2  ;;  %1760 = vmatpush.msra.mxu2 %v1724_v39 }
 0x501   :  { %v1436_v43 = vpop.f32.mrf.mxu3 }
 0x502   :  { %3476 = vmatmul.msk.f32.gmra.mxu1 %vm851_vm5, %v1436_v43  ;;  %v1723_v43 = vld [vmem:[%s5980_s5 + $0xe8] sm:$0xff] }
 0x503   :  { %v4558_v44 = vpop.f32.mrf.mxu2  ;;  %1761 = vmatpush.msra.mxu2 %v1723_v43 }
 0x509   :  { %v1439_v45 = vpop.f32.mrf.mxu3 }
 0x50a   :  { %3477 = vmatmul.msk.f32.gmra.mxu1 %vm851_vm5, %v1439_v45 }
 0x50b   :  { %v4561_v46 = vpop.f32.mrf.mxu2 }
 0x511   :  { %v1442_v47 = vpop.f32.mrf.mxu3 }
 0x512   :  { %3478 = vmatmul.msk.f32.gmra.mxu1 %vm851_vm5, %v1442_v47  ;;  %v1722_v47 = vld [vmem:[%s5980_s5 + $0xe0] sm:$0xff] }
 0x513   :  { %v4564_v50 = vpop.f32.mrf.mxu2  ;;  %1762 = vmatpush.msra.mxu2 %v1722_v47 }
 0x519   :  { %v1445_v49 = vpop.f32.mrf.mxu3 }
 0x51a   :  { %3479 = vmatmul.msk.f32.gmra.mxu1 %vm851_vm5, %v1445_v49  ;;  %v3530_v49 = vld [vmem:[%s5979_s4 + $0x1f0] sm:$0x3] }
 0x51b   :  { %v1564_v53 = vpop.f32.mrf.mxu2 }
 0x51c   :  { %3495 = vmatmul.msk.f32.vlgmr.msrb.gmra.mxu3 %vm851_vm5, %v1564_v53 }
 0x522   :  { %3510 = vmatmul.msk.f32.vlgmr.msra.gmra.mxu1 %vm712_vm4, %v3502_v54 }
 0x523   :  { %v1567_v55 = vpop.f32.mrf.mxu2 }
 0x524   :  { %3496 = vmatmul.msk.f32.gmra.mxu3 %vm851_vm5, %v1567_v55 }
 0x52a   :  { %3511 = vmatmul.msk.f32.gmra.mxu1 %vm712_vm4, %v3503_v56 }
 0x52b   :  { %v1570_v57 = vpop.f32.mrf.mxu2 }
 0x52c   :  { %3497 = vmatmul.msk.f32.gmra.mxu3 %vm851_vm5, %v1570_v57 }
 0x532   :  { %3512 = vmatmul.msk.f32.gmra.mxu1 %vm712_vm4, %v3504_v58 }
 0x533   :  { %v1573_v59 = vpop.f32.mrf.mxu2 }
 0x534   :  { %3498 = vmatmul.msk.f32.gmra.mxu3 %vm851_vm5, %v1573_v59 }
 0x53a   :  { %3513 = vmatmul.msk.f32.gmra.mxu1 %vm712_vm4, %v3505_v1  ;;  %v2255_v1 = vld [vmem:[%s5983_s8 + $0x2e0] sm:$0xff] }
 0x53b   :  { %v1576_v3 = vpop.f32.mrf.mxu2  ;;  %2270 = vmatpush.msrb.mxu0 %v2255_v1 }
 0x53c   :  { %3499 = vmatmul.msk.f32.gmra.mxu3 %vm851_vm5, %v1576_v3 }
 0x542   :  { %3514 = vmatmul.msk.f32.gmra.mxu1 %vm712_vm4, %v3506_v4 }
 0x543   :  { %v1579_v61 = vpop.f32.mrf.mxu2 }
 0x544   :  { %3500 = vmatmul.msk.f32.gmra.mxu3 %vm851_vm5, %v1579_v61  ;;  %v1862_v61 = vld [vmem:[%s5980_s5 + $0x118] sm:$0xff] }
 0x545   :  { %1896 = vmatpush.msrb.mxu1 %v1862_v61 }
 0x54a   :  { %3515 = vmatmul.msk.f32.gmra.mxu1 %vm712_vm4, %v3507_v63  ;;  %v1861_v63 = vld [vmem:[%s5980_s5 + $0x110] sm:$0xff] }
 0x54b   :  { %v1582_v0 = vpop.f32.mrf.mxu2  ;;  %1897 = vmatpush.msrb.mxu1 %v1861_v63  ;;  %v2247_v63 = vld [vmem:[%s5983_s8 + $0x2a0] sm:$0xff] }
 0x54c   :  { %3501 = vmatmul.msk.f32.gmra.mxu3 %vm851_vm5, %v1582_v0  ;;  %v1860_v0 = vld [vmem:[%s5980_s5 + $0x108] sm:$0xff] }
 0x54d   :  { %1898 = vmatpush.msrb.mxu1 %v1860_v0 }
 0x552   :  { %3516 = vmatmul.msk.f32.gmra.mxu1 %vm712_vm4, %v3508_v2 }
 0x554   :  { %3532 = vmatmul.msk.f32.vlgmr.msra.gmra.mxu3 %vm712_vm4, %v3524_v5  ;;  %v1859_v5 = vld [vmem:[%s5980_s5 + $0x100] sm:$0xff] }
 0x555   :  { %1899 = vmatpush.msrb.mxu1 %v1859_v5 }
 0x55c   :  { %3533 = vmatmul.msk.f32.gmra.mxu3 %vm712_vm4, %v3525_v7 }
 0x564   :  { %3534 = vmatmul.msk.f32.gmra.mxu3 %vm712_vm4, %v3526_v8 }
 0x567   :  { %v4614_v10 = vpop.f32.mrf.mxu1 }
 0x56c   :  { %3535 = vmatmul.msk.f32.gmra.mxu3 %vm712_vm4, %v3527_v11 }
 0x56f   :  { %v4620_v13 = vpop.f32.mrf.mxu1 }
 0x574   :  { %3536 = vmatmul.msk.f32.gmra.mxu3 %vm712_vm4, %v3528_v15 }
 0x577   :  { %v4626_v18 = vpop.f32.mrf.mxu1 }
 0x57c   :  { %3537 = vmatmul.msk.f32.gmra.mxu3 %vm712_vm4, %v3529_v9 }
 0x57f   :  { %v4641_v45 = vpop.f32.mrf.mxu1 }
 0x584   :  { %3538 = vmatmul.msk.f32.gmra.mxu3 %vm712_vm4, %v3530_v49  ;;  %v2251_v49 = vld [vmem:[%s5983_s8 + $0x2c0] sm:$0xff] }
 0x585   :  { %2271 = vmatpush.msrb.mxu0 %v2251_v49 }
 0x587   :  { %v4650_v53 = vpop.f32.mrf.mxu1  ;;  %2272 = vmatpush.msrb.mxu0 %v2247_v63  ;;  %v968_v63 = vadd.f32 %v4430_v35, %v4428_v34 }
 0x58f   :  { %v4652_v54 = vpop.f32.mrf.mxu1 }
 0x597   :  { %v4654_v55 = vpop.f32.mrf.mxu1 }
 0x59f   :  { %v4656_v56 = vpop.f32.mrf.mxu3  ;;  %v1701_v57 = vpop.f32.mrf.mxu1 }
 0x5a0   :  { %3517 = vmatmul.msk.f32.vlgmr.msra.gmra.mxu2 %vm851_vm5, %v1701_v57 }
 0x5a7   :  { %v4659_v58 = vpop.f32.mrf.mxu3  ;;  %v1704_v59 = vpop.f32.mrf.mxu1 }
 0x5a8   :  { %3518 = vmatmul.msk.f32.gmra.mxu2 %vm851_vm5, %v1704_v59 }
 0x5af   :  { %v4665_v3 = vpop.f32.mrf.mxu3  ;;  %v1707_v4 = vpop.f32.mrf.mxu1 }
 0x5b0   :  { %3519 = vmatmul.msk.f32.gmra.mxu2 %vm851_vm5, %v1707_v4 }
 0x5b7   :  { %v4677_v2 = vpop.f32.mrf.mxu3  ;;  %v1710_v7 = vpop.f32.mrf.mxu1 }
 0x5b8   :  { %3520 = vmatmul.msk.f32.gmra.mxu2 %vm851_vm5, %v1710_v7  ;;  %v2243_v7 = vld [vmem:[%s5983_s8 + $0x280] sm:$0xff] }
 0x5b9   :  { %2273 = vmatpush.msrb.mxu0 %v2243_v7 }
 0x5bf   :  { %v4683_v8 = vpop.f32.mrf.mxu3  ;;  %v1713_v11 = vpop.f32.mrf.mxu1 }
 0x5c0   :  { %3521 = vmatmul.msk.f32.gmra.mxu2 %vm851_vm5, %v1713_v11 }
 0x5c7   :  { %v4686_v15 = vpop.f32.mrf.mxu3  ;;  %v1716_v9 = vpop.f32.mrf.mxu1 }
 0x5c8   :  { %3522 = vmatmul.msk.f32.gmra.mxu2 %vm851_vm5, %v1716_v9 }
 0x5cf   :  { %v4689_v60 = vpop.f32.mrf.mxu3  ;;  %v1719_v39 = vpop.f32.mrf.mxu1 }
 0x5d0   :  { %3523 = vmatmul.msk.f32.gmra.mxu2 %vm851_vm5, %v1719_v39 }
 0x5d7   :  { %v1838_v43 = vpop.f32.mrf.mxu3 }
 0x5d8   :  { %3539 = vmatmul.msk.f32.vlgmr.msrb.gmra.mxu1 %vm851_vm5, %v1838_v43 }
 0x5df   :  { %v1841_v47 = vpop.f32.mrf.mxu3 }
 0x5e0   :  { %3540 = vmatmul.msk.f32.gmra.mxu1 %vm851_vm5, %v1841_v47 }
 0x5e7   :  { %v1844_v57 = vpop.f32.mrf.mxu3 }
 0x5e8   :  { %3541 = vmatmul.msk.f32.gmra.mxu1 %vm851_vm5, %v1844_v57 }
 0x5ef   :  { %v1847_v59 = vpop.f32.mrf.mxu3 }
 0x5f0   :  { %3542 = vmatmul.msk.f32.gmra.mxu1 %vm851_vm5, %v1847_v59 }
 0x5f7   :  { %v1850_v1 = vpop.f32.mrf.mxu3 }
 0x5f8   :  { %3543 = vmatmul.msk.f32.gmra.mxu1 %vm851_vm5, %v1850_v1  ;;  %v965_v1 = vadd.f32 %v4426_v33, %v4424_v32  ;;  %v1106_v32 = vadd.f32 %v4462_v52, %v968_v63 }
 0x5fa   :  { %v1105_v7 = vadd.f32 %v4459_v51, %v965_v1  ;;  %v1243_v35 = vadd.f32 %v4544_v27, %v1106_v32  ;;  %v3598_v1 = vld [vmem:[#allocation9] ss:$0 sm:$0xff] }
 0x5fc   :  { %v1242_v33 = vadd.f32 %v4542_v25, %v1105_v7 }
 0x5fe   :  { %v1379_v51 = vadd.f32 %v4561_v46, %v1242_v33 }
 0x5ff   :  { %v1853_v4 = vpop.f32.mrf.mxu3 }
 0x600   :  { %3544 = vmatmul.msk.f32.gmra.mxu1 %vm851_vm5, %v1853_v4 }
 0x607   :  { %v1856_v61 = vpop.f32.mrf.mxu3 }
 0x608   :  { %3545 = vmatmul.msk.f32.gmra.mxu1 %vm851_vm5, %v1856_v61  ;;  %v962_v61 = vadd.f32 %v4422_v31, %v4416_v62  ;;  %v956_v62 = vadd.f32 %v4406_v19, %v4400_v21  ;;  %v1380_v21 = vadd.f32 %v4564_v50, %v1243_v35  ;;  %v1516_v19 = vadd.f32 %v4652_v54, %v1379_v51 }
 0x623   :  { %v4705_v0 = vpop.f32.mrf.mxu2 }
 0x624   :  { %5991 = vst [vmem:[#allocation14_spill] sm:$0xff] %v4705_v0  ;;  %v1104_v0 = vadd.f32 %v4456_v48, %v962_v61 }
 0x626   :  { %v1241_v34 = vadd.f32 %v4540_v24, %v1104_v0 }
 0x628   :  { %v1378_v25 = vadd.f32 %v4558_v44, %v1241_v34  ;;  %v2044_v34 = vld [vmem:[%s5983_s8 + $0x180] sm:$0xff] }
 0x62b   :  { %v4707_v5 = vpop.f32.mrf.mxu2  ;;  %v5994_v7 = vld [vmem:[#allocation14_spill] sm:$0xff] }
 0x633   :  { %v4714_v9 = vpop.f32.mrf.mxu2 }
 0x63b   :  { %v1773_v43 = vpop.f32.mrf.mxu2 }
 0x643   :  { %v1776_v49 = vpop.f32.mrf.mxu2 }
 0x64b   :  { %v1779_v4 = vpop.f32.mrf.mxu2 }
 0x653   :  { %v1782_v54 = vpop.f32.mrf.mxu2 }
 0x655   :  { %v4712_v11 = vpop.f32.mrf.mxu1 }
 0x656   :  { %5992 = vst [vmem:[#allocation15_spill] sm:$0xff] %v4712_v11  ;;  %v2239_v11 = vld [vmem:[%s5983_s8 + $0x260] sm:$0xff] }
 0x657   :  { %2274 = vmatpush.msrb.mxu0 %v2239_v11 }
 0x65d   :  { %v4716_v39 = vpop.f32.mrf.mxu1  ;;  %v5996_v35 = vld [vmem:[#allocation15_spill] sm:$0xff] }
 0x65e   :  { %5993 = vst [vmem:[#allocation16_spill] sm:$0xff] %v4716_v39  ;;  %v959_v39 = vadd.f32 %v4414_v6, %v4408_v16  ;;  %v953_v16 = vadd.f32 %v4398_v29, %v4392_v23  ;;  %v1102_v6 = vadd.f32 %v4438_v40, %v956_v62  ;;  %v1515_v29 = vadd.f32 %v4650_v53, %v1378_v25 }
 0x65f   :  { %v1517_v40 = vadd.f32 %v4654_v55, %v1380_v21 }
 0x660   :  { %v1103_v31 = vadd.f32 %v4441_v42, %v959_v39  ;;  %v950_v42 = vadd.f32 %v4390_v28, %v4384_v26  ;;  %v1101_v24 = vadd.f32 %v4435_v38, %v953_v16  ;;  %v1239_v27 = vadd.f32 %v4532_v17, %v1102_v6  ;;  %v2235_v26 = vld [vmem:[%s5983_s8 + $0x240] sm:$0xff] }
 0x661   :  { %v1652_v38 = vadd.f32 %v4683_v8, %v1515_v29  ;;  %v1654_v17 = vadd.f32 %v4689_v60, %v1517_v40  ;;  %2275 = vmatpush.msrb.mxu0 %v2235_v26  ;;  %v2038_v40 = vld [vmem:[%s5983_s8 + $0x150] sm:$0xff]  ;;  %v2028_v26 = vld [vmem:[%s5983_s8 + $0x100] sm:$0xff] }
 0x662   :  { %v1240_v52 = vadd.f32 %v4538_v20, %v1103_v31  ;;  %v1653_v20 = vadd.f32 %v4686_v15, %v1516_v19  ;;  %v1100_v44 = vadd.f32 %v4432_v36, %v950_v42  ;;  %v1238_v46 = vadd.f32 %v4526_v14, %v1101_v24  ;;  %v2050_v31 = vld [vmem:[%s5983_s8 + $0x1b0] sm:$0xff]  ;;  %v2231_v42 = vld [vmem:[%s5983_s8 + $0x220] sm:$0xff] }
 0x663   :  { %v1376_v50 = vadd.f32 %v4552_v37, %v1239_v27  ;;  %v1789_v55 = vadd.f32 %v1776_v49, %v1652_v38  ;;  %v1791_v15 = vadd.f32 %v1782_v54, %v1654_v17  ;;  %v2042_v19 = vld [vmem:[%s5983_s8 + $0x170] sm:$0xff]  ;;  %v2036_v24 = vld [vmem:[%s5983_s8 + $0x140] sm:$0xff]  ;;  %2276 = vmatpush.msrb.mxu0 %v2231_v42  ;;  %v2252_v42 = vld [vmem:[%s5983_s8 + $0x2c8] sm:$0xff] }
 0x664   :  { %v1377_v23 = vadd.f32 %v4555_v41, %v1240_v52  ;;  %v1790_v41 = vadd.f32 %v1779_v4, %v1653_v20  ;;  %v1237_v53 = vadd.f32 %v4520_v12, %v1100_v44  ;;  %v1375_v36 = vadd.f32 %v4549_v30, %v1238_v46  ;;  %v2040_v52 = vld [vmem:[%s5983_s8 + $0x160] sm:$0xff]  ;;  %v2030_v17 = vld [vmem:[%s5983_s8 + $0x110] sm:$0xff] }
 0x665   :  { %v4718_v47 = vpop.f32.mrf.mxu1  ;;  %v1513_v14 = vadd.f32 %v4626_v18, %v1376_v50  ;;  %v5995_v32 = vld [vmem:[#allocation16_spill] sm:$0xff]  ;;  %v2034_v50 = vld [vmem:[%s5983_s8 + $0x130] sm:$0xff] }
 0x666   :  { %v1514_v28 = vadd.f32 %v4641_v45, %v1377_v23  ;;  %v1374_v11 = vadd.f32 %v4546_v22, %v1237_v53  ;;  %v1512_v45 = vadd.f32 %v4620_v13, %v1375_v36  ;;  %v2056_v13 = vld [vmem:[%s5983_s8 + $0x1e0] sm:$0xff]  ;;  %v2057_v53 = vld [vmem:[%s5983_s8 + $0x1e8] sm:$0xff] }
 0x667   :  { %v1650_v60 = vadd.f32 %v4665_v3, %v1513_v14  ;;  %v2058_v3 = vld [vmem:[%s5983_s8 + $0x1f0] sm:$0xff]  ;;  %2071 = vmatpush.msrb.mxu3 %v2056_v13  ;;  %v2227_v27 = vld [vmem:[%s5983_s8 + $0x200] sm:$0xff]  ;;  %v2024_v36 = vld [vmem:[%s5983_s8 + $0xe8] sm:$0xff] }
 0x668   :  { %v1651_v37 = vadd.f32 %v4677_v2, %v1514_v28  ;;  %v1511_v30 = vadd.f32 %v4614_v10, %v1374_v11  ;;  %v1649_v18 = vadd.f32 %v4659_v58, %v1512_v45  ;;  %2111 = vmatpush.msra.mxu1 %v2058_v3  ;;  %v2375_v20 = vld [vmem:[%s5983_s8 + $0x3e0] sm:$0xff]  ;;  %2277 = vmatpush.msrb.mxu0 %v2227_v27  ;;  %v2049_v11 = vld [vmem:[%s5983_s8 + $0x1a8] sm:$0xff] }
 0x669   :  { %v1787_v2 = vadd.f32 %v4714_v9, %v1650_v60  ;;  %v2054_v9 = vld [vmem:[%s5983_s8 + $0x1d0] sm:$0xff]  ;;  %v2032_v44 = vld [vmem:[%s5983_s8 + $0x120] sm:$0xff]  ;;  %v2016_v45 = vld [vmem:[%s5983_s8 + $0xa8] sm:$0xff] }
 0x66a   :  { %v1788_v39 = vadd.f32 %v1773_v43, %v1651_v37  ;;  %v1648_v22 = vadd.f32 %v4656_v56, %v1511_v30  ;;  %v1786_v43 = vadd.f32 %v4707_v5, %v1649_v18  ;;  %v2052_v56 = vld [vmem:[%s5983_s8 + $0x1c0] sm:$0xff]  ;;  %2112 = vmatpush.msra.mxu1 %v2054_v9  ;;  %2390 = vmatpush.msra.mxu0 %v2375_v20  ;;  %v2055_v37 = vld [vmem:[%s5983_s8 + $0x1d8] sm:$0xff]  ;;  %v1948_v60 = vld [vmem:[%s5982_s7 + $0x8] sm:$0xff] }
 0x66b   :  { %v1924_v10 = vadd.f32 %v4718_v47, %v1787_v2  ;;  %2072 = vmatpush.msrb.mxu3 %v2052_v56  ;;  %v2371_v54 = vld [vmem:[%s5983_s8 + $0x3c0] sm:$0xff]  ;;  %v1949_v30 = vld [vmem:[%s5982_s7 + $0x10] sm:$0x3]  ;;  %v2041_v3 = vld [vmem:[%s5983_s8 + $0x168] sm:$0xff] }
 0x66c   :  { %v1785_v5 = vadd.f32 %v5994_v7, %v1648_v22  ;;  %v1923_v47 = vadd.f32 %v5995_v32, %v1786_v43  ;;  %2113 = vmatpush.msra.mxu1 %v2050_v31  ;;  %v1947_v38 = vld [vmem:[%s5982_s7] sm:$0xff]  ;;  %2391 = vmatpush.msra.mxu0 %v2371_v54  ;;  %v2025_v18 = vld [vmem:[%s5983_s8 + $0xf0] sm:$0xff]  ;;  %v2008_v43 = vld [vmem:[%s5983_s8 + $0x68] sm:$0xff] }
 0x66d   :  { %v1910_v57 = vpop.f32.mrf.mxu1  ;;  %v1935_v16 = vadd.f32 %v3598_v1, %v1924_v10  ;;  %v2367_v14 = vld [vmem:[%s5983_s8 + $0x3a0] sm:$0xff]  ;;  %v2021_v2 = vld [vmem:[%s5983_s8 + $0xd0] sm:$0xff]  ;;  %v2004_v56 = vld [vmem:[%s5983_s8 + $0x48] sm:$0xff] }
 0x66e   :  { %v1925_v49 = vadd.f32 %v1910_v57, %v1788_v39  ;;  %v2048_v57 = vld [vmem:[%s5983_s8 + $0x1a0] sm:$0xff]  ;;  %v1922_v51 = vadd.f32 %v5996_v35, %v1785_v5  ;;  %v1934_v25 = vadd.f32 %v3598_v1, %v1923_v47  ;;  %2392 = vmatpush.msra.mxu0 %v2367_v14  ;;  %v2043_v39 = vld [vmem:[%s5983_s8 + $0x178] sm:$0xff]  ;;  %v2013_v22 = vld [vmem:[%s5983_s8 + $0x90] sm:$0xff] }
 0x66f   :  { %2073 = vmatpush.msrb.mxu3 %v2048_v57  ;;  %v1942_v29 = vmax.f32 %v1935_v16, 0.0  ;;  %v2363_v13 = vld [vmem:[%s5983_s8 + $0x380] sm:$0xff]  ;;  %v2009_v10 = vld [vmem:[%s5983_s8 + $0x70] sm:$0xff]  ;;  %v2033_v7 = vld [vmem:[%s5983_s8 + $0x128] sm:$0xff] }
 0x670   :  { %v1936_v33 = vadd.f32 %v3598_v1, %v1925_v49  ;;  %v1933_v23 = vadd.f32 %v3598_v1, %v1922_v51  ;;  %v1941_v46 = vmax.f32 %v1934_v25, 0.0  ;;  %v2017_v49 = vld [vmem:[%s5983_s8 + $0xb0] sm:$0xff]  ;;  %2393 = vmatpush.msra.mxu0 %v2363_v13  ;;  %v2355_v57 = vld [vmem:[%s5983_s8 + $0x340] sm:$0xff]  ;;  %v2000_v5 = vld [vmem:[%s5983_s8 + $0x28] sm:$0xff] }
 0x671   :  { %2074 = vmatpush.msrb.mxu3 %v2044_v34  ;;  %v2005_v9 = vld [vmem:[%s5983_s8 + $0x50] sm:$0xff]  ;;  %v2351_v47 = vld [vmem:[%s5983_s8 + $0x320] sm:$0xff]  ;;  %v2368_v13 = vld [vmem:[%s5983_s8 + $0x3a8] sm:$0xff] }
 0x672   :  { %v1943_v21 = vmax.f32 %v1936_v33, 0.0  ;;  %v1940_v28 = vmax.f32 %v1933_v23, 0.0  ;;  %v2001_v32 = vld [vmem:[%s5983_s8 + $0x30] sm:$0xff]  ;;  %v2029_v33 = vld [vmem:[%s5983_s8 + $0x108] sm:$0xff]  ;;  %v2347_v34 = vld [vmem:[%s5983_s8 + $0x300] sm:$0xff] }
 0x673   :  { %2075 = vmatpush.msrb.mxu3 %v2040_v52  ;;  %v1997_v31 = vld [vmem:[%s5983_s8 + $0x10] sm:$0xff]  ;;  %v2023_v51 = vld [vmem:[%s5983_s8 + $0xe0] sm:$0xff] }
 0x674   :  { %v2257_v25 = vld [vmem:[%s5983_s8 + $0x2f0] sm:$0xff]  ;;  %v2491_v27 = vld [vmem:[%s5983_s8 + $0x4c0] sm:$0xff] }
 0x675   :  { %v1913_v59 = vpop.f32.mrf.mxu1  ;;  %2076 = vmatpush.msrb.mxu3 %v2036_v24  ;;  %v2253_v24 = vld [vmem:[%s5983_s8 + $0x2d0] sm:$0xff]  ;;  %v2015_v23 = vld [vmem:[%s5983_s8 + $0xa0] sm:$0xff] }
 0x676   :  { %v1926_v4 = vadd.f32 %v1913_v59, %v1789_v55  ;;  %v2053_v55 = vld [vmem:[%s5983_s8 + $0x1c8] sm:$0xff]  ;;  %v2487_v20 = vld [vmem:[%s5983_s8 + $0x4a0] sm:$0xff] }
 0x677   :  { %2077 = vmatpush.msrb.mxu3 %v2032_v44  ;;  %v2011_v44 = vld [vmem:[%s5983_s8 + $0x80] sm:$0xff] }
 0x678   :  { %v1937_v58 = vadd.f32 %v3598_v1, %v1926_v4  ;;  %v2035_v4 = vld [vmem:[%s5983_s8 + $0x138] sm:$0xff]  ;;  %v2483_v54 = vld [vmem:[%s5983_s8 + $0x480] sm:$0xff] }
 0x679   :  { %2078 = vmatpush.msrb.mxu3 %v2028_v26  ;;  %v2007_v26 = vld [vmem:[%s5983_s8 + $0x60] sm:$0xff] }
 0x67a   :  { %v1944_v6 = vmax.f32 %v1937_v58, 0.0  ;;  %v2359_v58 = vld [vmem:[%s5983_s8 + $0x360] sm:$0xff] }
 0x67b   :  { %2091 = vmatpush.msra.mxu3 %v2057_v53  ;;  %2394 = vmatpush.msra.mxu0 %v2359_v58  ;;  %v2479_v53 = vld [vmem:[%s5983_s8 + $0x460] sm:$0xff]  ;;  %v2364_v58 = vld [vmem:[%s5983_s8 + $0x388] sm:$0xff] }
 0x67d   :  { %v1916_v48 = vpop.f32.mrf.mxu1  ;;  %2092 = vmatpush.msra.mxu3 %v2053_v55  ;;  %2395 = vmatpush.msra.mxu0 %v2355_v57  ;;  %v1999_v55 = vld [vmem:[%s5983_s8 + $0x20] sm:$0xff] }
 0x67e   :  { %v1927_v0 = vadd.f32 %v1916_v48, %v1790_v41  ;;  %v2046_v48 = vld [vmem:[%s5983_s8 + $0x190] sm:$0xff]  ;;  %v2059_v41 = vld [vmem:[%s5983_s8 + $0x1f8] sm:$0xff] }
 0x67f   :  { %2114 = vmatpush.msra.mxu1 %v2046_v48  ;;  %2093 = vmatpush.msra.mxu3 %v2049_v11  ;;  %v2256_v48 = vld [vmem:[%s5983_s8 + $0x2e8] sm:$0xff]  ;;  %v2233_v11 = vld [vmem:[%s5983_s8 + $0x230] sm:$0xff] }
 0x680   :  { %v1938_v61 = vadd.f32 %v3598_v1, %v1927_v0  ;;  %v2051_v0 = vld [vmem:[%s5983_s8 + $0x1b8] sm:$0xff]  ;;  %2396 = vmatpush.msra.mxu0 %v2351_v47 }
 0x681   :  { %2115 = vmatpush.msra.mxu1 %v2042_v19  ;;  %v2019_v19 = vld [vmem:[%s5983_s8 + $0xc0] sm:$0xff]  ;;  %v2006_v47 = vld [vmem:[%s5983_s8 + $0x58] sm:$0xff] }
 0x682   :  { %v1945_v62 = vmax.f32 %v1938_v61, 0.0  ;;  %v2045_v61 = vld [vmem:[%s5983_s8 + $0x188] sm:$0xff]  ;;  %2397 = vmatpush.msra.mxu0 %v2347_v34  ;;  %v2002_v34 = vld [vmem:[%s5983_s8 + $0x38] sm:$0xff] }
 0x683   :  { %2116 = vmatpush.msra.mxu1 %v2038_v40  ;;  %2094 = vmatpush.msra.mxu3 %v2045_v61  ;;  %v2249_v40 = vld [vmem:[%s5983_s8 + $0x2b0] sm:$0xff] }
 0x684   :  { %v2373_v61 = vld [vmem:[%s5983_s8 + $0x3d0] sm:$0xff] }
 0x685   :  { %v1919_v8 = vpop.f32.mrf.mxu1  ;;  %2117 = vmatpush.msra.mxu1 %v2034_v50  ;;  %2095 = vmatpush.msra.mxu3 %v2041_v3  ;;  %v2245_v50 = vld [vmem:[%s5983_s8 + $0x290] sm:$0xff] }
 0x686   :  { %v1928_v12 = vadd.f32 %v1919_v8, %v1791_v15  ;;  %v2020_v15 = vld [vmem:[%s5983_s8 + $0xc8] sm:$0xff]  ;;  %v2047_v8 = vld [vmem:[%s5983_s8 + $0x198] sm:$0xff]  ;;  %v2369_v3 = vld [vmem:[%s5983_s8 + $0x3b0] sm:$0xff] }
 0x687   :  { %2118 = vmatpush.msra.mxu1 %v2030_v17  ;;  %v2241_v17 = vld [vmem:[%s5983_s8 + $0x270] sm:$0xff] }
 0x688   :  { %v1939_v63 = vadd.f32 %v3598_v1, %v1928_v12  ;;  %v2039_v1 = vld [vmem:[%s5983_s8 + $0x158] sm:$0xff] }
 0x689   :  { %2174 = vmatpush.msrb.mxu1 %v2024_v36  ;;  %v2031_v12 = vld [vmem:[%s5983_s8 + $0x118] sm:$0xff]  ;;  %v2236_v36 = vld [vmem:[%s5983_s8 + $0x248] sm:$0xff] }
 0x68a   :  { %v1946_v59 = vmax.f32 %v1939_v63, 0.0  ;;  %v2012_v63 = vld [vmem:[%s5983_s8 + $0x88] sm:$0xff] }
 0x68b   :  { %2175 = vmatpush.msrb.mxu1 %v2020_v15  ;;  %v2475_v15 = vld [vmem:[%s5983_s8 + $0x440] sm:$0xff] }
 0x68c   :  { %3546 = vmatpush.msk.msrb.mxu2 %vm734_vm3, %v1946_v59  ;;  %v2037_v59 = vld [vmem:[%s5983_s8 + $0x148] sm:$0xff] }
 0x68d   :  { %2176 = vmatpush.msrb.mxu1 %v2016_v45  ;;  %2096 = vmatpush.msra.mxu3 %v2037_v59  ;;  %v1995_v45 = vld [vmem:[%s5983_s8] sm:$0xff]  ;;  %v2365_v59 = vld [vmem:[%s5983_s8 + $0x390] sm:$0xff] }
 0x68e   :  { %1973 = vmatpush.msrb.mxu2 %v1945_v62  ;;  %v1996_v62 = vld [vmem:[%s5983_s8 + $0x8] sm:$0xff] }
 0x68f   :  { %2177 = vmatpush.msrb.mxu1 %v2012_v63  ;;  %2097 = vmatpush.msra.mxu3 %v2033_v7  ;;  %v2611_v63 = vld [vmem:[%s5983_s8 + $0x5c0] sm:$0xff]  ;;  %v2360_v7 = vld [vmem:[%s5983_s8 + $0x368] sm:$0xff] }
 0x690   :  { %1974 = vmatpush.msrb.mxu2 %v1944_v6 }
 0x691   :  { %2178 = vmatpush.msrb.mxu1 %v2008_v43  ;;  %2098 = vmatpush.msra.mxu3 %v2029_v33  ;;  %v2607_v43 = vld [vmem:[%s5983_s8 + $0x5a0] sm:$0xff]  ;;  %v2356_v33 = vld [vmem:[%s5983_s8 + $0x348] sm:$0xff] }
 0x692   :  { %1975 = vmatpush.msrb.mxu2 %v1943_v21  ;;  %v2495_v21 = vld [vmem:[%s5983_s8 + $0x4e0] sm:$0xff] }
 0x693   :  { %2179 = vmatpush.msrb.mxu1 %v2004_v56  ;;  %v2603_v56 = vld [vmem:[%s5983_s8 + $0x580] sm:$0xff] }
 0x694   :  { %1976 = vmatpush.msrb.mxu2 %v1942_v29  ;;  %v2248_v29 = vld [vmem:[%s5983_s8 + $0x2a8] sm:$0xff] }
 0x695   :  { %2180 = vmatpush.msrb.mxu1 %v2000_v5  ;;  %v2361_v5 = vld [vmem:[%s5983_s8 + $0x370] sm:$0xff] }
 0x696   :  { %1977 = vmatpush.msrb.mxu2 %v1941_v46  ;;  %v2244_v46 = vld [vmem:[%s5983_s8 + $0x288] sm:$0xff] }
 0x697   :  { %2181 = vmatpush.msrb.mxu1 %v1996_v62  ;;  %v2357_v62 = vld [vmem:[%s5983_s8 + $0x350] sm:$0xff] }
 0x698   :  { %1978 = vmatpush.msrb.mxu2 %v1940_v28 }
 0x699   :  { %3547 = vmatmul.msk.f32.vlgmr.msrb.gmra.mxu2 %vm1950_vm6, %v1947_v38  ;;  %v2240_v38 = vld [vmem:[%s5983_s8 + $0x268] sm:$0xff] }
 0x69a   :  { %2131 = vmatpush.msra.mxu2 %v2059_v41  ;;  %v2003_v41 = vld [vmem:[%s5983_s8 + $0x40] sm:$0xff] }
 0x69c   :  { %2132 = vmatpush.msra.mxu2 %v2055_v37  ;;  %v2237_v37 = vld [vmem:[%s5983_s8 + $0x250] sm:$0xff] }
 0x69e   :  { %2133 = vmatpush.msra.mxu2 %v2051_v0  ;;  %v2232_v0 = vld [vmem:[%s5983_s8 + $0x228] sm:$0xff] }
 0x6a0   :  { %2134 = vmatpush.msra.mxu2 %v2047_v8  ;;  %v2471_v8 = vld [vmem:[%s5983_s8 + $0x420] sm:$0xff] }
 0x6a1   :  { %3548 = vmatmul.msk.f32.gmra.mxu2 %vm1950_vm6, %v1948_v60  ;;  %v2228_v60 = vld [vmem:[%s5983_s8 + $0x208] sm:$0xff] }
 0x6a2   :  { %2135 = vmatpush.msra.mxu2 %v2043_v39  ;;  %v2229_v39 = vld [vmem:[%s5983_s8 + $0x210] sm:$0xff] }
 0x6a4   :  { %2136 = vmatpush.msra.mxu2 %v2039_v1  ;;  %v2026_v1 = vld [vmem:[%s5983_s8 + $0xf8] sm:$0xff] }
 0x6a6   :  { %2137 = vmatpush.msra.mxu2 %v2035_v4  ;;  %v2467_v4 = vld [vmem:[%s5983_s8 + $0x400] sm:$0xff] }
 0x6a8   :  { %2138 = vmatpush.msra.mxu2 %v2031_v12  ;;  %v2376_v12 = vld [vmem:[%s5983_s8 + $0x3e8] sm:$0xff] }
 0x6a9   :  { %3549 = vmatmul.msk.f32.gmra.mxu2 %vm1950_vm6, %v1949_v30  ;;  %v2377_v30 = vld [vmem:[%s5983_s8 + $0x3f0] sm:$0xff] }
 0x6aa   :  { %2194 = vmatpush.msrb.mxu2 %v2025_v18  ;;  %v2615_v18 = vld [vmem:[%s5983_s8 + $0x5e0] sm:$0xff] }
 0x6ac   :  { %2195 = vmatpush.msrb.mxu2 %v2021_v2  ;;  %v2022_v2 = vld [vmem:[%s5983_s8 + $0xd8] sm:$0xff] }
 0x6ae   :  { %2196 = vmatpush.msrb.mxu2 %v2017_v49  ;;  %v2372_v49 = vld [vmem:[%s5983_s8 + $0x3c8] sm:$0xff] }
 0x6b0   :  { %2197 = vmatpush.msrb.mxu2 %v2013_v22  ;;  %v2018_v22 = vld [vmem:[%s5983_s8 + $0xb8] sm:$0xff] }
 0x6b2   :  { %2198 = vmatpush.msrb.mxu2 %v2009_v10  ;;  %v2014_v10 = vld [vmem:[%s5983_s8 + $0x98] sm:$0xff] }
 0x6b4   :  { %2199 = vmatpush.msrb.mxu2 %v2005_v9  ;;  %v2010_v9 = vld [vmem:[%s5983_s8 + $0x78] sm:$0xff] }
 0x6b6   :  { %2200 = vmatpush.msrb.mxu2 %v2001_v32  ;;  %v2599_v32 = vld [vmem:[%s5983_s8 + $0x560] sm:$0xff] }
 0x6b8   :  { %2201 = vmatpush.msrb.mxu2 %v1997_v31  ;;  %v2595_v31 = vld [vmem:[%s5983_s8 + $0x540] sm:$0xff] }
 0x71c   :  { %v1980_v35 = vpop.f32.mrf.mxu2 }
 0x71d   :  { %1990 = vst.msk [vmem:[#allocation2] sm:$0xff] %vm1989_vm7, %v1980_v35  ;;  %v2352_v35 = vld [vmem:[%s5983_s8 + $0x328] sm:$0xff] }
 0x724   :  { %v2027_v16 = vld [vmem:[#allocation2 + $0x2] sm:$0x3]  ;;  %v4972_v6 = vld [vmem:[#allocation2 + $0x4] sm:$0x3]  ;;  %v1983_v52 = vpop.f32.mrf.mxu2  ;;  %v5028_v28 = vld [vmem:[#allocation2] sm:$0x3] }
 0x725   :  { %3550 = vmatmul.msk.f32.vlgmr.msrb.gmra.mxu3 %vm1989_vm7, %v2027_v16  ;;  %3552 = vmatmul.msk.f32.vlgmr.msra.gmra.mxu1 %vm1989_vm7, %v2027_v16  ;;  %1991 = vst.msk [vmem:[#allocation2 + $0x8] sm:$0xff] %vm1989_vm7, %v1983_v52  ;;  %v5050_v14 = vld [vmem:[#allocation2 + $0x6] sm:$0x3]  ;;  %v2348_v52 = vld [vmem:[%s5983_s8 + $0x308] sm:$0xff] }
 0x726   :  { %3553 = vmatmul.msk.f32.vlgmr.msra.gmra.mxu2 %vm1989_vm7, %v2027_v16  ;;  %2154 = vmatpush.msrb.mxu3 %v2023_v51  ;;  %v2353_v51 = vld [vmem:[%s5983_s8 + $0x330] sm:$0xff] }
 0x727   :  { %3558 = vmatmul.msk.f32.vlgmr.msrb.gmra.mxu0 %vm1989_vm7, %v4972_v6  ;;  %2290 = vmatpush.msra.mxu1 %v2256_v48  ;;  %v1998_v48 = vld [vmem:[%s5983_s8 + $0x18] sm:$0xff] }
 0x728   :  { %2310 = vmatpush.msra.mxu2 %v2257_v25  ;;  %2510 = vmatpush.msrb.mxu0 %v2495_v21  ;;  %v2349_v25 = vld [vmem:[%s5983_s8 + $0x310] sm:$0xff]  ;;  %v2587_v21 = vld [vmem:[%s5983_s8 + $0x500] sm:$0xff] }
 0x729   :  { %2155 = vmatpush.msrb.mxu3 %v2019_v19  ;;  %2291 = vmatpush.msra.mxu1 %v2252_v42  ;;  %v2258_v19 = vld [vmem:[%s5983_s8 + $0x2f8] sm:$0xff]  ;;  %v2496_v42 = vld [vmem:[%s5983_s8 + $0x4e8] sm:$0xff] }
 0x72a   :  { %2311 = vmatpush.msra.mxu2 %v2253_v24  ;;  %2511 = vmatpush.msrb.mxu0 %v2491_v27  ;;  %v2497_v24 = vld [vmem:[%s5983_s8 + $0x4f0] sm:$0xff] }
 0x72b   :  { %2156 = vmatpush.msrb.mxu3 %v2015_v23  ;;  %2292 = vmatpush.msra.mxu1 %v2248_v29  ;;  %v2254_v23 = vld [vmem:[%s5983_s8 + $0x2d8] sm:$0xff]  ;;  %v2735_v29 = vld [vmem:[%s5983_s8 + $0x6e0] sm:$0xff] }
 0x72c   :  { %2312 = vmatpush.msra.mxu2 %v2249_v40  ;;  %2512 = vmatpush.msrb.mxu0 %v2487_v20  ;;  %v5141_v57 = vld [vmem:[#allocation2 + $0x8] sm:$0x3]  ;;  %v5203_v27 = vld [vmem:[#allocation2 + $0xa] sm:$0x3]  ;;  %v2493_v20 = vld [vmem:[%s5983_s8 + $0x4d0] sm:$0xff] }
 0x72d   :  { %2157 = vmatpush.msrb.mxu3 %v2011_v44  ;;  %2293 = vmatpush.msra.mxu1 %v2244_v46  ;;  %v2492_v40 = vld [vmem:[%s5983_s8 + $0x4c8] sm:$0xff]  ;;  %v2250_v44 = vld [vmem:[%s5983_s8 + $0x2b8] sm:$0xff]  ;;  %v2731_v46 = vld [vmem:[%s5983_s8 + $0x6c0] sm:$0xff] }
 0x72e   :  { %2313 = vmatpush.msra.mxu2 %v2245_v50  ;;  %2513 = vmatpush.msrb.mxu0 %v2483_v54  ;;  %v2488_v50 = vld [vmem:[%s5983_s8 + $0x4a8] sm:$0xff]  ;;  %v2489_v54 = vld [vmem:[%s5983_s8 + $0x4b0] sm:$0xff] }
 0x72f   :  { %3551 = vmatmul.msk.f32.vlgmr.msra.gmra.mxu3 %vm1989_vm7, %v2027_v16  ;;  %3555 = vmatmul.msk.f32.vlgmr.msrb.gmra.mxu1 %vm1989_vm7, %v5028_v28  ;;  %v2591_v16 = vld [vmem:[%s5983_s8 + $0x520] sm:$0xff] }
 0x730   :  { %2158 = vmatpush.msrb.mxu3 %v2007_v26  ;;  %3556 = vmatmul.msk.f32.vlgmr.msrb.gmra.mxu2 %vm1989_vm7, %v5028_v28  ;;  %v2246_v26 = vld [vmem:[%s5983_s8 + $0x298] sm:$0xff] }
 0x731   :  { %2294 = vmatpush.msra.mxu1 %v2240_v38  ;;  %2314 = vmatpush.msra.mxu2 %v2241_v17  ;;  %v2484_v38 = vld [vmem:[%s5983_s8 + $0x488] sm:$0xff]  ;;  %v2485_v17 = vld [vmem:[%s5983_s8 + $0x490] sm:$0xff] }
 0x732   :  { %3562 = vmatmul.msk.f32.vlgmr.msra.gmra.mxu0 %vm1989_vm7, %v5050_v14  ;;  %2159 = vmatpush.msrb.mxu3 %v2003_v41  ;;  %v2242_v41 = vld [vmem:[%s5983_s8 + $0x278] sm:$0xff] }
 0x733   :  { %2514 = vmatpush.msrb.mxu0 %v2479_v53  ;;  %2295 = vmatpush.msra.mxu1 %v2236_v36  ;;  %v2723_v53 = vld [vmem:[%s5983_s8 + $0x680] sm:$0xff]  ;;  %v2480_v36 = vld [vmem:[%s5983_s8 + $0x468] sm:$0xff] }
 0x734   :  { %2315 = vmatpush.msra.mxu2 %v2237_v37  ;;  %2160 = vmatpush.msrb.mxu3 %v1999_v55  ;;  %v2481_v37 = vld [vmem:[%s5983_s8 + $0x470] sm:$0xff]  ;;  %v2238_v55 = vld [vmem:[%s5983_s8 + $0x258] sm:$0xff] }
 0x735   :  { %2515 = vmatpush.msrb.mxu0 %v2475_v15  ;;  %2296 = vmatpush.msra.mxu1 %v2232_v0  ;;  %v2719_v15 = vld [vmem:[%s5983_s8 + $0x660] sm:$0xff]  ;;  %v2476_v0 = vld [vmem:[%s5983_s8 + $0x448] sm:$0xff] }
 0x736   :  { %2316 = vmatpush.msra.mxu2 %v2233_v11  ;;  %2161 = vmatpush.msrb.mxu3 %v1995_v45  ;;  %v2477_v11 = vld [vmem:[%s5983_s8 + $0x450] sm:$0xff]  ;;  %v2234_v45 = vld [vmem:[%s5983_s8 + $0x238] sm:$0xff] }
 0x737   :  { %2516 = vmatpush.msrb.mxu0 %v2471_v8  ;;  %2297 = vmatpush.msra.mxu1 %v2228_v60  ;;  %v2715_v8 = vld [vmem:[%s5983_s8 + $0x640] sm:$0xff]  ;;  %v2472_v60 = vld [vmem:[%s5983_s8 + $0x428] sm:$0xff] }
 0x738   :  { %2317 = vmatpush.msra.mxu2 %v2229_v39  ;;  %2214 = vmatpush.msra.mxu3 %v2026_v1  ;;  %v2473_v39 = vld [vmem:[%s5983_s8 + $0x430] sm:$0xff]  ;;  %v2230_v1 = vld [vmem:[%s5983_s8 + $0x218] sm:$0xff] }
 0x739   :  { %2517 = vmatpush.msrb.mxu0 %v2467_v4  ;;  %2410 = vmatpush.msrb.mxu1 %v2376_v12  ;;  %v1986_v4 = vpop.f32.mrf.mxu2  ;;  %v2711_v12 = vld [vmem:[%s5983_s8 + $0x620] sm:$0xff] }
 0x73a   :  { %2430 = vmatpush.msrb.mxu2 %v2377_v30  ;;  %3554 = vmatmul.msk.f32.vlgmr.msrb.gmra.mxu3 %vm1989_vm7, %v5028_v28  ;;  %v2468_v30 = vld [vmem:[%s5983_s8 + $0x408] sm:$0xff]  ;;  %1993 = vst.msk [vmem:[#allocation2 + $0x10] sm:$0x3] %vm1992_vm8, %v1986_v4  ;;  %v2474_v4 = vld [vmem:[%s5983_s8 + $0x438] sm:$0xff] }
 0x73b   :  { %2630 = vmatpush.msra.mxu0 %v2615_v18  ;;  %3559 = vmatmul.msk.f32.vlgmr.msra.gmra.mxu1 %vm1989_vm7, %v4972_v6  ;;  %v2469_v18 = vld [vmem:[%s5983_s8 + $0x410] sm:$0xff] }
 0x73c   :  { %3560 = vmatmul.msk.f32.vlgmr.msra.gmra.mxu2 %vm1989_vm7, %v4972_v6  ;;  %2215 = vmatpush.msra.mxu3 %v2022_v2  ;;  %v2707_v2 = vld [vmem:[%s5983_s8 + $0x600] sm:$0xff] }
 0x73d   :  { %2411 = vmatpush.msrb.mxu1 %v2372_v49  ;;  %2431 = vmatpush.msrb.mxu2 %v2373_v61  ;;  %v2378_v49 = vld [vmem:[%s5983_s8 + $0x3f8] sm:$0xff]  ;;  %v2616_v61 = vld [vmem:[%s5983_s8 + $0x5e8] sm:$0xff] }
 0x73e   :  { %2631 = vmatpush.msra.mxu0 %v2611_v63  ;;  %2216 = vmatpush.msra.mxu3 %v2018_v22  ;;  %v2617_v63 = vld [vmem:[%s5983_s8 + $0x5f0] sm:$0xff]  ;;  %v5307_v22 = vld [vmem:[#allocation2 + $0xc] sm:$0x3] }
 0x73f   :  { %2412 = vmatpush.msrb.mxu1 %v2368_v13  ;;  %2432 = vmatpush.msrb.mxu2 %v2369_v3  ;;  %v2374_v13 = vld [vmem:[%s5983_s8 + $0x3d8] sm:$0xff]  ;;  %v2612_v3 = vld [vmem:[%s5983_s8 + $0x5c8] sm:$0xff] }
 0x740   :  { %2632 = vmatpush.msra.mxu0 %v2607_v43  ;;  %2217 = vmatpush.msra.mxu3 %v2014_v10  ;;  %v2613_v43 = vld [vmem:[%s5983_s8 + $0x5d0] sm:$0xff]  ;;  %v2370_v10 = vld [vmem:[%s5983_s8 + $0x3b8] sm:$0xff] }
 0x741   :  { %2413 = vmatpush.msrb.mxu1 %v2364_v58  ;;  %2433 = vmatpush.msrb.mxu2 %v2365_v59  ;;  %v2851_v58 = vld [vmem:[%s5983_s8 + $0x7c0] sm:$0xff]  ;;  %v2608_v59 = vld [vmem:[%s5983_s8 + $0x5a8] sm:$0xff] }
 0x742   :  { %2633 = vmatpush.msra.mxu0 %v2603_v56  ;;  %2218 = vmatpush.msra.mxu3 %v2010_v9  ;;  %v2609_v56 = vld [vmem:[%s5983_s8 + $0x5b0] sm:$0xff]  ;;  %v2366_v9 = vld [vmem:[%s5983_s8 + $0x398] sm:$0xff] }
 0x743   :  { %3566 = vmatmul.msk.f32.vlgmr.msrb.gmra.mxu0 %vm1989_vm7, %v5141_v57  ;;  %2414 = vmatpush.msrb.mxu1 %v2360_v7  ;;  %v2847_v7 = vld [vmem:[%s5983_s8 + $0x7a0] sm:$0xff] }
 0x744   :  { %2434 = vmatpush.msrb.mxu2 %v2361_v5  ;;  %2634 = vmatpush.msra.mxu0 %v2599_v32  ;;  %v2604_v5 = vld [vmem:[%s5983_s8 + $0x588] sm:$0xff]  ;;  %v2605_v32 = vld [vmem:[%s5983_s8 + $0x590] sm:$0xff] }
 0x745   :  { %2219 = vmatpush.msra.mxu3 %v2006_v47  ;;  %2415 = vmatpush.msrb.mxu1 %v2356_v33  ;;  %v2362_v47 = vld [vmem:[%s5983_s8 + $0x378] sm:$0xff]  ;;  %v2843_v33 = vld [vmem:[%s5983_s8 + $0x780] sm:$0xff] }
 0x746   :  { %2435 = vmatpush.msrb.mxu2 %v2357_v62  ;;  %2635 = vmatpush.msra.mxu0 %v2595_v31  ;;  %v2600_v62 = vld [vmem:[%s5983_s8 + $0x568] sm:$0xff]  ;;  %v2601_v31 = vld [vmem:[%s5983_s8 + $0x570] sm:$0xff] }
 0x747   :  { %2220 = vmatpush.msra.mxu3 %v2002_v34  ;;  %2416 = vmatpush.msrb.mxu1 %v2352_v35  ;;  %v2358_v34 = vld [vmem:[%s5983_s8 + $0x358] sm:$0xff]  ;;  %v2839_v35 = vld [vmem:[%s5983_s8 + $0x760] sm:$0xff] }
 0x748   :  { %2436 = vmatpush.msrb.mxu2 %v2353_v51  ;;  %2636 = vmatpush.msra.mxu0 %v2591_v16  ;;  %v2596_v51 = vld [vmem:[%s5983_s8 + $0x548] sm:$0xff]  ;;  %v2597_v16 = vld [vmem:[%s5983_s8 + $0x550] sm:$0xff] }
 0x749   :  { %2221 = vmatpush.msra.mxu3 %v1998_v48  ;;  %2417 = vmatpush.msrb.mxu1 %v2348_v52  ;;  %v2354_v48 = vld [vmem:[%s5983_s8 + $0x338] sm:$0xff]  ;;  %v2835_v52 = vld [vmem:[%s5983_s8 + $0x740] sm:$0xff] }
 0x74a   :  { %2437 = vmatpush.msrb.mxu2 %v2349_v25  ;;  %2637 = vmatpush.msra.mxu0 %v2587_v21  ;;  %v2592_v25 = vld [vmem:[%s5983_s8 + $0x528] sm:$0xff]  ;;  %v2593_v21 = vld [vmem:[%s5983_s8 + $0x530] sm:$0xff] }
 0x74b   :  { %3557 = vmatmul.msk.f32.vlgmr.msra.gmra.mxu3 %vm1989_vm7, %v5028_v28  ;;  %3563 = vmatmul.msk.f32.vlgmr.msrb.gmra.mxu1 %vm1989_vm7, %v5050_v14  ;;  %v2727_v28 = vld [vmem:[%s5983_s8 + $0x6a0] sm:$0xff] }
 0x74c   :  { %2330 = vmatpush.msrb.mxu3 %v2258_v19  ;;  %3564 = vmatmul.msk.f32.vlgmr.msrb.gmra.mxu2 %vm1989_vm7, %v5050_v14  ;;  %v2350_v19 = vld [vmem:[%s5983_s8 + $0x318] sm:$0xff] }
 0x74d   :  { %2530 = vmatpush.msra.mxu1 %v2496_v42  ;;  %2550 = vmatpush.msra.mxu2 %v2497_v24  ;;  %v2831_v42 = vld [vmem:[%s5983_s8 + $0x720] sm:$0xff]  ;;  %v2588_v24 = vld [vmem:[%s5983_s8 + $0x508] sm:$0xff] }
 0x74e   :  { %3570 = vmatmul.msk.f32.vlgmr.msra.gmra.mxu0 %vm1989_vm7, %v5203_v27  ;;  %2331 = vmatpush.msrb.mxu3 %v2254_v23  ;;  %v2589_v23 = vld [vmem:[%s5983_s8 + $0x510] sm:$0xff] }
 0x74f   :  { %2750 = vmatpush.msrb.mxu0 %v2735_v29  ;;  %2531 = vmatpush.msra.mxu1 %v2492_v40  ;;  %v2827_v29 = vld [vmem:[%s5983_s8 + $0x700] sm:$0xff]  ;;  %v2498_v40 = vld [vmem:[%s5983_s8 + $0x4f8] sm:$0xff] }
 0x750   :  { %2551 = vmatpush.msra.mxu2 %v2493_v20  ;;  %2332 = vmatpush.msrb.mxu3 %v2250_v44  ;;  %v2736_v20 = vld [vmem:[%s5983_s8 + $0x6e8] sm:$0xff]  ;;  %v2737_v44 = vld [vmem:[%s5983_s8 + $0x6f0] sm:$0xff] }
 0x751   :  { %2751 = vmatpush.msrb.mxu0 %v2731_v46  ;;  %2532 = vmatpush.msra.mxu1 %v2488_v50  ;;  %v5413_v46 = vld [vmem:[#allocation2 + $0xe] sm:$0x3]  ;;  %v2494_v50 = vld [vmem:[%s5983_s8 + $0x4d8] sm:$0xff] }
 0x752   :  { %2552 = vmatpush.msra.mxu2 %v2489_v54  ;;  %2333 = vmatpush.msrb.mxu3 %v2246_v26  ;;  %v2732_v54 = vld [vmem:[%s5983_s8 + $0x6c8] sm:$0xff]  ;;  %v2733_v26 = vld [vmem:[%s5983_s8 + $0x6d0] sm:$0xff] }
 0x753   :  { %2752 = vmatpush.msrb.mxu0 %v2727_v28  ;;  %2533 = vmatpush.msra.mxu1 %v2484_v38  ;;  %v2490_v28 = vld [vmem:[%s5983_s8 + $0x4b8] sm:$0xff]  ;;  %v2971_v38 = vld [vmem:[%s5983_s8 + $0x8c0] sm:$0xff] }
 0x754   :  { %2553 = vmatpush.msra.mxu2 %v2485_v17  ;;  %2334 = vmatpush.msrb.mxu3 %v2242_v41  ;;  %v2728_v17 = vld [vmem:[%s5983_s8 + $0x6a8] sm:$0xff]  ;;  %v2729_v41 = vld [vmem:[%s5983_s8 + $0x6b0] sm:$0xff] }
 0x755   :  { %2753 = vmatpush.msrb.mxu0 %v2723_v53  ;;  %2534 = vmatpush.msra.mxu1 %v2480_v36  ;;  %v2486_v53 = vld [vmem:[%s5983_s8 + $0x498] sm:$0xff]  ;;  %v2967_v36 = vld [vmem:[%s5983_s8 + $0x8a0] sm:$0xff] }
 0x756   :  { %2554 = vmatpush.msra.mxu2 %v2481_v37  ;;  %2335 = vmatpush.msrb.mxu3 %v2238_v55  ;;  %v2724_v37 = vld [vmem:[%s5983_s8 + $0x688] sm:$0xff]  ;;  %v2725_v55 = vld [vmem:[%s5983_s8 + $0x690] sm:$0xff] }
 0x757   :  { %2754 = vmatpush.msrb.mxu0 %v2719_v15  ;;  %2535 = vmatpush.msra.mxu1 %v2476_v0  ;;  %v2482_v15 = vld [vmem:[%s5983_s8 + $0x478] sm:$0xff]  ;;  %v2963_v0 = vld [vmem:[%s5983_s8 + $0x880] sm:$0xff] }
 0x758   :  { %2555 = vmatpush.msra.mxu2 %v2477_v11  ;;  %2336 = vmatpush.msrb.mxu3 %v2234_v45  ;;  %v2720_v11 = vld [vmem:[%s5983_s8 + $0x668] sm:$0xff]  ;;  %v2721_v45 = vld [vmem:[%s5983_s8 + $0x670] sm:$0xff] }
 0x759   :  { %2755 = vmatpush.msrb.mxu0 %v2715_v8  ;;  %2536 = vmatpush.msra.mxu1 %v2472_v60  ;;  %v2478_v8 = vld [vmem:[%s5983_s8 + $0x458] sm:$0xff]  ;;  %v2959_v60 = vld [vmem:[%s5983_s8 + $0x860] sm:$0xff] }
 0x75a   :  { %2556 = vmatpush.msra.mxu2 %v2473_v39  ;;  %2337 = vmatpush.msrb.mxu3 %v2230_v1  ;;  %v2716_v39 = vld [vmem:[%s5983_s8 + $0x648] sm:$0xff]  ;;  %v2717_v1 = vld [vmem:[%s5983_s8 + $0x650] sm:$0xff] }
 0x75b   :  { %2756 = vmatpush.msrb.mxu0 %v2711_v12  ;;  %2537 = vmatpush.msra.mxu1 %v2468_v30  ;;  %v2955_v12 = vld [vmem:[%s5983_s8 + $0x840] sm:$0xff]  ;;  %v2712_v30 = vld [vmem:[%s5983_s8 + $0x628] sm:$0xff] }
 0x75c   :  { %2557 = vmatpush.msra.mxu2 %v2469_v18  ;;  %3561 = vmatmul.msk.f32.vlgmr.msrb.gmra.mxu3 %vm1989_vm7, %v4972_v6  ;;  %v2855_v6 = vld [vmem:[%s5983_s8 + $0x7e0] sm:$0xff]  ;;  %v2713_v18 = vld [vmem:[%s5983_s8 + $0x630] sm:$0xff] }
 0x75d   :  { %2757 = vmatpush.msrb.mxu0 %v2707_v2  ;;  %2450 = vmatpush.msra.mxu3 %v2378_v49  ;;  %v2470_v2 = vld [vmem:[%s5983_s8 + $0x418] sm:$0xff]  ;;  %v2951_v49 = vld [vmem:[%s5983_s8 + $0x820] sm:$0xff] }
 0x75e   :  { %3567 = vmatmul.msk.f32.vlgmr.msra.gmra.mxu1 %vm1989_vm7, %v5141_v57  ;;  %3568 = vmatmul.msk.f32.vlgmr.msra.gmra.mxu2 %vm1989_vm7, %v5141_v57 }
 0x75f   :  { %2650 = vmatpush.msrb.mxu1 %v2616_v61  ;;  %2670 = vmatpush.msrb.mxu2 %v2617_v63  ;;  %v2708_v61 = vld [vmem:[%s5983_s8 + $0x608] sm:$0xff]  ;;  %v2709_v63 = vld [vmem:[%s5983_s8 + $0x610] sm:$0xff] }
 0x760   :  { %3574 = vmatmul.msk.f32.vlgmr.msrb.gmra.mxu0 %vm1989_vm7, %v5307_v22  ;;  %2451 = vmatpush.msra.mxu3 %v2374_v13  ;;  %v2947_v13 = vld [vmem:[%s5983_s8 + $0x800] sm:$0xff] }
 0x761   :  { %2870 = vmatpush.msra.mxu0 %v2855_v6  ;;  %2651 = vmatpush.msrb.mxu1 %v2612_v3  ;;  %v2618_v6 = vld [vmem:[%s5983_s8 + $0x5f8] sm:$0xff]  ;;  %v2856_v3 = vld [vmem:[%s5983_s8 + $0x7e8] sm:$0xff] }
 0x762   :  { %2671 = vmatpush.msrb.mxu2 %v2613_v43  ;;  %2452 = vmatpush.msra.mxu3 %v2370_v10  ;;  %v2857_v43 = vld [vmem:[%s5983_s8 + $0x7f0] sm:$0xff] }
 0x763   :  { %2871 = vmatpush.msra.mxu0 %v2851_v58  ;;  %2652 = vmatpush.msrb.mxu1 %v2608_v59  ;;  %v5519_v10 = vld [vmem:[#allocation2 + $0x10] sm:$0x3]  ;;  %v2614_v58 = vld [vmem:[%s5983_s8 + $0x5d8] sm:$0xff] }
 0x764   :  { %2672 = vmatpush.msrb.mxu2 %v2609_v56  ;;  %2453 = vmatpush.msra.mxu3 %v2366_v9  ;;  %v2853_v59 = vld [vmem:[%s5983_s8 + $0x7d0] sm:$0xff]  ;;  %v2610_v56 = vld [vmem:[%s5983_s8 + $0x5b8] sm:$0xff]  ;;  %v2848_v9 = vld [vmem:[%s5983_s8 + $0x7a8] sm:$0xff] }
 0x765   :  { %2872 = vmatpush.msra.mxu0 %v2847_v7  ;;  %2653 = vmatpush.msrb.mxu1 %v2604_v5  ;;  %v2849_v7 = vld [vmem:[%s5983_s8 + $0x7b0] sm:$0xff]  ;;  %v2606_v5 = vld [vmem:[%s5983_s8 + $0x598] sm:$0xff] }
 0x766   :  { %2673 = vmatpush.msrb.mxu2 %v2605_v32  ;;  %2454 = vmatpush.msra.mxu3 %v2362_v47  ;;  %v2844_v32 = vld [vmem:[%s5983_s8 + $0x788] sm:$0xff]  ;;  %v2845_v47 = vld [vmem:[%s5983_s8 + $0x790] sm:$0xff] }
 0x767   :  { %2873 = vmatpush.msra.mxu0 %v2843_v33  ;;  %2654 = vmatpush.msrb.mxu1 %v2600_v62  ;;  %v2602_v33 = vld [vmem:[%s5983_s8 + $0x578] sm:$0xff]  ;;  %v2840_v62 = vld [vmem:[%s5983_s8 + $0x768] sm:$0xff] }
 0x768   :  { %2674 = vmatpush.msrb.mxu2 %v2601_v31  ;;  %2455 = vmatpush.msra.mxu3 %v2358_v34  ;;  %v2841_v31 = vld [vmem:[%s5983_s8 + $0x770] sm:$0xff]  ;;  %v2598_v34 = vld [vmem:[%s5983_s8 + $0x558] sm:$0xff] }
 0x769   :  { %2874 = vmatpush.msra.mxu0 %v2839_v35  ;;  %2655 = vmatpush.msrb.mxu1 %v2596_v51  ;;  %v2836_v35 = vld [vmem:[%s5983_s8 + $0x748] sm:$0xff]  ;;  %v2837_v51 = vld [vmem:[%s5983_s8 + $0x750] sm:$0xff] }
 0x76a   :  { %2675 = vmatpush.msrb.mxu2 %v2597_v16  ;;  %2456 = vmatpush.msra.mxu3 %v2354_v48  ;;  %v2594_v16 = vld [vmem:[%s5983_s8 + $0x538] sm:$0xff]  ;;  %v2832_v48 = vld [vmem:[%s5983_s8 + $0x728] sm:$0xff] }
 0x76b   :  { %2875 = vmatpush.msra.mxu0 %v2835_v52  ;;  %2656 = vmatpush.msrb.mxu1 %v2592_v25  ;;  %v2833_v52 = vld [vmem:[%s5983_s8 + $0x730] sm:$0xff]  ;;  %v2590_v25 = vld [vmem:[%s5983_s8 + $0x518] sm:$0xff] }
 0x76c   :  { %2676 = vmatpush.msrb.mxu2 %v2593_v21  ;;  %2457 = vmatpush.msra.mxu3 %v2350_v19  ;;  %v2828_v21 = vld [vmem:[%s5983_s8 + $0x708] sm:$0xff]  ;;  %v2829_v19 = vld [vmem:[%s5983_s8 + $0x710] sm:$0xff] }
 0x76d   :  { %2876 = vmatpush.msra.mxu0 %v2831_v42  ;;  %2657 = vmatpush.msrb.mxu1 %v2588_v24  ;;  %v2738_v42 = vld [vmem:[%s5983_s8 + $0x6f8] sm:$0xff]  ;;  %v2976_v24 = vld [vmem:[%s5983_s8 + $0x8e8] sm:$0xff] }
 0x76e   :  { %2677 = vmatpush.msrb.mxu2 %v2589_v23  ;;  %3565 = vmatmul.msk.f32.vlgmr.msra.gmra.mxu3 %vm1989_vm7, %v5050_v14  ;;  %v2975_v14 = vld [vmem:[%s5983_s8 + $0x8e0] sm:$0xff]  ;;  %v2977_v23 = vld [vmem:[%s5983_s8 + $0x8f0] sm:$0xff] }
 0x76f   :  { %2877 = vmatpush.msra.mxu0 %v2827_v29  ;;  %2570 = vmatpush.msrb.mxu3 %v2498_v40  ;;  %v2734_v29 = vld [vmem:[%s5983_s8 + $0x6d8] sm:$0xff]  ;;  %v2972_v40 = vld [vmem:[%s5983_s8 + $0x8c8] sm:$0xff] }
 0x770   :  { %3571 = vmatmul.msk.f32.vlgmr.msrb.gmra.mxu1 %vm1989_vm7, %v5203_v27  ;;  %3572 = vmatmul.msk.f32.vlgmr.msrb.gmra.mxu2 %vm1989_vm7, %v5203_v27 }
 0x771   :  { %2770 = vmatpush.msra.mxu1 %v2736_v20  ;;  %2790 = vmatpush.msra.mxu2 %v2737_v44  ;;  %v2973_v20 = vld [vmem:[%s5983_s8 + $0x8d0] sm:$0xff]  ;;  %v2968_v44 = vld [vmem:[%s5983_s8 + $0x8a8] sm:$0xff] }
 0x772   :  { %3578 = vmatmul.msk.f32.vlgmr.msra.gmra.mxu0 %vm1989_vm7, %v5413_v46  ;;  %2571 = vmatpush.msrb.mxu3 %v2494_v50  ;;  %v2969_v50 = vld [vmem:[%s5983_s8 + $0x8b0] sm:$0xff] }
 0x773   :  { %2990 = vmatpush.msrb.mxu0 %v2975_v14  ;;  %2771 = vmatpush.msra.mxu1 %v2732_v54  ;;  %v2726_v14 = vld [vmem:[%s5983_s8 + $0x698] sm:$0xff]  ;;  %v2964_v54 = vld [vmem:[%s5983_s8 + $0x888] sm:$0xff] }
 0x774   :  { %2791 = vmatpush.msra.mxu2 %v2733_v26  ;;  %2572 = vmatpush.msrb.mxu3 %v2490_v28  ;;  %v2965_v26 = vld [vmem:[%s5983_s8 + $0x890] sm:$0xff]  ;;  %v2722_v28 = vld [vmem:[%s5983_s8 + $0x678] sm:$0xff] }
 0x775   :  { %2991 = vmatpush.msrb.mxu0 %v2971_v38  ;;  %2772 = vmatpush.msra.mxu1 %v2728_v17  ;;  %v2960_v38 = vld [vmem:[%s5983_s8 + $0x868] sm:$0xff]  ;;  %v2961_v17 = vld [vmem:[%s5983_s8 + $0x870] sm:$0xff] }
 0x776   :  { %2792 = vmatpush.msra.mxu2 %v2729_v41  ;;  %2573 = vmatpush.msrb.mxu3 %v2486_v53  ;;  %v2718_v41 = vld [vmem:[%s5983_s8 + $0x658] sm:$0xff]  ;;  %v2956_v53 = vld [vmem:[%s5983_s8 + $0x848] sm:$0xff] }
 0x777   :  { %2992 = vmatpush.msrb.mxu0 %v2967_v36  ;;  %2773 = vmatpush.msra.mxu1 %v2724_v37  ;;  %v2957_v36 = vld [vmem:[%s5983_s8 + $0x850] sm:$0xff]  ;;  %v2714_v37 = vld [vmem:[%s5983_s8 + $0x638] sm:$0xff] }
 0x778   :  { %2793 = vmatpush.msra.mxu2 %v2725_v55  ;;  %2574 = vmatpush.msrb.mxu3 %v2482_v15  ;;  %v2952_v55 = vld [vmem:[%s5983_s8 + $0x828] sm:$0xff]  ;;  %v2953_v15 = vld [vmem:[%s5983_s8 + $0x830] sm:$0xff] }
 0x779   :  { %2993 = vmatpush.msrb.mxu0 %v2963_v0  ;;  %2774 = vmatpush.msra.mxu1 %v2720_v11  ;;  %v2710_v0 = vld [vmem:[%s5983_s8 + $0x618] sm:$0xff]  ;;  %v2948_v11 = vld [vmem:[%s5983_s8 + $0x808] sm:$0xff] }
 0x77a   :  { %2794 = vmatpush.msra.mxu2 %v2721_v45  ;;  %2575 = vmatpush.msrb.mxu3 %v2478_v8  ;;  %v2949_v45 = vld [vmem:[%s5983_s8 + $0x810] sm:$0xff]  ;;  %v2858_v8 = vld [vmem:[%s5983_s8 + $0x7f8] sm:$0xff] }
 0x77b   :  { %2994 = vmatpush.msrb.mxu0 %v2959_v60  ;;  %2775 = vmatpush.msra.mxu1 %v2716_v39  ;;  %v2854_v60 = vld [vmem:[%s5983_s8 + $0x7d8] sm:$0xff]  ;;  %v3082_v39 = vld [vmem:[%s5985_s10 + $0x8] sm:$0xff] }
 0x77c   :  { %2795 = vmatpush.msra.mxu2 %v2717_v1  ;;  %2576 = vmatpush.msrb.mxu3 %v2474_v4  ;;  %v2850_v1 = vld [vmem:[%s5983_s8 + $0x7b8] sm:$0xff]  ;;  %v3080_v4 = vld [vmem:[%s5986_s11] sm:$0x3] }
 0x77d   :  { %2995 = vmatpush.msrb.mxu0 %v2955_v12  ;;  %2776 = vmatpush.msra.mxu1 %v2712_v30  ;;  %v2846_v12 = vld [vmem:[%s5983_s8 + $0x798] sm:$0xff] }
 0x77e   :  { %2796 = vmatpush.msra.mxu2 %v2713_v18  ;;  %2577 = vmatpush.msrb.mxu3 %v2470_v2  ;;  %v2842_v30 = vld [vmem:[%s5983_s8 + $0x778] sm:$0xff] }
 0x77f   :  { %2996 = vmatpush.msrb.mxu0 %v2951_v49  ;;  %2777 = vmatpush.msra.mxu1 %v2708_v61  ;;  %v2838_v18 = vld [vmem:[%s5983_s8 + $0x758] sm:$0xff] }
 0x780   :  { %2797 = vmatpush.msra.mxu2 %v2709_v63  ;;  %3569 = vmatmul.msk.f32.vlgmr.msrb.gmra.mxu3 %vm1989_vm7, %v5141_v57  ;;  %v2852_v57 = vld [vmem:[%s5983_s8 + $0x7c8] sm:$0xff]  ;;  %v2834_v2 = vld [vmem:[%s5983_s8 + $0x738] sm:$0xff] }
 0x781   :  { %2997 = vmatpush.msrb.mxu0 %v2947_v13  ;;  %2690 = vmatpush.msra.mxu3 %v2618_v6  ;;  %v2830_v49 = vld [vmem:[%s5983_s8 + $0x718] sm:$0xff] }
 0x782   :  { %3575 = vmatmul.msk.f32.vlgmr.msra.gmra.mxu1 %vm1989_vm7, %v5307_v22  ;;  %3576 = vmatmul.msk.f32.vlgmr.msra.gmra.mxu2 %vm1989_vm7, %v5307_v22  ;;  %v2978_v61 = vld [vmem:[%s5983_s8 + $0x8f8] sm:$0xff] }
 0x783   :  { %2890 = vmatpush.msrb.mxu1 %v2856_v3  ;;  %2910 = vmatpush.msrb.mxu2 %v2857_v43  ;;  %v2974_v63 = vld [vmem:[%s5983_s8 + $0x8d8] sm:$0xff] }
 0x784   :  { %3582 = vmatmul.msk.f32.vlgmr.msrb.gmra.mxu0 %vm1989_vm7, %v5519_v10  ;;  %2691 = vmatpush.msra.mxu3 %v2614_v58  ;;  %v2970_v13 = vld [vmem:[%s5983_s8 + $0x8b8] sm:$0xff] }
 0x785   :  { %2891 = vmatpush.msrb.mxu1 %v2852_v57  ;;  %2911 = vmatpush.msrb.mxu2 %v2853_v59  ;;  %v2966_v6 = vld [vmem:[%s5983_s8 + $0x898] sm:$0xff]  ;;  %v3124_v59 = vld [vmem:[%s5988_s13 + $0x70] sm:$0xff] }
 0x786   :  { %2692 = vmatpush.msra.mxu3 %v2610_v56  ;;  %3101 = vmatpush.msra.mxu0 %v3082_v39  ;;  %v2962_v3 = vld [vmem:[%s5983_s8 + $0x878] sm:$0xff]  ;;  %v3123_v56 = vld [vmem:[%s5988_s13 + $0x68] sm:$0xff] }
 0x787   :  { %2892 = vmatpush.msrb.mxu1 %v2848_v9  ;;  %2912 = vmatpush.msrb.mxu2 %v2849_v7  ;;  %v2954_v43 = vld [vmem:[%s5983_s8 + $0x838] sm:$0xff]  ;;  %v3122_v9 = vld [vmem:[%s5988_s13 + $0x60] sm:$0xff] }
 0x788   :  { %2693 = vmatpush.msra.mxu3 %v2606_v5  ;;  %v3125_v58 = vld [vmem:[%s5988_s13 + $0x78] sm:$0xff]  ;;  %v3120_v5 = vld [vmem:[%s5988_s13 + $0x50] sm:$0xff] }
 0x789   :  { %2893 = vmatpush.msrb.mxu1 %v2844_v32  ;;  %2913 = vmatpush.msrb.mxu2 %v2845_v47  ;;  %v2950_v57 = vld [vmem:[%s5983_s8 + $0x818] sm:$0xff]  ;;  %v3118_v47 = vld [vmem:[%s5988_s13 + $0x40] sm:$0xff] }
 0x78a   :  { %2694 = vmatpush.msra.mxu3 %v2602_v33  ;;  %v3121_v7 = vld [vmem:[%s5988_s13 + $0x58] sm:$0xff] }
 0x78b   :  { %2894 = vmatpush.msrb.mxu1 %v2840_v62  ;;  %2914 = vmatpush.msrb.mxu2 %v2841_v31  ;;  %v3117_v33 = vld [vmem:[%s5988_s13 + $0x38] sm:$0xff]  ;;  %v3116_v62 = vld [vmem:[%s5988_s13 + $0x30] sm:$0xff] }
 0x78c   :  { %2695 = vmatpush.msra.mxu3 %v2598_v34  ;;  %v3115_v34 = vld [vmem:[%s5988_s13 + $0x28] sm:$0xff] }
 0x78d   :  { %2895 = vmatpush.msrb.mxu1 %v2836_v35  ;;  %2915 = vmatpush.msrb.mxu2 %v2837_v51  ;;  %v3114_v51 = vld [vmem:[%s5988_s13 + $0x20] sm:$0xff] }
 0x78e   :  { %2696 = vmatpush.msra.mxu3 %v2594_v16  ;;  %v3113_v16 = vld [vmem:[%s5988_s13 + $0x18] sm:$0xff] }
 0x78f   :  { %2896 = vmatpush.msrb.mxu1 %v2832_v48  ;;  %2916 = vmatpush.msrb.mxu2 %v2833_v52 }
 0x790   :  { %2697 = vmatpush.msra.mxu3 %v2590_v25 }
 0x791   :  { %2897 = vmatpush.msrb.mxu1 %v2828_v21  ;;  %2917 = vmatpush.msrb.mxu2 %v2829_v19  ;;  %v3112_v19 = vld [vmem:[%s5988_s13 + $0x10] sm:$0xff] }
 0x792   :  { %3573 = vmatmul.msk.f32.vlgmr.msra.gmra.mxu3 %vm1989_vm7, %v5203_v27  ;;  %3579 = vmatmul.msk.f32.vlgmr.msrb.gmra.mxu1 %vm1989_vm7, %v5413_v46  ;;  %v2730_v27 = vld [vmem:[%s5983_s8 + $0x6b8] sm:$0xff] }
 0x793   :  { %2810 = vmatpush.msrb.mxu3 %v2738_v42  ;;  %3580 = vmatmul.msk.f32.vlgmr.msrb.gmra.mxu2 %vm1989_vm7, %v5413_v46  ;;  %v3111_v42 = vld [vmem:[%s5988_s13 + $0x8] sm:$0xff] }
 0x794   :  { %3010 = vmatpush.msra.mxu1 %v2976_v24  ;;  %3030 = vmatpush.msra.mxu2 %v2977_v23  ;;  %v3141_v24 = vld [vmem:[%s5988_s13 + $0xf8] sm:$0xff]  ;;  %v3110_v23 = vld [vmem:[%s5988_s13] sm:$0xff] }
 0x795   :  { %2811 = vmatpush.msrb.mxu3 %v2734_v29 }
 0x796   :  { %3011 = vmatpush.msra.mxu1 %v2972_v40  ;;  %3031 = vmatpush.msra.mxu2 %v2973_v20  ;;  %v3140_v40 = vld [vmem:[%s5988_s13 + $0xf0] sm:$0xff]  ;;  %v3139_v20 = vld [vmem:[%s5988_s13 + $0xe8] sm:$0xff] }
 0x797   :  { %2812 = vmatpush.msrb.mxu3 %v2730_v27  ;;  %v3157_v27 = vld [vmem:[%s5988_s13 + $0x178] sm:$0xff] }
 0x798   :  { %3012 = vmatpush.msra.mxu1 %v2968_v44  ;;  %3032 = vmatpush.msra.mxu2 %v2969_v50  ;;  %v3156_v44 = vld [vmem:[%s5988_s13 + $0x170] sm:$0xff]  ;;  %v3138_v50 = vld [vmem:[%s5988_s13 + $0xe0] sm:$0xff] }
 0x799   :  { %2813 = vmatpush.msrb.mxu3 %v2726_v14 }
 0x79a   :  { %3013 = vmatpush.msra.mxu1 %v2964_v54  ;;  %3033 = vmatpush.msra.mxu2 %v2965_v26  ;;  %v3155_v26 = vld [vmem:[%s5988_s13 + $0x168] sm:$0xff] }
 0x79b   :  { %2814 = vmatpush.msrb.mxu3 %v2722_v28  ;;  %v3137_v28 = vld [vmem:[%s5988_s13 + $0xd8] sm:$0xff] }
 0x79c   :  { %3014 = vmatpush.msra.mxu1 %v2960_v38  ;;  %3034 = vmatpush.msra.mxu2 %v2961_v17  ;;  %v3136_v17 = vld [vmem:[%s5988_s13 + $0xd0] sm:$0xff] }
 0x79d   :  { %2815 = vmatpush.msrb.mxu3 %v2718_v41 }
 0x79e   :  { %3015 = vmatpush.msra.mxu1 %v2956_v53  ;;  %3035 = vmatpush.msra.mxu2 %v2957_v36 }
 0x79f   :  { %2816 = vmatpush.msrb.mxu3 %v2714_v37  ;;  %v3135_v37 = vld [vmem:[%s5988_s13 + $0xc8] sm:$0xff] }
 0x7a0   :  { %3016 = vmatpush.msra.mxu1 %v2952_v55  ;;  %3036 = vmatpush.msra.mxu2 %v2953_v15  ;;  %v3154_v55 = vld [vmem:[%s5988_s13 + $0x160] sm:$0xff] }
 0x7a1   :  { %2817 = vmatpush.msrb.mxu3 %v2710_v0  ;;  %v3134_v15 = vld [vmem:[%s5988_s13 + $0xc0] sm:$0xff] }
 0x7a2   :  { %3017 = vmatpush.msra.mxu1 %v2948_v11  ;;  %3037 = vmatpush.msra.mxu2 %v2949_v45  ;;  %v5774_v48 = vpop.f32.mrf.mxu1  ;;  %v3153_v11 = vld [vmem:[%s5988_s13 + $0x158] sm:$0xff] }
 0x7a3   :  { %3577 = vmatmul.msk.f32.vlgmr.msrb.gmra.mxu3 %vm1989_vm7, %v5307_v22  ;;  %3583 = vmatmul.msk.f32.vlgmr.msra.gmra.mxu1 %vm1989_vm7, %v5519_v10  ;;  %v3081_v22 = vld [vmem:[%s5985_s10] sm:$0xff]  ;;  %v3133_v45 = vld [vmem:[%s5988_s13 + $0xb8] sm:$0xff] }
 0x7a4   :  { %2930 = vmatpush.msra.mxu3 %v2858_v8  ;;  %3584 = vmatmul.msk.f32.vlgmr.msra.gmra.mxu2 %vm1989_vm7, %v5519_v10  ;;  %v2279_v32 = vpop.f32.mrf.mxu0  ;;  %v3152_v8 = vld [vmem:[%s5988_s13 + $0x150] sm:$0xff] }
 0x7a5   :  { %3102 = vmatpush.msra.mxu0 %v3081_v22  ;;  %3174 = vmatpush.msrb.mxu1 %v3125_v58  ;;  %v3151_v22 = vld [vmem:[%s5988_s13 + $0x148] sm:$0xff] }
 0x7a6   :  { %2931 = vmatpush.msra.mxu3 %v2854_v60  ;;  %3586 = vmatmul.msk.f32.vlgmr.msra.gmra.mxu0 %vm3083_vm9, %v3080_v4  ;;  %v3131_v4 = vld [vmem:[%s5988_s13 + $0xa8] sm:$0xff] }
 0x7a7   :  { %3175 = vmatpush.msrb.mxu1 %v3124_v59  ;;  %3194 = vmatpush.msrb.mxu2 %v3141_v24 }
 0x7a8   :  { %2932 = vmatpush.msra.mxu3 %v2850_v1  ;;  %v2080_v31 = vpop.f32.mrf.mxu3  ;;  %3214 = vmatpush.msrb.mxu0 %v3157_v27  ;;  %v3132_v1 = vld [vmem:[%s5988_s13 + $0xb0] sm:$0xff]  ;;  %v3169_v27 = vld [vmem:[%s5988_s13 + $0x1d8] sm:$0xff] }
 0x7a9   :  { %3176 = vmatpush.msrb.mxu1 %v3123_v56  ;;  %v5778_v21 = vpop.f32.mrf.mxu2  ;;  %3195 = vmatpush.msrb.mxu2 %v3140_v40 }
 0x7aa   :  { %2933 = vmatpush.msra.mxu3 %v2846_v12  ;;  %3215 = vmatpush.msrb.mxu0 %v3156_v44 }
 0x7ab   :  { %3177 = vmatpush.msrb.mxu1 %v3122_v9  ;;  %3196 = vmatpush.msrb.mxu2 %v3139_v20  ;;  %v3128_v9 = vld [vmem:[%s5988_s13 + $0x90] sm:$0xff] }
 0x7ac   :  { %2934 = vmatpush.msra.mxu3 %v2842_v30  ;;  %v5792_v29 = vpop.f32.mrf.mxu1  ;;  %3216 = vmatpush.msrb.mxu0 %v3155_v26 }
 0x7ad   :  { %3178 = vmatpush.msrb.mxu1 %v3121_v7  ;;  %3197 = vmatpush.msrb.mxu2 %v3138_v50  ;;  %v3147_v7 = vld [vmem:[%s5988_s13 + $0x128] sm:$0xff]  ;;  %v3168_v50 = vld [vmem:[%s5988_s13 + $0x1d0] sm:$0xff] }
 0x7ae   :  { %2935 = vmatpush.msra.mxu3 %v2838_v18  ;;  %3217 = vmatpush.msrb.mxu0 %v3154_v55  ;;  %v3150_v18 = vld [vmem:[%s5988_s13 + $0x140] sm:$0xff]  ;;  %v3164_v55 = vld [vmem:[%s5988_s13 + $0x1b0] sm:$0xff] }
 0x7af   :  { %3179 = vmatpush.msrb.mxu1 %v3120_v5  ;;  %v2399_v35 = vpop.f32.mrf.mxu0  ;;  %3198 = vmatpush.msrb.mxu2 %v3137_v28 }
 0x7b0   :  { %2936 = vmatpush.msra.mxu3 %v2834_v2  ;;  %3218 = vmatpush.msrb.mxu0 %v3153_v11  ;;  %v3163_v11 = vld [vmem:[%s5988_s13 + $0x1a8] sm:$0xff] }
 0x7b1   :  { %3199 = vmatpush.msrb.mxu2 %v3136_v17 }
 0x7b2   :  { %2937 = vmatpush.msra.mxu3 %v2830_v49  ;;  %v5776_v52 = vpop.f32.mrf.mxu3  ;;  %3219 = vmatpush.msrb.mxu0 %v3152_v8  ;;  %v3130_v49 = vld [vmem:[%s5988_s13 + $0xa0] sm:$0xff] }
 0x7b3   :  { %3581 = vmatmul.msk.f32.vlgmr.msra.gmra.mxu3 %vm1989_vm7, %v5413_v46  ;;  %v2958_v46 = vld [vmem:[%s5983_s8 + $0x858] sm:$0xff]  ;;  %v5818_v41 = vpop.f32.mrf.mxu2  ;;  %3200 = vmatpush.msrb.mxu2 %v3135_v37  ;;  %v2184_v44 = vadd.f32 %v5792_v29, %v5776_v52  ;;  %v3166_v52 = vld [vmem:[%s5988_s13 + $0x1c0] sm:$0xff] }
 0x7b4   :  { %3050 = vmatpush.msrb.mxu3 %v2978_v61  ;;  %3220 = vmatpush.msrb.mxu0 %v3151_v22  ;;  %v3149_v61 = vld [vmem:[%s5988_s13 + $0x138] sm:$0xff] }
 0x7b5   :  { %3201 = vmatpush.msrb.mxu2 %v3134_v15 }
 0x7b6   :  { %3051 = vmatpush.msrb.mxu3 %v2974_v63  ;;  %3221 = vmatpush.msrb.mxu0 %v3150_v18  ;;  %v3129_v63 = vld [vmem:[%s5988_s13 + $0x98] sm:$0xff] }
 0x7b7   :  { %3202 = vmatpush.msrb.mxu2 %v3133_v45 }
 0x7b8   :  { %3052 = vmatpush.msrb.mxu3 %v2970_v13  ;;  %v5820_v53 = vpop.f32.mrf.mxu1  ;;  %v3148_v13 = vld [vmem:[%s5988_s13 + $0x130] sm:$0xff]  ;;  %3222 = vmatpush.msrb.mxu0 %v3149_v61 }
 0x7b9   :  { %3203 = vmatpush.msrb.mxu2 %v3132_v1 }
 0x7ba   :  { %3053 = vmatpush.msrb.mxu3 %v2966_v6  ;;  %3223 = vmatpush.msrb.mxu0 %v3148_v13 }
 0x7bb   :  { %3204 = vmatpush.msrb.mxu2 %v3131_v4 }
 0x7bc   :  { %3054 = vmatpush.msrb.mxu3 %v2962_v3  ;;  %v5871_v3 = vld [vmem:[%s5984_s9] sm:$0xf]  ;;  %3224 = vmatpush.msrb.mxu0 %v3147_v7 }
 0x7bd   :  { %v2163_v14 = vpop.f32.mrf.mxu3  ;;  %3205 = vmatpush.msrb.mxu2 %v3130_v49  ;;  %v3068_v59 = vperm.slane %v5871_v3, 0  ;;  %v3160_v49 = vld [vmem:[%s5988_s13 + $0x190] sm:$0xff]  ;;  %v3070_v13 = vperm.slane %v5871_v3, 2 }
 0x7be   :  { %3055 = vmatpush.msrb.mxu3 %v2958_v46  ;;  %v2164_v38 = vadd.f32 %v2163_v14, %v2080_v31  ;;  %v2343_v14 = vadd.f32 %v5820_v53, %v2184_v44  ;;  %v3165_v53 = vld [vmem:[%s5988_s13 + $0x1b8] sm:$0xff] }
 0x7bf   :  { %v5840_v39 = vpop.f32.mrf.mxu2  ;;  %3206 = vmatpush.msrb.mxu2 %v3129_v63 }
 0x7c0   :  { %3056 = vmatpush.msrb.mxu3 %v2954_v43  ;;  %v2519_v25 = vpop.f32.mrf.mxu0  ;;  %v2342_v36 = vadd.f32 %v2279_v32, %v2164_v38  ;;  %v3127_v32 = vld [vmem:[%s5988_s13 + $0x88] sm:$0xff] }
 0x7c1   :  { %3207 = vmatpush.msrb.mxu2 %v3128_v9  ;;  %v3167_v38 = vld [vmem:[%s5988_s13 + $0x1c8] sm:$0xff]  ;;  %v3107_v9 = vld [vmem:[%s5987_s12] sm:$0xff] }
 0x7c2   :  { %3057 = vmatpush.msrb.mxu3 %v2950_v57  ;;  %v2462_v60 = vadd.f32 %v2399_v35, %v2342_v36  ;;  %v2204_v36 = vadd.f32 %v5818_v41, %v5774_v48  ;;  %v3069_v48 = vperm.slane %v5871_v3, 1  ;;  %v3162_v41 = vld [vmem:[%s5988_s13 + $0x1a0] sm:$0xff] }
 0x7c3   :  { %3585 = vmatmul.msk.f32.vlgmr.msrb.gmra.mxu3 %vm1989_vm7, %v5519_v10  ;;  %v3119_v10 = vld [vmem:[%s5988_s13 + $0x48] sm:$0xff]  ;;  %3208 = vmatpush.msrb.mxu2 %v3127_v32 }
 0x7c4   :  { %3180 = vmatpush.msrb.mxu1 %v3119_v10  ;;  %v2582_v12 = vadd.f32 %v2519_v25, %v2462_v60  ;;  %v3146_v10 = vld [vmem:[%s5988_s13 + $0x120] sm:$0xff]  ;;  %v3173_v25 = vld [vmem:[%s5988_s13 + $0x1f8] sm:$0xff]  ;;  %v2344_v15 = vadd.f32 %v5840_v39, %v2204_v36 }
 0x7c5   :  { %3225 = vmatpush.msrb.mxu0 %v3146_v10  ;;  %3234 = vmatpush.msra.mxu3 %v3173_v25 }
 0x7c6   :  { %3181 = vmatpush.msrb.mxu1 %v3118_v47  ;;  %v3126_v47 = vld [vmem:[%s5988_s13 + $0x80] sm:$0xff] }
 0x7c7   :  { %3209 = vmatpush.msrb.mxu2 %v3126_v47 }
 0x7c8   :  { %3182 = vmatpush.msrb.mxu1 %v3117_v33  ;;  %v5851_v30 = vpop.f32.mrf.mxu1 }
 0x7c9   :  { %v2463_v26 = vadd.f32 %v5851_v30, %v2343_v14  ;;  %v3599_v14 = vld [vmem:[#allocation3] ss:$0 sm:$0xff] }
 0x7ca   :  { %3183 = vmatpush.msrb.mxu1 %v3116_v62  ;;  %v3145_v62 = vld [vmem:[%s5988_s13 + $0x118] sm:$0xff] }
 0x7cb   :  { %v2639_v54 = vpop.f32.mrf.mxu0  ;;  %3226 = vmatpush.msrb.mxu0 %v3145_v62 }
 0x7cc   :  { %3184 = vmatpush.msrb.mxu1 %v3115_v34  ;;  %v2702_v6 = vadd.f32 %v2639_v54, %v2582_v12  ;;  %v3144_v34 = vld [vmem:[%s5988_s13 + $0x110] sm:$0xff]  ;;  %v3161_v12 = vld [vmem:[%s5988_s13 + $0x198] sm:$0xff] }
 0x7cd   :  { %3227 = vmatpush.msrb.mxu0 %v3144_v34 }
 0x7ce   :  { %3185 = vmatpush.msrb.mxu1 %v3114_v51  ;;  %v3143_v51 = vld [vmem:[%s5988_s13 + $0x108] sm:$0xff]  ;;  %v5910_v24 = vpop.f32.mrf.mxu3 }
 0x7cf   :  { %v2439_v43 = vpop.f32.mrf.mxu2  ;;  %3228 = vmatpush.msrb.mxu0 %v3143_v51  ;;  %v2224_v10 = vadd.f32 %v5910_v24, %v5778_v21 }
 0x7d0   :  { %3186 = vmatpush.msrb.mxu1 %v3113_v16  ;;  %v3142_v16 = vld [vmem:[%s5988_s13 + $0x100] sm:$0xff]  ;;  %v2464_v45 = vadd.f32 %v2439_v43, %v2344_v15 }
 0x7d1   :  { %3229 = vmatpush.msrb.mxu0 %v3142_v16  ;;  %v3071_v16 = vperm.slane %v5871_v3, 3 }
 0x7d2   :  { %3187 = vmatpush.msrb.mxu1 %v3112_v19  ;;  %v3172_v19 = vld [vmem:[%s5988_s13 + $0x1f0] sm:$0xff] }
 0x7d3   :  { %3235 = vmatpush.msra.mxu3 %v3172_v19 }
 0x7d4   :  { %3188 = vmatpush.msrb.mxu1 %v3111_v42  ;;  %v3171_v42 = vld [vmem:[%s5988_s13 + $0x1e8] sm:$0xff] }
 0x7d5   :  { %3236 = vmatpush.msra.mxu3 %v3171_v42 }
 0x7d6   :  { %3189 = vmatpush.msrb.mxu1 %v3110_v23  ;;  %v3170_v23 = vld [vmem:[%s5988_s13 + $0x1e0] sm:$0xff] }
 0x7d7   :  { %3237 = vmatpush.msra.mxu3 %v3170_v23 }
 0x7d9   :  { %3238 = vmatpush.msra.mxu3 %v3169_v27 }
 0x7db   :  { %v2539_v58 = vpop.f32.mrf.mxu1  ;;  %3239 = vmatpush.msra.mxu3 %v3168_v50 }
 0x7dc   :  { %v2583_v17 = vadd.f32 %v2539_v58, %v2463_v26  ;;  %v3158_v58 = vld [vmem:[%s5988_s13 + $0x180] sm:$0xff] }
 0x7dd   :  { %v2759_v0 = vpop.f32.mrf.mxu0  ;;  %3240 = vmatpush.msra.mxu3 %v3167_v38 }
 0x7de   :  { %v2822_v46 = vadd.f32 %v2759_v0, %v2702_v6 }
 0x7df   :  { %v2339_v54 = vpop.f32.mrf.mxu3  ;;  %3241 = vmatpush.msra.mxu3 %v3166_v52 }
 0x7e0   :  { %v2345_v47 = vadd.f32 %v2339_v54, %v2224_v10 }
 0x7e1   :  { %v2559_v31 = vpop.f32.mrf.mxu2  ;;  %3242 = vmatpush.msra.mxu3 %v3165_v53 }
 0x7e2   :  { %v2584_v22 = vadd.f32 %v2559_v31, %v2464_v45 }
 0x7e3   :  { %3243 = vmatpush.msra.mxu3 %v3164_v55 }
 0x7e5   :  { %3244 = vmatpush.msra.mxu3 %v3163_v11 }
 0x7e7   :  { %3245 = vmatpush.msra.mxu3 %v3162_v41 }
 0x7e9   :  { %3246 = vmatpush.msra.mxu3 %v3161_v12 }
 0x7eb   :  { %3247 = vmatpush.msra.mxu3 %v3160_v49 }
 0x7ed   :  { %v2659_v35 = vpop.f32.mrf.mxu1 }
 0x7ee   :  { %v2703_v37 = vadd.f32 %v2659_v35, %v2583_v17 }
 0x7ef   :  { %v2879_v2 = vpop.f32.mrf.mxu0 }
 0x7f0   :  { %v2942_v57 = vadd.f32 %v2879_v2, %v2822_v46  ;;  %v3159_v46 = vld [vmem:[%s5988_s13 + $0x188] sm:$0xff] }
 0x7f1   :  { %v2459_v8 = vpop.f32.mrf.mxu3  ;;  %3248 = vmatpush.msra.mxu3 %v3159_v46 }
 0x7f3   :  { %v2679_v40 = vpop.f32.mrf.mxu2  ;;  %3249 = vmatpush.msra.mxu3 %v3158_v58 }
 0x7f4   :  { %v2704_v30 = vadd.f32 %v2679_v40, %v2584_v22 }
 0x7ff   :  { %v2779_v20 = vpop.f32.mrf.mxu1 }
 0x800   :  { %v2823_v0 = vadd.f32 %v2779_v20, %v2703_v37 }
 0x801   :  { %v2999_v56 = vpop.f32.mrf.mxu0 }
 0x802   :  { %v3062_v5 = vadd.f32 %v2999_v56, %v2942_v57  ;;  %v3108_v56 = vld [vmem:[%s5987_s12 + $0x8] sm:$0xff] }
 0x803   :  { %v2579_v61 = vpop.f32.mrf.mxu3 }
 0x804   :  { %v3076_v33 = vadd.f32 %v3068_v59, %v3062_v5  ;;  %v3109_v59 = vld [vmem:[%s5987_s12 + $0x10] sm:$0xf] }
 0x805   :  { %v2799_v28 = vpop.f32.mrf.mxu2  ;;  %3587 = vmatpush.msk.msra.mxu1 %vm3258_vm10, %v3109_v59 }
 0x806   :  { %3190 = vmatmul.f32.vlgmr.msrb.gmra.mxu1 %v3076_v33  ;;  %v2824_v2 = vadd.f32 %v2799_v28, %v2704_v30  ;;  %v2465_v33 = vadd.f32 %v2459_v8, %v2345_v47 }
 0x807   :  { %3276 = vmatpush.msra.mxu1 %v3108_v56 }
 0x808   :  { %v2585_v31 = vadd.f32 %v2579_v61, %v2465_v33 }
 0x809   :  { %3277 = vmatpush.msra.mxu1 %v3107_v9 }
 0x80f   :  { %v2899_v29 = vpop.f32.mrf.mxu1 }
 0x810   :  { %v2943_v60 = vadd.f32 %v2899_v29, %v2823_v0 }
 0x815   :  { %v2699_v7 = vpop.f32.mrf.mxu3 }
 0x816   :  { %v2919_v1 = vpop.f32.mrf.mxu2  ;;  %v2705_v34 = vadd.f32 %v2699_v7, %v2585_v31 }
 0x817   :  { %v2944_v63 = vadd.f32 %v2919_v1, %v2824_v2 }
 0x820   :  { %v3019_v4 = vpop.f32.mrf.mxu1 }
 0x821   :  { %v3063_v39 = vadd.f32 %v3019_v4, %v2943_v60 }
 0x823   :  { %v3077_v18 = vadd.f32 %v3069_v48, %v3063_v39  ;;  %v3104_v5 = vpop.f32.mrf.mxu0 }
 0x824   :  { %3588 = vmatmul.msk.f32.vlgmr.msra.gmra.mxu1 %vm3254_vm11, %v3104_v5 }
 0x825   :  { %3210 = vmatmul.f32.vlgmr.msrb.gmra.mxu2 %v3077_v18 }
 0x826   :  { %v2819_v32 = vpop.f32.mrf.mxu3 }
 0x827   :  { %v3039_v6 = vpop.f32.mrf.mxu2  ;;  %v2825_v35 = vadd.f32 %v2819_v32, %v2705_v34 }
 0x828   :  { %v3064_v43 = vadd.f32 %v3039_v6, %v2944_v63 }
 0x82a   :  { %v3078_v57 = vadd.f32 %v3070_v13, %v3064_v43 }
 0x82c   :  { %3230 = vmatmul.f32.vlgmr.msrb.gmra.mxu0 %v3078_v57 }
 0x836   :  { %v2939_v62 = vpop.f32.mrf.mxu3 }
 0x837   :  { %v2945_v51 = vadd.f32 %v2939_v62, %v2825_v35 }
 0x846   :  { %v3059_v25 = vpop.f32.mrf.mxu3 }
 0x847   :  { %v3065_v19 = vadd.f32 %v3059_v25, %v2945_v51 }
 0x849   :  { %v3079_v42 = vadd.f32 %v3071_v16, %v3065_v19 }
 0x84b   :  { %3250 = vmatmul.f32.vlgmr.msra.gmra.mxu3 %v3079_v42 }
 0x883   :  { %v3191_v23 = vpop.f32.mrf.mxu1 }
 0x8a1   :  { %v3279_v21 = vpop.f32.mrf.mxu1 }
 0x8a8   :  { %v3211_v40 = vpop.f32.mrf.mxu2 }
 0x8a9   :  { %v3212_v20 = vadd.f32 %v3211_v40, %v3191_v23  ;;  %v3231_v27 = vpop.f32.mrf.mxu0 }
 0x8ab   :  { %v3232_v44 = vadd.f32 %v3231_v27, %v3212_v20 }
 0x8ce   :  { %v3251_v50 = vpop.f32.mrf.mxu3 }
 0x8cf   :  { %v3252_v24 = vadd.f32 %v3251_v50, %v3232_v44 }
 0x8d1   :  { %v3280_v54 = vadd.f32 %v3279_v21, %v3252_v24 }
 0x8d3   :  { %v3286_v26 = vadd.f32 %v3599_v14, %v3280_v54 }
 0x8d5   :  { %3288 = vst.msk [vmem:[%s5990_s15] sm:$0x3] %vm3287_vm12, %v3286_v26 }
 0x8d6   :  { %3293 = vsyncpa [#allocation5], 1 }
 0x8d7   :  { %3294 = vsyncpa [#allocation7], 1 }
 0x8d8   :  { %3295 = vsyncpa [#allocation10], 1 }

</bundles_post_ra>
